<compile_context>
chip_gen: v7x
topology: tpu7x:2x2x1
jax: 0.10.0
libtpu: 0.0.40
codegen_flags: <defaults>
</compile_context>

<pallas_src>
import functools

import jax
import jax.numpy as jnp
from jax.experimental import pallas as pl
from jax.experimental.pallas import tpu as pltpu


def _spatial_attention_kernel(x_ref, w_ref, o_ref, pad_ref, *,
                              TB, C, H, W, K, P, WPAD):
    # x_ref:   (TB, C, H, W)            VMEM
    # w_ref:   (2*K*K,)                 SMEM (scalar conv weights)
    # o_ref:   (TB, 1, H, W)            VMEM
    # pad_ref: (TB, 2, H + 2P, WPAD)    VMEM scratch (zero-padded feature map)

    # Re-zero the padded scratch every step (only ~2*TB*Hp*WPAD/1024 vregs of
    # stores).  No cross-step state => batch grid axis is safely "parallel".
    pad_ref[...] = jnp.zeros_like(pad_ref)

    inv_c = 1.0 / float(C)

    # Channel mean / max -> interior of the padded 2-channel feature map.
    for b in range(TB):
        xb = x_ref[b].astype(jnp.float32)                 # (C, H, W)
        pad_ref[b, 0, P:P + H, P:P + W] = jnp.sum(xb, axis=0) * inv_c
        pad_ref[b, 1, P:P + H, P:P + W] = jnp.max(xb, axis=0)

    # KxK "same" conv (cross-correlation, no bias) + sigmoid.
    for b in range(TB):
        # 4 independent partial accumulators (channel x dy parity).
        accs = [jnp.zeros((H, WPAD), jnp.float32) for _ in range(4)]
        for c in range(2):
            for dy in range(K):
                # One row-block load per (c, dy): (H, WPAD), full lane width.
                row = pad_ref[b, c, dy:dy + H, :]
                a = 2 * c + (dy & 1)
                for dx in range(K):
                    w = w_ref[c * K * K + dy * K + dx]    # scalar from SMEM
                    if dx == 0:
                        shifted = row
                    else:
                        # shifted[:, j] == row[:, j + dx] for j < W (lane roll
                        # on the XLU; wrapped lanes land beyond column W and
                        # are discarded below).
                        shifted = pltpu.roll(row, WPAD - dx, axis=1)
                    accs[a] = accs[a] + w * shifted
        acc = (accs[0] + accs[1]) + (accs[2] + accs[3])
        o_ref[b, 0] = jax.nn.sigmoid(acc[:, :W]).astype(o_ref.dtype)


def spatial_attention(x, weight, *, kernel_size=7, batch_tile=None):
    """x: (N, C, H, W), weight: (1, 2, K, K) -> (N, 1, H, W) (same dtype as x)."""
    assert kernel_size in (3, 7), "kernel size must be 3 or 7"
    K = kernel_size
    P = 3 if K == 7 else 1
    N, C, H, W = x.shape
    assert weight.shape == (1, 2, K, K)

    Hp = H + 2 * P
    WPAD = max(128, ((W + 2 * P + 127) // 128) * 128)     # lane-aligned scratch width

    # Batch tile: pack as many images per grid step as fit a modest VMEM
    # budget (caps the unrolled code size at 8 images/step).
    if batch_tile is None:
        per_b = (2 * C * H * W + 2 * H * W + 2 * Hp * WPAD) * 4
        budget = 8 * 1024 * 1024
        batch_tile = max(1, min(N, 8, budget // max(per_b, 1)))
    TB = max(1, min(N, batch_tile))
    while N % TB:                                          # TB must divide N
        TB -= 1
    num_steps = N // TB

    w_flat = weight.reshape(2 * K * K).astype(jnp.float32)

    x_spec = pl.BlockSpec((TB, C, H, W), lambda n: (n, 0, 0, 0))
    w_spec = pl.BlockSpec(memory_space=pltpu.MemorySpace.SMEM)
    out_spec = pl.BlockSpec((TB, 1, H, W), lambda n: (n, 0, 0, 0))

    kernel = functools.partial(_spatial_attention_kernel,
                               TB=TB, C=C, H=H, W=W, K=K, P=P, WPAD=WPAD)

    # Advisory cost estimate (mean+max reductions + conv MACs; sigmoid -> EUP).
    elem = x.dtype.itemsize
    cost = pl.CostEstimate(
        flops=int(N * H * W * (2 * C + 4 * K * K)),
        transcendentals=int(N * H * W),
        bytes_accessed=int(x.size * elem + N * H * W * elem + w_flat.size * 4),
    )

    return pl.pallas_call(
        kernel,
        out_shape=jax.ShapeDtypeStruct((N, 1, H, W), x.dtype),
        grid_spec=pltpu.PrefetchScalarGridSpec(
            num_scalar_prefetch=0,
            grid=(num_steps,),
            in_specs=[x_spec, w_spec],
            out_specs=out_spec,
            scratch_shapes=[pltpu.VMEM((TB, 2, Hp, WPAD), jnp.float32)],
        ),
        compiler_params=pltpu.CompilerParams(
            # Each grid step is fully independent (scratch re-zeroed per step),
            # so the batch axis can shard across TensorCores on v7x.
            dimension_semantics=("parallel",),
            # Explicit scoped-VMEM cap with headroom; safely below v7x's
            # 64 MiB physical VMEM and ample on v5e/v6e.
            vmem_limit_bytes=32 * 1024 * 1024,
        ),
        cost_estimate=cost,
    )(x, w_flat)


def _reference(x, weight, kernel_size=7):
    # Pure-JAX reference reproducing the PyTorch forward.
    P = 3 if kernel_size == 7 else 1
    avg_out = jnp.mean(x, axis=1, keepdims=True)
    max_out = jnp.max(x, axis=1, keepdims=True)
    feat = jnp.concatenate([avg_out, max_out], axis=1)          # (N, 2, H, W)
    out = jax.lax.conv_general_dilated(
        feat, weight, window_strides=(1, 1), padding=[(P, P), (P, P)],
        dimension_numbers=("NCHW", "OIHW", "NCHW"))
    return jax.nn.sigmoid(out)


if __name__ == "__main__":
    key = jax.random.PRNGKey(0)
    kx, kw = jax.random.split(key)

    N, C, H, W = 2, 4, 16, 16
    K = 7

    x = jax.random.normal(kx, (N, C, H, W), dtype=jnp.float32)
    # Deterministic conv weight init (kaiming-uniform-like bound, fan_in=2*K*K).
    bound = 1.0 / jnp.sqrt(2.0 * K * K)
    weight = jax.random.uniform(kw, (1, 2, K, K), dtype=jnp.float32,
                                minval=-bound, maxval=bound)

    out = spatial_attention(x, weight, kernel_size=K)
    out = jax.block_until_ready(out)

    ref = _reference(x, weight, kernel_size=K)
    assert out.shape == (N, 1, H, W)
    assert jnp.allclose(out, ref, atol=1e-5, rtol=1e-5), "mismatch vs reference"

    print("KERNEL_OK")
</pallas_src>

<mosaic_0001>
module attributes {stable_mosaic.version = 11 : i64} {
  func.func @_spatial_attention_kernel(%arg0: i32, %arg1: memref<2x4x16x16xf32, #tpu.memory_space<vmem>>, %arg2: memref<98xf32, #tpu.memory_space<smem>>, %arg3: memref<2x1x16x16xf32, #tpu.memory_space<vmem>>, %arg4: memref<2x2x22x128xf32, #tpu.memory_space<vmem>>) attributes {dimension_semantics = [#tpu.dimension_semantics<parallel>], iteration_bounds = array<i64: 1>, scalar_prefetch = 0 : i64, scratch_operands = 1 : i64, tpu.core_type = #tpu.core_type<tc>, window_params = [{transform_indices = @transform_0, window_bounds = array<i64: 2, 4, 16, 16>}, {transform_indices = @transform_1, window_bounds = array<i64: 98>}, {transform_indices = @transform_2, window_bounds = array<i64: 2, 1, 16, 16>}]} {
    %cst = arith.constant 0.000000e+00 : f32
    %0 = vector.broadcast %cst : f32 to vector<2x2x22x128xf32>
    %c0 = arith.constant 0 : index
    %c0_0 = arith.constant 0 : index
    %c0_1 = arith.constant 0 : index
    %c0_2 = arith.constant 0 : index
    %1 = vector.load %arg4[%c0, %c0_0, %c0_1, %c0_2] : memref<2x2x22x128xf32, #tpu.memory_space<vmem>>, vector<2x2x22x128xf32>
    tpu.vector_store %arg4[%c0, %c0_0, %c0_1, %c0_2], %0 {strides = array<i32>} : memref<2x2x22x128xf32, #tpu.memory_space<vmem>>, vector<2x2x22x128xf32>,
    %c0_3 = arith.constant 0 : index
    %c0_4 = arith.constant 0 : index
    %c0_5 = arith.constant 0 : index
    %c0_6 = arith.constant 0 : index
    %2 = vector.load %arg1[%c0_3, %c0_4, %c0_5, %c0_6] : memref<2x4x16x16xf32, #tpu.memory_space<vmem>>, vector<1x4x16x16xf32>
    %3 = vector.shape_cast %2 : vector<1x4x16x16xf32> to vector<4x16x16xf32>
    %cst_7 = arith.constant dense<0.000000e+00> : vector<16x16xf32>
    %4 = vector.multi_reduction <add>, %3, %cst_7 [0] : vector<4x16x16xf32> to vector<16x16xf32>
    %cst_8 = arith.constant 2.500000e-01 : f32
    %5 = vector.broadcast %cst_8 : f32 to vector<16x16xf32>
    %6 = arith.mulf %4, %5 : vector<16x16xf32>
    %c0_9 = arith.constant 0 : index
    %c0_10 = arith.constant 0 : index
    %c3 = arith.constant 3 : index
    %c3_11 = arith.constant 3 : index
    %7 = vector.load %arg4[%c0_9, %c0_10, %c3, %c3_11] : memref<2x2x22x128xf32, #tpu.memory_space<vmem>>, vector<1x1x16x16xf32>
    %8 = vector.shape_cast %7 : vector<1x1x16x16xf32> to vector<16x16xf32>
    %9 = vector.shape_cast %6 : vector<16x16xf32> to vector<1x1x16x16xf32>
    tpu.vector_store %arg4[%c0_9, %c0_10, %c3, %c3_11], %9 {strides = array<i32>} : memref<2x2x22x128xf32, #tpu.memory_space<vmem>>, vector<1x1x16x16xf32>,
    %cst_12 = arith.constant dense<0xFF800000> : vector<16x16xf32>
    %10 = vector.multi_reduction <maximumf>, %3, %cst_12 [0] : vector<4x16x16xf32> to vector<16x16xf32>
    %c0_13 = arith.constant 0 : index
    %c1 = arith.constant 1 : index
    %c3_14 = arith.constant 3 : index
    %c3_15 = arith.constant 3 : index
    %11 = vector.load %arg4[%c0_13, %c1, %c3_14, %c3_15] : memref<2x2x22x128xf32, #tpu.memory_space<vmem>>, vector<1x1x16x16xf32>
    %12 = vector.shape_cast %11 : vector<1x1x16x16xf32> to vector<16x16xf32>
    %13 = vector.shape_cast %10 : vector<16x16xf32> to vector<1x1x16x16xf32>
    tpu.vector_store %arg4[%c0_13, %c1, %c3_14, %c3_15], %13 {strides = array<i32>} : memref<2x2x22x128xf32, #tpu.memory_space<vmem>>, vector<1x1x16x16xf32>,
    %c1_16 = arith.constant 1 : index
    %c0_17 = arith.constant 0 : index
    %c0_18 = arith.constant 0 : index
    %c0_19 = arith.constant 0 : index
    %14 = vector.load %arg1[%c1_16, %c0_17, %c0_18, %c0_19] : memref<2x4x16x16xf32, #tpu.memory_space<vmem>>, vector<1x4x16x16xf32>
    %15 = vector.shape_cast %14 : vector<1x4x16x16xf32> to vector<4x16x16xf32>
    %cst_20 = arith.constant dense<0.000000e+00> : vector<16x16xf32>
    %16 = vector.multi_reduction <add>, %15, %cst_20 [0] : vector<4x16x16xf32> to vector<16x16xf32>
    %cst_21 = arith.constant 2.500000e-01 : f32
    %17 = vector.broadcast %cst_21 : f32 to vector<16x16xf32>
    %18 = arith.mulf %16, %17 : vector<16x16xf32>
    %c1_22 = arith.constant 1 : index
    %c0_23 = arith.constant 0 : index
    %c3_24 = arith.constant 3 : index
    %c3_25 = arith.constant 3 : index
    %19 = vector.load %arg4[%c1_22, %c0_23, %c3_24, %c3_25] : memref<2x2x22x128xf32, #tpu.memory_space<vmem>>, vector<1x1x16x16xf32>
    %20 = vector.shape_cast %19 : vector<1x1x16x16xf32> to vector<16x16xf32>
    %21 = vector.shape_cast %18 : vector<16x16xf32> to vector<1x1x16x16xf32>
    tpu.vector_store %arg4[%c1_22, %c0_23, %c3_24, %c3_25], %21 {strides = array<i32>} : memref<2x2x22x128xf32, #tpu.memory_space<vmem>>, vector<1x1x16x16xf32>,
    %cst_26 = arith.constant dense<0xFF800000> : vector<16x16xf32>
    %22 = vector.multi_reduction <maximumf>, %15, %cst_26 [0] : vector<4x16x16xf32> to vector<16x16xf32>
    %c1_27 = arith.constant 1 : index
    %c1_28 = arith.constant 1 : index
    %c3_29 = arith.constant 3 : index
    %c3_30 = arith.constant 3 : index
    %23 = vector.load %arg4[%c1_27, %c1_28, %c3_29, %c3_30] : memref<2x2x22x128xf32, #tpu.memory_space<vmem>>, vector<1x1x16x16xf32>
    %24 = vector.shape_cast %23 : vector<1x1x16x16xf32> to vector<16x16xf32>
    %25 = vector.shape_cast %22 : vector<16x16xf32> to vector<1x1x16x16xf32>
    tpu.vector_store %arg4[%c1_27, %c1_28, %c3_29, %c3_30], %25 {strides = array<i32>} : memref<2x2x22x128xf32, #tpu.memory_space<vmem>>, vector<1x1x16x16xf32>,
    %cst_31 = arith.constant 0.000000e+00 : f32
    %26 = vector.broadcast %cst_31 : f32 to vector<16x128xf32>
    %cst_32 = arith.constant 0.000000e+00 : f32
    %27 = vector.broadcast %cst_32 : f32 to vector<16x128xf32>
    %cst_33 = arith.constant 0.000000e+00 : f32
    %28 = vector.broadcast %cst_33 : f32 to vector<16x128xf32>
    %cst_34 = arith.constant 0.000000e+00 : f32
    %29 = vector.broadcast %cst_34 : f32 to vector<16x128xf32>
    %c0_35 = arith.constant 0 : index
    %c0_36 = arith.constant 0 : index
    %c0_37 = arith.constant 0 : index
    %c0_38 = arith.constant 0 : index
    %30 = vector.load %arg4[%c0_35, %c0_36, %c0_37, %c0_38] : memref<2x2x22x128xf32, #tpu.memory_space<vmem>>, vector<1x1x16x128xf32>
    %31 = vector.shape_cast %30 : vector<1x1x16x128xf32> to vector<16x128xf32>
    %c0_39 = arith.constant 0 : index
    %32 = memref.load %arg2[%c0_39] : memref<98xf32, #tpu.memory_space<smem>>
    %33 = vector.broadcast %32 : f32 to vector<16x128xf32>
    %34 = arith.mulf %33, %31 : vector<16x128xf32>
    %35 = arith.addf %26, %34 : vector<16x128xf32>
    %c1_40 = arith.constant 1 : index
    %36 = memref.load %arg2[%c1_40] : memref<98xf32, #tpu.memory_space<smem>>
    %c127_i32 = arith.constant 127 : i32
    %37 = tpu.dynamic_rotate %31 by %c127_i32 dim 1 : vector<16x128xf32>, i32 -> vector<16x128xf32>
    %38 = vector.broadcast %36 : f32 to vector<16x128xf32>
    %39 = arith.mulf %38, %37 : vector<16x128xf32>
    %40 = arith.addf %35, %39 : vector<16x128xf32>
    %c2 = arith.constant 2 : index
    %41 = memref.load %arg2[%c2] : memref<98xf32, #tpu.memory_space<smem>>
    %c126_i32 = arith.constant 126 : i32
    %42 = tpu.dynamic_rotate %31 by %c126_i32 dim 1 : vector<16x128xf32>, i32 -> vector<16x128xf32>
    %43 = vector.broadcast %41 : f32 to vector<16x128xf32>
    %44 = arith.mulf %43, %42 : vector<16x128xf32>
    %45 = arith.addf %40, %44 : vector<16x128xf32>
    %c3_41 = arith.constant 3 : index
    %46 = memref.load %arg2[%c3_41] : memref<98xf32, #tpu.memory_space<smem>>
    %c125_i32 = arith.constant 125 : i32
    %47 = tpu.dynamic_rotate %31 by %c125_i32 dim 1 : vector<16x128xf32>, i32 -> vector<16x128xf32>
    %48 = vector.broadcast %46 : f32 to vector<16x128xf32>
    %49 = arith.mulf %48, %47 : vector<16x128xf32>
    %50 = arith.addf %45, %49 : vector<16x128xf32>
    %c4 = arith.constant 4 : index
    %51 = memref.load %arg2[%c4] : memref<98xf32, #tpu.memory_space<smem>>
    %c124_i32 = arith.constant 124 : i32
    %52 = tpu.dynamic_rotate %31 by %c124_i32 dim 1 : vector<16x128xf32>, i32 -> vector<16x128xf32>
    %53 = vector.broadcast %51 : f32 to vector<16x128xf32>
    %54 = arith.mulf %53, %52 : vector<16x128xf32>
    %55 = arith.addf %50, %54 : vector<16x128xf32>
    %c5 = arith.constant 5 : index
    %56 = memref.load %arg2[%c5] : memref<98xf32, #tpu.memory_space<smem>>
    %c123_i32 = arith.constant 123 : i32
    %57 = tpu.dynamic_rotate %31 by %c123_i32 dim 1 : vector<16x128xf32>, i32 -> vector<16x128xf32>
    %58 = vector.broadcast %56 : f32 to vector<16x128xf32>
    %59 = arith.mulf %58, %57 : vector<16x128xf32>
    %60 = arith.addf %55, %59 : vector<16x128xf32>
    %c6 = arith.constant 6 : index
    %61 = memref.load %arg2[%c6] : memref<98xf32, #tpu.memory_space<smem>>
    %c122_i32 = arith.constant 122 : i32
    %62 = tpu.dynamic_rotate %31 by %c122_i32 dim 1 : vector<16x128xf32>, i32 -> vector<16x128xf32>
    %63 = vector.broadcast %61 : f32 to vector<16x128xf32>
    %64 = arith.mulf %63, %62 : vector<16x128xf32>
    %65 = arith.addf %60, %64 : vector<16x128xf32>
    %c0_42 = arith.constant 0 : index
    %c0_43 = arith.constant 0 : index
    %c1_44 = arith.constant 1 : index
    %c0_45 = arith.constant 0 : index
    %66 = vector.load %arg4[%c0_42, %c0_43, %c1_44, %c0_45] : memref<2x2x22x128xf32, #tpu.memory_space<vmem>>, vector<1x1x16x128xf32>
    %67 = vector.shape_cast %66 : vector<1x1x16x128xf32> to vector<16x128xf32>
    %c7 = arith.constant 7 : index
    %68 = memref.load %arg2[%c7] : memref<98xf32, #tpu.memory_space<smem>>
    %69 = vector.broadcast %68 : f32 to vector<16x128xf32>
    %70 = arith.mulf %69, %67 : vector<16x128xf32>
    %71 = arith.addf %27, %70 : vector<16x128xf32>
    %c8 = arith.constant 8 : index
    %72 = memref.load %arg2[%c8] : memref<98xf32, #tpu.memory_space<smem>>
    %c127_i32_46 = arith.constant 127 : i32
    %73 = tpu.dynamic_rotate %67 by %c127_i32_46 dim 1 : vector<16x128xf32>, i32 -> vector<16x128xf32>
    %74 = vector.broadcast %72 : f32 to vector<16x128xf32>
    %75 = arith.mulf %74, %73 : vector<16x128xf32>
    %76 = arith.addf %71, %75 : vector<16x128xf32>
    %c9 = arith.constant 9 : index
    %77 = memref.load %arg2[%c9] : memref<98xf32, #tpu.memory_space<smem>>
    %c126_i32_47 = arith.constant 126 : i32
    %78 = tpu.dynamic_rotate %67 by %c126_i32_47 dim 1 : vector<16x128xf32>, i32 -> vector<16x128xf32>
    %79 = vector.broadcast %77 : f32 to vector<16x128xf32>
    %80 = arith.mulf %79, %78 : vector<16x128xf32>
    %81 = arith.addf %76, %80 : vector<16x128xf32>
    %c10 = arith.constant 10 : index
    %82 = memref.load %arg2[%c10] : memref<98xf32, #tpu.memory_space<smem>>
    %c125_i32_48 = arith.constant 125 : i32
    %83 = tpu.dynamic_rotate %67 by %c125_i32_48 dim 1 : vector<16x128xf32>, i32 -> vector<16x128xf32>
    %84 = vector.broadcast %82 : f32 to vector<16x128xf32>
    %85 = arith.mulf %84, %83 : vector<16x128xf32>
    %86 = arith.addf %81, %85 : vector<16x128xf32>
    %c11 = arith.constant 11 : index
    %87 = memref.load %arg2[%c11] : memref<98xf32, #tpu.memory_space<smem>>
    %c124_i32_49 = arith.constant 124 : i32
    %88 = tpu.dynamic_rotate %67 by %c124_i32_49 dim 1 : vector<16x128xf32>, i32 -> vector<16x128xf32>
    %89 = vector.broadcast %87 : f32 to vector<16x128xf32>
    %90 = arith.mulf %89, %88 : vector<16x128xf32>
    %91 = arith.addf %86, %90 : vector<16x128xf32>
    %c12 = arith.constant 12 : index
    %92 = memref.load %arg2[%c12] : memref<98xf32, #tpu.memory_space<smem>>
    %c123_i32_50 = arith.constant 123 : i32
    %93 = tpu.dynamic_rotate %67 by %c123_i32_50 dim 1 : vector<16x128xf32>, i32 -> vector<16x128xf32>
    %94 = vector.broadcast %92 : f32 to vector<16x128xf32>
    %95 = arith.mulf %94, %93 : vector<16x128xf32>
    %96 = arith.addf %91, %95 : vector<16x128xf32>
    %c13 = arith.constant 13 : index
    %97 = memref.load %arg2[%c13] : memref<98xf32, #tpu.memory_space<smem>>
    %c122_i32_51 = arith.constant 122 : i32
    %98 = tpu.dynamic_rotate %67 by %c122_i32_51 dim 1 : vector<16x128xf32>, i32 -> vector<16x128xf32>
    %99 = vector.broadcast %97 : f32 to vector<16x128xf32>
    %100 = arith.mulf %99, %98 : vector<16x128xf32>
    %101 = arith.addf %96, %100 : vector<16x128xf32>
    %c0_52 = arith.constant 0 : index
    %c0_53 = arith.constant 0 : index
    %c2_54 = arith.constant 2 : index
    %c0_55 = arith.constant 0 : index
    %102 = vector.load %arg4[%c0_52, %c0_53, %c2_54, %c0_55] : memref<2x2x22x128xf32, #tpu.memory_space<vmem>>, vector<1x1x16x128xf32>
    %103 = vector.shape_cast %102 : vector<1x1x16x128xf32> to vector<16x128xf32>
    %c14 = arith.constant 14 : index
    %104 = memref.load %arg2[%c14] : memref<98xf32, #tpu.memory_space<smem>>
    %105 = vector.broadcast %104 : f32 to vector<16x128xf32>
    %106 = arith.mulf %105, %103 : vector<16x128xf32>
    %107 = arith.addf %65, %106 : vector<16x128xf32>
    %c15 = arith.constant 15 : index
    %108 = memref.load %arg2[%c15] : memref<98xf32, #tpu.memory_space<smem>>
    %c127_i32_56 = arith.constant 127 : i32
    %109 = tpu.dynamic_rotate %103 by %c127_i32_56 dim 1 : vector<16x128xf32>, i32 -> vector<16x128xf32>
    %110 = vector.broadcast %108 : f32 to vector<16x128xf32>
    %111 = arith.mulf %110, %109 : vector<16x128xf32>
    %112 = arith.addf %107, %111 : vector<16x128xf32>
    %c16 = arith.constant 16 : index
    %113 = memref.load %arg2[%c16] : memref<98xf32, #tpu.memory_space<smem>>
    %c126_i32_57 = arith.constant 126 : i32
    %114 = tpu.dynamic_rotate %103 by %c126_i32_57 dim 1 : vector<16x128xf32>, i32 -> vector<16x128xf32>
    %115 = vector.broadcast %113 : f32 to vector<16x128xf32>
    %116 = arith.mulf %115, %114 : vector<16x128xf32>
    %117 = arith.addf %112, %116 : vector<16x128xf32>
    %c17 = arith.constant 17 : index
    %118 = memref.load %arg2[%c17] : memref<98xf32, #tpu.memory_space<smem>>
    %c125_i32_58 = arith.constant 125 : i32
    %119 = tpu.dynamic_rotate %103 by %c125_i32_58 dim 1 : vector<16x128xf32>, i32 -> vector<16x128xf32>
    %120 = vector.broadcast %118 : f32 to vector<16x128xf32>
    %121 = arith.mulf %120, %119 : vector<16x128xf32>
    %122 = arith.addf %117, %121 : vector<16x128xf32>
    %c18 = arith.constant 18 : index
    %123 = memref.load %arg2[%c18] : memref<98xf32, #tpu.memory_space<smem>>
    %c124_i32_59 = arith.constant 124 : i32
    %124 = tpu.dynamic_rotate %103 by %c124_i32_59 dim 1 : vector<16x128xf32>, i32 -> vector<16x128xf32>
    %125 = vector.broadcast %123 : f32 to vector<16x128xf32>
    %126 = arith.mulf %125, %124 : vector<16x128xf32>
    %127 = arith.addf %122, %126 : vector<16x128xf32>
    %c19 = arith.constant 19 : index
    %128 = memref.load %arg2[%c19] : memref<98xf32, #tpu.memory_space<smem>>
    %c123_i32_60 = arith.constant 123 : i32
    %129 = tpu.dynamic_rotate %103 by %c123_i32_60 dim 1 : vector<16x128xf32>, i32 -> vector<16x128xf32>
    %130 = vector.broadcast %128 : f32 to vector<16x128xf32>
    %131 = arith.mulf %130, %129 : vector<16x128xf32>
    %132 = arith.addf %127, %131 : vector<16x128xf32>
    %c20 = arith.constant 20 : index
    %133 = memref.load %arg2[%c20] : memref<98xf32, #tpu.memory_space<smem>>
    %c122_i32_61 = arith.constant 122 : i32
    %134 = tpu.dynamic_rotate %103 by %c122_i32_61 dim 1 : vector<16x128xf32>, i32 -> vector<16x128xf32>
    %135 = vector.broadcast %133 : f32 to vector<16x128xf32>
    %136 = arith.mulf %135, %134 : vector<16x128xf32>
    %137 = arith.addf %132, %136 : vector<16x128xf32>
    %c0_62 = arith.constant 0 : index
    %c0_63 = arith.constant 0 : index
    %c3_64 = arith.constant 3 : index
    %c0_65 = arith.constant 0 : index
    %138 = vector.load %arg4[%c0_62, %c0_63, %c3_64, %c0_65] : memref<2x2x22x128xf32, #tpu.memory_space<vmem>>, vector<1x1x16x128xf32>
    %139 = vector.shape_cast %138 : vector<1x1x16x128xf32> to vector<16x128xf32>
    %c21 = arith.constant 21 : index
    %140 = memref.load %arg2[%c21] : memref<98xf32, #tpu.memory_space<smem>>
    %141 = vector.broadcast %140 : f32 to vector<16x128xf32>
    %142 = arith.mulf %141, %139 : vector<16x128xf32>
    %143 = arith.addf %101, %142 : vector<16x128xf32>
    %c22 = arith.constant 22 : index
    %144 = memref.load %arg2[%c22] : memref<98xf32, #tpu.memory_space<smem>>
    %c127_i32_66 = arith.constant 127 : i32
    %145 = tpu.dynamic_rotate %139 by %c127_i32_66 dim 1 : vector<16x128xf32>, i32 -> vector<16x128xf32>
    %146 = vector.broadcast %144 : f32 to vector<16x128xf32>
    %147 = arith.mulf %146, %145 : vector<16x128xf32>
    %148 = arith.addf %143, %147 : vector<16x128xf32>
    %c23 = arith.constant 23 : index
    %149 = memref.load %arg2[%c23] : memref<98xf32, #tpu.memory_space<smem>>
    %c126_i32_67 = arith.constant 126 : i32
    %150 = tpu.dynamic_rotate %139 by %c126_i32_67 dim 1 : vector<16x128xf32>, i32 -> vector<16x128xf32>
    %151 = vector.broadcast %149 : f32 to vector<16x128xf32>
    %152 = arith.mulf %151, %150 : vector<16x128xf32>
    %153 = arith.addf %148, %152 : vector<16x128xf32>
    %c24 = arith.constant 24 : index
    %154 = memref.load %arg2[%c24] : memref<98xf32, #tpu.memory_space<smem>>
    %c125_i32_68 = arith.constant 125 : i32
    %155 = tpu.dynamic_rotate %139 by %c125_i32_68 dim 1 : vector<16x128xf32>, i32 -> vector<16x128xf32>
    %156 = vector.broadcast %154 : f32 to vector<16x128xf32>
    %157 = arith.mulf %156, %155 : vector<16x128xf32>
    %158 = arith.addf %153, %157 : vector<16x128xf32>
    %c25 = arith.constant 25 : index
    %159 = memref.load %arg2[%c25] : memref<98xf32, #tpu.memory_space<smem>>
    %c124_i32_69 = arith.constant 124 : i32
    %160 = tpu.dynamic_rotate %139 by %c124_i32_69 dim 1 : vector<16x128xf32>, i32 -> vector<16x128xf32>
    %161 = vector.broadcast %159 : f32 to vector<16x128xf32>
    %162 = arith.mulf %161, %160 : vector<16x128xf32>
    %163 = arith.addf %158, %162 : vector<16x128xf32>
    %c26 = arith.constant 26 : index
    %164 = memref.load %arg2[%c26] : memref<98xf32, #tpu.memory_space<smem>>
    %c123_i32_70 = arith.constant 123 : i32
    %165 = tpu.dynamic_rotate %139 by %c123_i32_70 dim 1 : vector<16x128xf32>, i32 -> vector<16x128xf32>
    %166 = vector.broadcast %164 : f32 to vector<16x128xf32>
    %167 = arith.mulf %166, %165 : vector<16x128xf32>
    %168 = arith.addf %163, %167 : vector<16x128xf32>
    %c27 = arith.constant 27 : index
    %169 = memref.load %arg2[%c27] : memref<98xf32, #tpu.memory_space<smem>>
    %c122_i32_71 = arith.constant 122 : i32
    %170 = tpu.dynamic_rotate %139 by %c122_i32_71 dim 1 : vector<16x128xf32>, i32 -> vector<16x128xf32>
    %171 = vector.broadcast %169 : f32 to vector<16x128xf32>
    %172 = arith.mulf %171, %170 : vector<16x128xf32>
    %173 = arith.addf %168, %172 : vector<16x128xf32>
    %c0_72 = arith.constant 0 : index
    %c0_73 = arith.constant 0 : index
    %c4_74 = arith.constant 4 : index
    %c0_75 = arith.constant 0 : index
    %174 = vector.load %arg4[%c0_72, %c0_73, %c4_74, %c0_75] : memref<2x2x22x128xf32, #tpu.memory_space<vmem>>, vector<1x1x16x128xf32>
    %175 = vector.shape_cast %174 : vector<1x1x16x128xf32> to vector<16x128xf32>
    %c28 = arith.constant 28 : index
    %176 = memref.load %arg2[%c28] : memref<98xf32, #tpu.memory_space<smem>>
    %177 = vector.broadcast %176 : f32 to vector<16x128xf32>
    %178 = arith.mulf %177, %175 : vector<16x128xf32>
    %179 = arith.addf %137, %178 : vector<16x128xf32>
    %c29 = arith.constant 29 : index
    %180 = memref.load %arg2[%c29] : memref<98xf32, #tpu.memory_space<smem>>
    %c127_i32_76 = arith.constant 127 : i32
    %181 = tpu.dynamic_rotate %175 by %c127_i32_76 dim 1 : vector<16x128xf32>, i32 -> vector<16x128xf32>
    %182 = vector.broadcast %180 : f32 to vector<16x128xf32>
    %183 = arith.mulf %182, %181 : vector<16x128xf32>
    %184 = arith.addf %179, %183 : vector<16x128xf32>
    %c30 = arith.constant 30 : index
    %185 = memref.load %arg2[%c30] : memref<98xf32, #tpu.memory_space<smem>>
    %c126_i32_77 = arith.constant 126 : i32
    %186 = tpu.dynamic_rotate %175 by %c126_i32_77 dim 1 : vector<16x128xf32>, i32 -> vector<16x128xf32>
    %187 = vector.broadcast %185 : f32 to vector<16x128xf32>
    %188 = arith.mulf %187, %186 : vector<16x128xf32>
    %189 = arith.addf %184, %188 : vector<16x128xf32>
    %c31 = arith.constant 31 : index
    %190 = memref.load %arg2[%c31] : memref<98xf32, #tpu.memory_space<smem>>
    %c125_i32_78 = arith.constant 125 : i32
    %191 = tpu.dynamic_rotate %175 by %c125_i32_78 dim 1 : vector<16x128xf32>, i32 -> vector<16x128xf32>
    %192 = vector.broadcast %190 : f32 to vector<16x128xf32>
    %193 = arith.mulf %192, %191 : vector<16x128xf32>
    %194 = arith.addf %189, %193 : vector<16x128xf32>
    %c32 = arith.constant 32 : index
    %195 = memref.load %arg2[%c32] : memref<98xf32, #tpu.memory_space<smem>>
    %c124_i32_79 = arith.constant 124 : i32
    %196 = tpu.dynamic_rotate %175 by %c124_i32_79 dim 1 : vector<16x128xf32>, i32 -> vector<16x128xf32>
    %197 = vector.broadcast %195 : f32 to vector<16x128xf32>
    %198 = arith.mulf %197, %196 : vector<16x128xf32>
    %199 = arith.addf %194, %198 : vector<16x128xf32>
    %c33 = arith.constant 33 : index
    %200 = memref.load %arg2[%c33] : memref<98xf32, #tpu.memory_space<smem>>
    %c123_i32_80 = arith.constant 123 : i32
    %201 = tpu.dynamic_rotate %175 by %c123_i32_80 dim 1 : vector<16x128xf32>, i32 -> vector<16x128xf32>
    %202 = vector.broadcast %200 : f32 to vector<16x128xf32>
    %203 = arith.mulf %202, %201 : vector<16x128xf32>
    %204 = arith.addf %199, %203 : vector<16x128xf32>
    %c34 = arith.constant 34 : index
    %205 = memref.load %arg2[%c34] : memref<98xf32, #tpu.memory_space<smem>>
    %c122_i32_81 = arith.constant 122 : i32
    %206 = tpu.dynamic_rotate %175 by %c122_i32_81 dim 1 : vector<16x128xf32>, i32 -> vector<16x128xf32>
    %207 = vector.broadcast %205 : f32 to vector<16x128xf32>
    %208 = arith.mulf %207, %206 : vector<16x128xf32>
    %209 = arith.addf %204, %208 : vector<16x128xf32>
    %c0_82 = arith.constant 0 : index
    %c0_83 = arith.constant 0 : index
    %c5_84 = arith.constant 5 : index
    %c0_85 = arith.constant 0 : index
    %210 = vector.load %arg4[%c0_82, %c0_83, %c5_84, %c0_85] : memref<2x2x22x128xf32, #tpu.memory_space<vmem>>, vector<1x1x16x128xf32>
    %211 = vector.shape_cast %210 : vector<1x1x16x128xf32> to vector<16x128xf32>
    %c35 = arith.constant 35 : index
    %212 = memref.load %arg2[%c35] : memref<98xf32, #tpu.memory_space<smem>>
    %213 = vector.broadcast %212 : f32 to vector<16x128xf32>
    %214 = arith.mulf %213, %211 : vector<16x128xf32>
    %215 = arith.addf %173, %214 : vector<16x128xf32>
    %c36 = arith.constant 36 : index
    %216 = memref.load %arg2[%c36] : memref<98xf32, #tpu.memory_space<smem>>
    %c127_i32_86 = arith.constant 127 : i32
    %217 = tpu.dynamic_rotate %211 by %c127_i32_86 dim 1 : vector<16x128xf32>, i32 -> vector<16x128xf32>
    %218 = vector.broadcast %216 : f32 to vector<16x128xf32>
    %219 = arith.mulf %218, %217 : vector<16x128xf32>
    %220 = arith.addf %215, %219 : vector<16x128xf32>
    %c37 = arith.constant 37 : index
    %221 = memref.load %arg2[%c37] : memref<98xf32, #tpu.memory_space<smem>>
    %c126_i32_87 = arith.constant 126 : i32
    %222 = tpu.dynamic_rotate %211 by %c126_i32_87 dim 1 : vector<16x128xf32>, i32 -> vector<16x128xf32>
    %223 = vector.broadcast %221 : f32 to vector<16x128xf32>
    %224 = arith.mulf %223, %222 : vector<16x128xf32>
    %225 = arith.addf %220, %224 : vector<16x128xf32>
    %c38 = arith.constant 38 : index
    %226 = memref.load %arg2[%c38] : memref<98xf32, #tpu.memory_space<smem>>
    %c125_i32_88 = arith.constant 125 : i32
    %227 = tpu.dynamic_rotate %211 by %c125_i32_88 dim 1 : vector<16x128xf32>, i32 -> vector<16x128xf32>
    %228 = vector.broadcast %226 : f32 to vector<16x128xf32>
    %229 = arith.mulf %228, %227 : vector<16x128xf32>
    %230 = arith.addf %225, %229 : vector<16x128xf32>
    %c39 = arith.constant 39 : index
    %231 = memref.load %arg2[%c39] : memref<98xf32, #tpu.memory_space<smem>>
    %c124_i32_89 = arith.constant 124 : i32
    %232 = tpu.dynamic_rotate %211 by %c124_i32_89 dim 1 : vector<16x128xf32>, i32 -> vector<16x128xf32>
    %233 = vector.broadcast %231 : f32 to vector<16x128xf32>
    %234 = arith.mulf %233, %232 : vector<16x128xf32>
    %235 = arith.addf %230, %234 : vector<16x128xf32>
    %c40 = arith.constant 40 : index
    %236 = memref.load %arg2[%c40] : memref<98xf32, #tpu.memory_space<smem>>
    %c123_i32_90 = arith.constant 123 : i32
    %237 = tpu.dynamic_rotate %211 by %c123_i32_90 dim 1 : vector<16x128xf32>, i32 -> vector<16x128xf32>
    %238 = vector.broadcast %236 : f32 to vector<16x128xf32>
    %239 = arith.mulf %238, %237 : vector<16x128xf32>
    %240 = arith.addf %235, %239 : vector<16x128xf32>
    %c41 = arith.constant 41 : index
    %241 = memref.load %arg2[%c41] : memref<98xf32, #tpu.memory_space<smem>>
    %c122_i32_91 = arith.constant 122 : i32
    %242 = tpu.dynamic_rotate %211 by %c122_i32_91 dim 1 : vector<16x128xf32>, i32 -> vector<16x128xf32>
    %243 = vector.broadcast %241 : f32 to vector<16x128xf32>
    %244 = arith.mulf %243, %242 : vector<16x128xf32>
    %245 = arith.addf %240, %244 : vector<16x128xf32>
    %c0_92 = arith.constant 0 : index
    %c0_93 = arith.constant 0 : index
    %c6_94 = arith.constant 6 : index
    %c0_95 = arith.constant 0 : index
    %246 = vector.load %arg4[%c0_92, %c0_93, %c6_94, %c0_95] : memref<2x2x22x128xf32, #tpu.memory_space<vmem>>, vector<1x1x16x128xf32>
    %247 = vector.shape_cast %246 : vector<1x1x16x128xf32> to vector<16x128xf32>
    %c42 = arith.constant 42 : index
    %248 = memref.load %arg2[%c42] : memref<98xf32, #tpu.memory_space<smem>>
    %249 = vector.broadcast %248 : f32 to vector<16x128xf32>
    %250 = arith.mulf %249, %247 : vector<16x128xf32>
    %251 = arith.addf %209, %250 : vector<16x128xf32>
    %c43 = arith.constant 43 : index
    %252 = memref.load %arg2[%c43] : memref<98xf32, #tpu.memory_space<smem>>
    %c127_i32_96 = arith.constant 127 : i32
    %253 = tpu.dynamic_rotate %247 by %c127_i32_96 dim 1 : vector<16x128xf32>, i32 -> vector<16x128xf32>
    %254 = vector.broadcast %252 : f32 to vector<16x128xf32>
    %255 = arith.mulf %254, %253 : vector<16x128xf32>
    %256 = arith.addf %251, %255 : vector<16x128xf32>
    %c44 = arith.constant 44 : index
    %257 = memref.load %arg2[%c44] : memref<98xf32, #tpu.memory_space<smem>>
    %c126_i32_97 = arith.constant 126 : i32
    %258 = tpu.dynamic_rotate %247 by %c126_i32_97 dim 1 : vector<16x128xf32>, i32 -> vector<16x128xf32>
    %259 = vector.broadcast %257 : f32 to vector<16x128xf32>
    %260 = arith.mulf %259, %258 : vector<16x128xf32>
    %261 = arith.addf %256, %260 : vector<16x128xf32>
    %c45 = arith.constant 45 : index
    %262 = memref.load %arg2[%c45] : memref<98xf32, #tpu.memory_space<smem>>
    %c125_i32_98 = arith.constant 125 : i32
    %263 = tpu.dynamic_rotate %247 by %c125_i32_98 dim 1 : vector<16x128xf32>, i32 -> vector<16x128xf32>
    %264 = vector.broadcast %262 : f32 to vector<16x128xf32>
    %265 = arith.mulf %264, %263 : vector<16x128xf32>
    %266 = arith.addf %261, %265 : vector<16x128xf32>
    %c46 = arith.constant 46 : index
    %267 = memref.load %arg2[%c46] : memref<98xf32, #tpu.memory_space<smem>>
    %c124_i32_99 = arith.constant 124 : i32
    %268 = tpu.dynamic_rotate %247 by %c124_i32_99 dim 1 : vector<16x128xf32>, i32 -> vector<16x128xf32>
    %269 = vector.broadcast %267 : f32 to vector<16x128xf32>
    %270 = arith.mulf %269, %268 : vector<16x128xf32>
    %271 = arith.addf %266, %270 : vector<16x128xf32>
    %c47 = arith.constant 47 : index
    %272 = memref.load %arg2[%c47] : memref<98xf32, #tpu.memory_space<smem>>
    %c123_i32_100 = arith.constant 123 : i32
    %273 = tpu.dynamic_rotate %247 by %c123_i32_100 dim 1 : vector<16x128xf32>, i32 -> vector<16x128xf32>
    %274 = vector.broadcast %272 : f32 to vector<16x128xf32>
    %275 = arith.mulf %274, %273 : vector<16x128xf32>
    %276 = arith.addf %271, %275 : vector<16x128xf32>
    %c48 = arith.constant 48 : index
    %277 = memref.load %arg2[%c48] : memref<98xf32, #tpu.memory_space<smem>>
    %c122_i32_101 = arith.constant 122 : i32
    %278 = tpu.dynamic_rotate %247 by %c122_i32_101 dim 1 : vector<16x128xf32>, i32 -> vector<16x128xf32>
    %279 = vector.broadcast %277 : f32 to vector<16x128xf32>
    %280 = arith.mulf %279, %278 : vector<16x128xf32>
    %281 = arith.addf %276, %280 : vector<16x128xf32>
    %c0_102 = arith.constant 0 : index
    %c1_103 = arith.constant 1 : index
    %c0_104 = arith.constant 0 : index
    %c0_105 = arith.constant 0 : index
    %282 = vector.load %arg4[%c0_102, %c1_103, %c0_104, %c0_105] : memref<2x2x22x128xf32, #tpu.memory_space<vmem>>, vector<1x1x16x128xf32>
    %283 = vector.shape_cast %282 : vector<1x1x16x128xf32> to vector<16x128xf32>
    %c49 = arith.constant 49 : index
    %284 = memref.load %arg2[%c49] : memref<98xf32, #tpu.memory_space<smem>>
    %285 = vector.broadcast %284 : f32 to vector<16x128xf32>
    %286 = arith.mulf %285, %283 : vector<16x128xf32>
    %287 = arith.addf %28, %286 : vector<16x128xf32>
    %c50 = arith.constant 50 : index
    %288 = memref.load %arg2[%c50] : memref<98xf32, #tpu.memory_space<smem>>
    %c127_i32_106 = arith.constant 127 : i32
    %289 = tpu.dynamic_rotate %283 by %c127_i32_106 dim 1 : vector<16x128xf32>, i32 -> vector<16x128xf32>
    %290 = vector.broadcast %288 : f32 to vector<16x128xf32>
    %291 = arith.mulf %290, %289 : vector<16x128xf32>
    %292 = arith.addf %287, %291 : vector<16x128xf32>
    %c51 = arith.constant 51 : index
    %293 = memref.load %arg2[%c51] : memref<98xf32, #tpu.memory_space<smem>>
    %c126_i32_107 = arith.constant 126 : i32
    %294 = tpu.dynamic_rotate %283 by %c126_i32_107 dim 1 : vector<16x128xf32>, i32 -> vector<16x128xf32>
    %295 = vector.broadcast %293 : f32 to vector<16x128xf32>
    %296 = arith.mulf %295, %294 : vector<16x128xf32>
    %297 = arith.addf %292, %296 : vector<16x128xf32>
    %c52 = arith.constant 52 : index
    %298 = memref.load %arg2[%c52] : memref<98xf32, #tpu.memory_space<smem>>
    %c125_i32_108 = arith.constant 125 : i32
    %299 = tpu.dynamic_rotate %283 by %c125_i32_108 dim 1 : vector<16x128xf32>, i32 -> vector<16x128xf32>
    %300 = vector.broadcast %298 : f32 to vector<16x128xf32>
    %301 = arith.mulf %300, %299 : vector<16x128xf32>
    %302 = arith.addf %297, %301 : vector<16x128xf32>
    %c53 = arith.constant 53 : index
    %303 = memref.load %arg2[%c53] : memref<98xf32, #tpu.memory_space<smem>>
    %c124_i32_109 = arith.constant 124 : i32
    %304 = tpu.dynamic_rotate %283 by %c124_i32_109 dim 1 : vector<16x128xf32>, i32 -> vector<16x128xf32>
    %305 = vector.broadcast %303 : f32 to vector<16x128xf32>
    %306 = arith.mulf %305, %304 : vector<16x128xf32>
    %307 = arith.addf %302, %306 : vector<16x128xf32>
    %c54 = arith.constant 54 : index
    %308 = memref.load %arg2[%c54] : memref<98xf32, #tpu.memory_space<smem>>
    %c123_i32_110 = arith.constant 123 : i32
    %309 = tpu.dynamic_rotate %283 by %c123_i32_110 dim 1 : vector<16x128xf32>, i32 -> vector<16x128xf32>
    %310 = vector.broadcast %308 : f32 to vector<16x128xf32>
    %311 = arith.mulf %310, %309 : vector<16x128xf32>
    %312 = arith.addf %307, %311 : vector<16x128xf32>
    %c55 = arith.constant 55 : index
    %313 = memref.load %arg2[%c55] : memref<98xf32, #tpu.memory_space<smem>>
    %c122_i32_111 = arith.constant 122 : i32
    %314 = tpu.dynamic_rotate %283 by %c122_i32_111 dim 1 : vector<16x128xf32>, i32 -> vector<16x128xf32>
    %315 = vector.broadcast %313 : f32 to vector<16x128xf32>
    %316 = arith.mulf %315, %314 : vector<16x128xf32>
    %317 = arith.addf %312, %316 : vector<16x128xf32>
    %c0_112 = arith.constant 0 : index
    %c1_113 = arith.constant 1 : index
    %c1_114 = arith.constant 1 : index
    %c0_115 = arith.constant 0 : index
    %318 = vector.load %arg4[%c0_112, %c1_113, %c1_114, %c0_115] : memref<2x2x22x128xf32, #tpu.memory_space<vmem>>, vector<1x1x16x128xf32>
    %319 = vector.shape_cast %318 : vector<1x1x16x128xf32> to vector<16x128xf32>
    %c56 = arith.constant 56 : index
    %320 = memref.load %arg2[%c56] : memref<98xf32, #tpu.memory_space<smem>>
    %321 = vector.broadcast %320 : f32 to vector<16x128xf32>
    %322 = arith.mulf %321, %319 : vector<16x128xf32>
    %323 = arith.addf %29, %322 : vector<16x128xf32>
    %c57 = arith.constant 57 : index
    %324 = memref.load %arg2[%c57] : memref<98xf32, #tpu.memory_space<smem>>
    %c127_i32_116 = arith.constant 127 : i32
    %325 = tpu.dynamic_rotate %319 by %c127_i32_116 dim 1 : vector<16x128xf32>, i32 -> vector<16x128xf32>
    %326 = vector.broadcast %324 : f32 to vector<16x128xf32>
    %327 = arith.mulf %326, %325 : vector<16x128xf32>
    %328 = arith.addf %323, %327 : vector<16x128xf32>
    %c58 = arith.constant 58 : index
    %329 = memref.load %arg2[%c58] : memref<98xf32, #tpu.memory_space<smem>>
    %c126_i32_117 = arith.constant 126 : i32
    %330 = tpu.dynamic_rotate %319 by %c126_i32_117 dim 1 : vector<16x128xf32>, i32 -> vector<16x128xf32>
    %331 = vector.broadcast %329 : f32 to vector<16x128xf32>
    %332 = arith.mulf %331, %330 : vector<16x128xf32>
    %333 = arith.addf %328, %332 : vector<16x128xf32>
    %c59 = arith.constant 59 : index
    %334 = memref.load %arg2[%c59] : memref<98xf32, #tpu.memory_space<smem>>
    %c125_i32_118 = arith.constant 125 : i32
    %335 = tpu.dynamic_rotate %319 by %c125_i32_118 dim 1 : vector<16x128xf32>, i32 -> vector<16x128xf32>
    %336 = vector.broadcast %334 : f32 to vector<16x128xf32>
    %337 = arith.mulf %336, %335 : vector<16x128xf32>
    %338 = arith.addf %333, %337 : vector<16x128xf32>
    %c60 = arith.constant 60 : index
    %339 = memref.load %arg2[%c60] : memref<98xf32, #tpu.memory_space<smem>>
    %c124_i32_119 = arith.constant 124 : i32
    %340 = tpu.dynamic_rotate %319 by %c124_i32_119 dim 1 : vector<16x128xf32>, i32 -> vector<16x128xf32>
    %341 = vector.broadcast %339 : f32 to vector<16x128xf32>
    %342 = arith.mulf %341, %340 : vector<16x128xf32>
    %343 = arith.addf %338, %342 : vector<16x128xf32>
    %c61 = arith.constant 61 : index
    %344 = memref.load %arg2[%c61] : memref<98xf32, #tpu.memory_space<smem>>
    %c123_i32_120 = arith.constant 123 : i32
    %345 = tpu.dynamic_rotate %319 by %c123_i32_120 dim 1 : vector<16x128xf32>, i32 -> vector<16x128xf32>
    %346 = vector.broadcast %344 : f32 to vector<16x128xf32>
    %347 = arith.mulf %346, %345 : vector<16x128xf32>
    %348 = arith.addf %343, %347 : vector<16x128xf32>
    %c62 = arith.constant 62 : index
    %349 = memref.load %arg2[%c62] : memref<98xf32, #tpu.memory_space<smem>>
    %c122_i32_121 = arith.constant 122 : i32
    %350 = tpu.dynamic_rotate %319 by %c122_i32_121 dim 1 : vector<16x128xf32>, i32 -> vector<16x128xf32>
    %351 = vector.broadcast %349 : f32 to vector<16x128xf32>
    %352 = arith.mulf %351, %350 : vector<16x128xf32>
    %353 = arith.addf %348, %352 : vector<16x128xf32>
    %c0_122 = arith.constant 0 : index
    %c1_123 = arith.constant 1 : index
    %c2_124 = arith.constant 2 : index
    %c0_125 = arith.constant 0 : index
    %354 = vector.load %arg4[%c0_122, %c1_123, %c2_124, %c0_125] : memref<2x2x22x128xf32, #tpu.memory_space<vmem>>, vector<1x1x16x128xf32>
    %355 = vector.shape_cast %354 : vector<1x1x16x128xf32> to vector<16x128xf32>
    %c63 = arith.constant 63 : index
    %356 = memref.load %arg2[%c63] : memref<98xf32, #tpu.memory_space<smem>>
    %357 = vector.broadcast %356 : f32 to vector<16x128xf32>
    %358 = arith.mulf %357, %355 : vector<16x128xf32>
    %359 = arith.addf %317, %358 : vector<16x128xf32>
    %c64 = arith.constant 64 : index
    %360 = memref.load %arg2[%c64] : memref<98xf32, #tpu.memory_space<smem>>
    %c127_i32_126 = arith.constant 127 : i32
    %361 = tpu.dynamic_rotate %355 by %c127_i32_126 dim 1 : vector<16x128xf32>, i32 -> vector<16x128xf32>
    %362 = vector.broadcast %360 : f32 to vector<16x128xf32>
    %363 = arith.mulf %362, %361 : vector<16x128xf32>
    %364 = arith.addf %359, %363 : vector<16x128xf32>
    %c65 = arith.constant 65 : index
    %365 = memref.load %arg2[%c65] : memref<98xf32, #tpu.memory_space<smem>>
    %c126_i32_127 = arith.constant 126 : i32
    %366 = tpu.dynamic_rotate %355 by %c126_i32_127 dim 1 : vector<16x128xf32>, i32 -> vector<16x128xf32>
    %367 = vector.broadcast %365 : f32 to vector<16x128xf32>
    %368 = arith.mulf %367, %366 : vector<16x128xf32>
    %369 = arith.addf %364, %368 : vector<16x128xf32>
    %c66 = arith.constant 66 : index
    %370 = memref.load %arg2[%c66] : memref<98xf32, #tpu.memory_space<smem>>
    %c125_i32_128 = arith.constant 125 : i32
    %371 = tpu.dynamic_rotate %355 by %c125_i32_128 dim 1 : vector<16x128xf32>, i32 -> vector<16x128xf32>
    %372 = vector.broadcast %370 : f32 to vector<16x128xf32>
    %373 = arith.mulf %372, %371 : vector<16x128xf32>
    %374 = arith.addf %369, %373 : vector<16x128xf32>
    %c67 = arith.constant 67 : index
    %375 = memref.load %arg2[%c67] : memref<98xf32, #tpu.memory_space<smem>>
    %c124_i32_129 = arith.constant 124 : i32
    %376 = tpu.dynamic_rotate %355 by %c124_i32_129 dim 1 : vector<16x128xf32>, i32 -> vector<16x128xf32>
    %377 = vector.broadcast %375 : f32 to vector<16x128xf32>
    %378 = arith.mulf %377, %376 : vector<16x128xf32>
    %379 = arith.addf %374, %378 : vector<16x128xf32>
    %c68 = arith.constant 68 : index
    %380 = memref.load %arg2[%c68] : memref<98xf32, #tpu.memory_space<smem>>
    %c123_i32_130 = arith.constant 123 : i32
    %381 = tpu.dynamic_rotate %355 by %c123_i32_130 dim 1 : vector<16x128xf32>, i32 -> vector<16x128xf32>
    %382 = vector.broadcast %380 : f32 to vector<16x128xf32>
    %383 = arith.mulf %382, %381 : vector<16x128xf32>
    %384 = arith.addf %379, %383 : vector<16x128xf32>
    %c69 = arith.constant 69 : index
    %385 = memref.load %arg2[%c69] : memref<98xf32, #tpu.memory_space<smem>>
    %c122_i32_131 = arith.constant 122 : i32
    %386 = tpu.dynamic_rotate %355 by %c122_i32_131 dim 1 : vector<16x128xf32>, i32 -> vector<16x128xf32>
    %387 = vector.broadcast %385 : f32 to vector<16x128xf32>
    %388 = arith.mulf %387, %386 : vector<16x128xf32>
    %389 = arith.addf %384, %388 : vector<16x128xf32>
    %c0_132 = arith.constant 0 : index
    %c1_133 = arith.constant 1 : index
    %c3_134 = arith.constant 3 : index
    %c0_135 = arith.constant 0 : index
    %390 = vector.load %arg4[%c0_132, %c1_133, %c3_134, %c0_135] : memref<2x2x22x128xf32, #tpu.memory_space<vmem>>, vector<1x1x16x128xf32>
    %391 = vector.shape_cast %390 : vector<1x1x16x128xf32> to vector<16x128xf32>
    %c70 = arith.constant 70 : index
    %392 = memref.load %arg2[%c70] : memref<98xf32, #tpu.memory_space<smem>>
    %393 = vector.broadcast %392 : f32 to vector<16x128xf32>
    %394 = arith.mulf %393, %391 : vector<16x128xf32>
    %395 = arith.addf %353, %394 : vector<16x128xf32>
    %c71 = arith.constant 71 : index
    %396 = memref.load %arg2[%c71] : memref<98xf32, #tpu.memory_space<smem>>
    %c127_i32_136 = arith.constant 127 : i32
    %397 = tpu.dynamic_rotate %391 by %c127_i32_136 dim 1 : vector<16x128xf32>, i32 -> vector<16x128xf32>
    %398 = vector.broadcast %396 : f32 to vector<16x128xf32>
    %399 = arith.mulf %398, %397 : vector<16x128xf32>
    %400 = arith.addf %395, %399 : vector<16x128xf32>
    %c72 = arith.constant 72 : index
    %401 = memref.load %arg2[%c72] : memref<98xf32, #tpu.memory_space<smem>>
    %c126_i32_137 = arith.constant 126 : i32
    %402 = tpu.dynamic_rotate %391 by %c126_i32_137 dim 1 : vector<16x128xf32>, i32 -> vector<16x128xf32>
    %403 = vector.broadcast %401 : f32 to vector<16x128xf32>
    %404 = arith.mulf %403, %402 : vector<16x128xf32>
    %405 = arith.addf %400, %404 : vector<16x128xf32>
    %c73 = arith.constant 73 : index
    %406 = memref.load %arg2[%c73] : memref<98xf32, #tpu.memory_space<smem>>
    %c125_i32_138 = arith.constant 125 : i32
    %407 = tpu.dynamic_rotate %391 by %c125_i32_138 dim 1 : vector<16x128xf32>, i32 -> vector<16x128xf32>
    %408 = vector.broadcast %406 : f32 to vector<16x128xf32>
    %409 = arith.mulf %408, %407 : vector<16x128xf32>
    %410 = arith.addf %405, %409 : vector<16x128xf32>
    %c74 = arith.constant 74 : index
    %411 = memref.load %arg2[%c74] : memref<98xf32, #tpu.memory_space<smem>>
    %c124_i32_139 = arith.constant 124 : i32
    %412 = tpu.dynamic_rotate %391 by %c124_i32_139 dim 1 : vector<16x128xf32>, i32 -> vector<16x128xf32>
    %413 = vector.broadcast %411 : f32 to vector<16x128xf32>
    %414 = arith.mulf %413, %412 : vector<16x128xf32>
    %415 = arith.addf %410, %414 : vector<16x128xf32>
    %c75 = arith.constant 75 : index
    %416 = memref.load %arg2[%c75] : memref<98xf32, #tpu.memory_space<smem>>
    %c123_i32_140 = arith.constant 123 : i32
    %417 = tpu.dynamic_rotate %391 by %c123_i32_140 dim 1 : vector<16x128xf32>, i32 -> vector<16x128xf32>
    %418 = vector.broadcast %416 : f32 to vector<16x128xf32>
    %419 = arith.mulf %418, %417 : vector<16x128xf32>
    %420 = arith.addf %415, %419 : vector<16x128xf32>
    %c76 = arith.constant 76 : index
    %421 = memref.load %arg2[%c76] : memref<98xf32, #tpu.memory_space<smem>>
    %c122_i32_141 = arith.constant 122 : i32
    %422 = tpu.dynamic_rotate %391 by %c122_i32_141 dim 1 : vector<16x128xf32>, i32 -> vector<16x128xf32>
    %423 = vector.broadcast %421 : f32 to vector<16x128xf32>
    %424 = arith.mulf %423, %422 : vector<16x128xf32>
    %425 = arith.addf %420, %424 : vector<16x128xf32>
    %c0_142 = arith.constant 0 : index
    %c1_143 = arith.constant 1 : index
    %c4_144 = arith.constant 4 : index
    %c0_145 = arith.constant 0 : index
    %426 = vector.load %arg4[%c0_142, %c1_143, %c4_144, %c0_145] : memref<2x2x22x128xf32, #tpu.memory_space<vmem>>, vector<1x1x16x128xf32>
    %427 = vector.shape_cast %426 : vector<1x1x16x128xf32> to vector<16x128xf32>
    %c77 = arith.constant 77 : index
    %428 = memref.load %arg2[%c77] : memref<98xf32, #tpu.memory_space<smem>>
    %429 = vector.broadcast %428 : f32 to vector<16x128xf32>
    %430 = arith.mulf %429, %427 : vector<16x128xf32>
    %431 = arith.addf %389, %430 : vector<16x128xf32>
    %c78 = arith.constant 78 : index
    %432 = memref.load %arg2[%c78] : memref<98xf32, #tpu.memory_space<smem>>
    %c127_i32_146 = arith.constant 127 : i32
    %433 = tpu.dynamic_rotate %427 by %c127_i32_146 dim 1 : vector<16x128xf32>, i32 -> vector<16x128xf32>
    %434 = vector.broadcast %432 : f32 to vector<16x128xf32>
    %435 = arith.mulf %434, %433 : vector<16x128xf32>
    %436 = arith.addf %431, %435 : vector<16x128xf32>
    %c79 = arith.constant 79 : index
    %437 = memref.load %arg2[%c79] : memref<98xf32, #tpu.memory_space<smem>>
    %c126_i32_147 = arith.constant 126 : i32
    %438 = tpu.dynamic_rotate %427 by %c126_i32_147 dim 1 : vector<16x128xf32>, i32 -> vector<16x128xf32>
    %439 = vector.broadcast %437 : f32 to vector<16x128xf32>
    %440 = arith.mulf %439, %438 : vector<16x128xf32>
    %441 = arith.addf %436, %440 : vector<16x128xf32>
    %c80 = arith.constant 80 : index
    %442 = memref.load %arg2[%c80] : memref<98xf32, #tpu.memory_space<smem>>
    %c125_i32_148 = arith.constant 125 : i32
    %443 = tpu.dynamic_rotate %427 by %c125_i32_148 dim 1 : vector<16x128xf32>, i32 -> vector<16x128xf32>
    %444 = vector.broadcast %442 : f32 to vector<16x128xf32>
    %445 = arith.mulf %444, %443 : vector<16x128xf32>
    %446 = arith.addf %441, %445 : vector<16x128xf32>
    %c81 = arith.constant 81 : index
    %447 = memref.load %arg2[%c81] : memref<98xf32, #tpu.memory_space<smem>>
    %c124_i32_149 = arith.constant 124 : i32
    %448 = tpu.dynamic_rotate %427 by %c124_i32_149 dim 1 : vector<16x128xf32>, i32 -> vector<16x128xf32>
    %449 = vector.broadcast %447 : f32 to vector<16x128xf32>
    %450 = arith.mulf %449, %448 : vector<16x128xf32>
    %451 = arith.addf %446, %450 : vector<16x128xf32>
    %c82 = arith.constant 82 : index
    %452 = memref.load %arg2[%c82] : memref<98xf32, #tpu.memory_space<smem>>
    %c123_i32_150 = arith.constant 123 : i32
    %453 = tpu.dynamic_rotate %427 by %c123_i32_150 dim 1 : vector<16x128xf32>, i32 -> vector<16x128xf32>
    %454 = vector.broadcast %452 : f32 to vector<16x128xf32>
    %455 = arith.mulf %454, %453 : vector<16x128xf32>
    %456 = arith.addf %451, %455 : vector<16x128xf32>
    %c83 = arith.constant 83 : index
    %457 = memref.load %arg2[%c83] : memref<98xf32, #tpu.memory_space<smem>>
    %c122_i32_151 = arith.constant 122 : i32
    %458 = tpu.dynamic_rotate %427 by %c122_i32_151 dim 1 : vector<16x128xf32>, i32 -> vector<16x128xf32>
    %459 = vector.broadcast %457 : f32 to vector<16x128xf32>
    %460 = arith.mulf %459, %458 : vector<16x128xf32>
    %461 = arith.addf %456, %460 : vector<16x128xf32>
    %c0_152 = arith.constant 0 : index
    %c1_153 = arith.constant 1 : index
    %c5_154 = arith.constant 5 : index
    %c0_155 = arith.constant 0 : index
    %462 = vector.load %arg4[%c0_152, %c1_153, %c5_154, %c0_155] : memref<2x2x22x128xf32, #tpu.memory_space<vmem>>, vector<1x1x16x128xf32>
    %463 = vector.shape_cast %462 : vector<1x1x16x128xf32> to vector<16x128xf32>
    %c84 = arith.constant 84 : index
    %464 = memref.load %arg2[%c84] : memref<98xf32, #tpu.memory_space<smem>>
    %465 = vector.broadcast %464 : f32 to vector<16x128xf32>
    %466 = arith.mulf %465, %463 : vector<16x128xf32>
    %467 = arith.addf %425, %466 : vector<16x128xf32>
    %c85 = arith.constant 85 : index
    %468 = memref.load %arg2[%c85] : memref<98xf32, #tpu.memory_space<smem>>
    %c127_i32_156 = arith.constant 127 : i32
    %469 = tpu.dynamic_rotate %463 by %c127_i32_156 dim 1 : vector<16x128xf32>, i32 -> vector<16x128xf32>
    %470 = vector.broadcast %468 : f32 to vector<16x128xf32>
    %471 = arith.mulf %470, %469 : vector<16x128xf32>
    %472 = arith.addf %467, %471 : vector<16x128xf32>
    %c86 = arith.constant 86 : index
    %473 = memref.load %arg2[%c86] : memref<98xf32, #tpu.memory_space<smem>>
    %c126_i32_157 = arith.constant 126 : i32
    %474 = tpu.dynamic_rotate %463 by %c126_i32_157 dim 1 : vector<16x128xf32>, i32 -> vector<16x128xf32>
    %475 = vector.broadcast %473 : f32 to vector<16x128xf32>
    %476 = arith.mulf %475, %474 : vector<16x128xf32>
    %477 = arith.addf %472, %476 : vector<16x128xf32>
    %c87 = arith.constant 87 : index
    %478 = memref.load %arg2[%c87] : memref<98xf32, #tpu.memory_space<smem>>
    %c125_i32_158 = arith.constant 125 : i32
    %479 = tpu.dynamic_rotate %463 by %c125_i32_158 dim 1 : vector<16x128xf32>, i32 -> vector<16x128xf32>
    %480 = vector.broadcast %478 : f32 to vector<16x128xf32>
    %481 = arith.mulf %480, %479 : vector<16x128xf32>
    %482 = arith.addf %477, %481 : vector<16x128xf32>
    %c88 = arith.constant 88 : index
    %483 = memref.load %arg2[%c88] : memref<98xf32, #tpu.memory_space<smem>>
    %c124_i32_159 = arith.constant 124 : i32
    %484 = tpu.dynamic_rotate %463 by %c124_i32_159 dim 1 : vector<16x128xf32>, i32 -> vector<16x128xf32>
    %485 = vector.broadcast %483 : f32 to vector<16x128xf32>
    %486 = arith.mulf %485, %484 : vector<16x128xf32>
    %487 = arith.addf %482, %486 : vector<16x128xf32>
    %c89 = arith.constant 89 : index
    %488 = memref.load %arg2[%c89] : memref<98xf32, #tpu.memory_space<smem>>
    %c123_i32_160 = arith.constant 123 : i32
    %489 = tpu.dynamic_rotate %463 by %c123_i32_160 dim 1 : vector<16x128xf32>, i32 -> vector<16x128xf32>
    %490 = vector.broadcast %488 : f32 to vector<16x128xf32>
    %491 = arith.mulf %490, %489 : vector<16x128xf32>
    %492 = arith.addf %487, %491 : vector<16x128xf32>
    %c90 = arith.constant 90 : index
    %493 = memref.load %arg2[%c90] : memref<98xf32, #tpu.memory_space<smem>>
    %c122_i32_161 = arith.constant 122 : i32
    %494 = tpu.dynamic_rotate %463 by %c122_i32_161 dim 1 : vector<16x128xf32>, i32 -> vector<16x128xf32>
    %495 = vector.broadcast %493 : f32 to vector<16x128xf32>
    %496 = arith.mulf %495, %494 : vector<16x128xf32>
    %497 = arith.addf %492, %496 : vector<16x128xf32>
    %c0_162 = arith.constant 0 : index
    %c1_163 = arith.constant 1 : index
    %c6_164 = arith.constant 6 : index
    %c0_165 = arith.constant 0 : index
    %498 = vector.load %arg4[%c0_162, %c1_163, %c6_164, %c0_165] : memref<2x2x22x128xf32, #tpu.memory_space<vmem>>, vector<1x1x16x128xf32>
    %499 = vector.shape_cast %498 : vector<1x1x16x128xf32> to vector<16x128xf32>
    %c91 = arith.constant 91 : index
    %500 = memref.load %arg2[%c91] : memref<98xf32, #tpu.memory_space<smem>>
    %501 = vector.broadcast %500 : f32 to vector<16x128xf32>
    %502 = arith.mulf %501, %499 : vector<16x128xf32>
    %503 = arith.addf %461, %502 : vector<16x128xf32>
    %c92 = arith.constant 92 : index
    %504 = memref.load %arg2[%c92] : memref<98xf32, #tpu.memory_space<smem>>
    %c127_i32_166 = arith.constant 127 : i32
    %505 = tpu.dynamic_rotate %499 by %c127_i32_166 dim 1 : vector<16x128xf32>, i32 -> vector<16x128xf32>
    %506 = vector.broadcast %504 : f32 to vector<16x128xf32>
    %507 = arith.mulf %506, %505 : vector<16x128xf32>
    %508 = arith.addf %503, %507 : vector<16x128xf32>
    %c93 = arith.constant 93 : index
    %509 = memref.load %arg2[%c93] : memref<98xf32, #tpu.memory_space<smem>>
    %c126_i32_167 = arith.constant 126 : i32
    %510 = tpu.dynamic_rotate %499 by %c126_i32_167 dim 1 : vector<16x128xf32>, i32 -> vector<16x128xf32>
    %511 = vector.broadcast %509 : f32 to vector<16x128xf32>
    %512 = arith.mulf %511, %510 : vector<16x128xf32>
    %513 = arith.addf %508, %512 : vector<16x128xf32>
    %c94 = arith.constant 94 : index
    %514 = memref.load %arg2[%c94] : memref<98xf32, #tpu.memory_space<smem>>
    %c125_i32_168 = arith.constant 125 : i32
    %515 = tpu.dynamic_rotate %499 by %c125_i32_168 dim 1 : vector<16x128xf32>, i32 -> vector<16x128xf32>
    %516 = vector.broadcast %514 : f32 to vector<16x128xf32>
    %517 = arith.mulf %516, %515 : vector<16x128xf32>
    %518 = arith.addf %513, %517 : vector<16x128xf32>
    %c95 = arith.constant 95 : index
    %519 = memref.load %arg2[%c95] : memref<98xf32, #tpu.memory_space<smem>>
    %c124_i32_169 = arith.constant 124 : i32
    %520 = tpu.dynamic_rotate %499 by %c124_i32_169 dim 1 : vector<16x128xf32>, i32 -> vector<16x128xf32>
    %521 = vector.broadcast %519 : f32 to vector<16x128xf32>
    %522 = arith.mulf %521, %520 : vector<16x128xf32>
    %523 = arith.addf %518, %522 : vector<16x128xf32>
    %c96 = arith.constant 96 : index
    %524 = memref.load %arg2[%c96] : memref<98xf32, #tpu.memory_space<smem>>
    %c123_i32_170 = arith.constant 123 : i32
    %525 = tpu.dynamic_rotate %499 by %c123_i32_170 dim 1 : vector<16x128xf32>, i32 -> vector<16x128xf32>
    %526 = vector.broadcast %524 : f32 to vector<16x128xf32>
    %527 = arith.mulf %526, %525 : vector<16x128xf32>
    %528 = arith.addf %523, %527 : vector<16x128xf32>
    %c97 = arith.constant 97 : index
    %529 = memref.load %arg2[%c97] : memref<98xf32, #tpu.memory_space<smem>>
    %c122_i32_171 = arith.constant 122 : i32
    %530 = tpu.dynamic_rotate %499 by %c122_i32_171 dim 1 : vector<16x128xf32>, i32 -> vector<16x128xf32>
    %531 = vector.broadcast %529 : f32 to vector<16x128xf32>
    %532 = arith.mulf %531, %530 : vector<16x128xf32>
    %533 = arith.addf %528, %532 : vector<16x128xf32>
    %534 = arith.addf %281, %245 : vector<16x128xf32>
    %535 = arith.addf %533, %497 : vector<16x128xf32>
    %536 = arith.addf %534, %535 : vector<16x128xf32>
    %537 = vector.extract_strided_slice %536 {offsets = [0, 0], sizes = [16, 16], strides = [1, 1]} : vector<16x128xf32> to vector<16x16xf32>
    %538 = arith.negf %537 : vector<16x16xf32>
    %539 = math.exp %538 : vector<16x16xf32>
    %cst_172 = arith.constant 1.000000e+00 : f32
    %540 = vector.broadcast %cst_172 : f32 to vector<16x16xf32>
    %541 = arith.addf %540, %539 : vector<16x16xf32>
    %542 = arith.divf %540, %541 : vector<16x16xf32>
    %c0_173 = arith.constant 0 : index
    %c0_174 = arith.constant 0 : index
    %c0_175 = arith.constant 0 : index
    %c0_176 = arith.constant 0 : index
    %543 = vector.load %arg3[%c0_173, %c0_174, %c0_175, %c0_176] : memref<2x1x16x16xf32, #tpu.memory_space<vmem>>, vector<1x1x16x16xf32>
    %544 = vector.shape_cast %543 : vector<1x1x16x16xf32> to vector<16x16xf32>
    %545 = vector.shape_cast %542 : vector<16x16xf32> to vector<1x1x16x16xf32>
    tpu.vector_store %arg3[%c0_173, %c0_174, %c0_175, %c0_176], %545 {strides = array<i32>} : memref<2x1x16x16xf32, #tpu.memory_space<vmem>>, vector<1x1x16x16xf32>,
    %cst_177 = arith.constant 0.000000e+00 : f32
    %546 = vector.broadcast %cst_177 : f32 to vector<16x128xf32>
    %cst_178 = arith.constant 0.000000e+00 : f32
    %547 = vector.broadcast %cst_178 : f32 to vector<16x128xf32>
    %cst_179 = arith.constant 0.000000e+00 : f32
    %548 = vector.broadcast %cst_179 : f32 to vector<16x128xf32>
    %cst_180 = arith.constant 0.000000e+00 : f32
    %549 = vector.broadcast %cst_180 : f32 to vector<16x128xf32>
    %c1_181 = arith.constant 1 : index
    %c0_182 = arith.constant 0 : index
    %c0_183 = arith.constant 0 : index
    %c0_184 = arith.constant 0 : index
    %550 = vector.load %arg4[%c1_181, %c0_182, %c0_183, %c0_184] : memref<2x2x22x128xf32, #tpu.memory_space<vmem>>, vector<1x1x16x128xf32>
    %551 = vector.shape_cast %550 : vector<1x1x16x128xf32> to vector<16x128xf32>
    %c0_185 = arith.constant 0 : index
    %552 = memref.load %arg2[%c0_185] : memref<98xf32, #tpu.memory_space<smem>>
    %553 = vector.broadcast %552 : f32 to vector<16x128xf32>
    %554 = arith.mulf %553, %551 : vector<16x128xf32>
    %555 = arith.addf %546, %554 : vector<16x128xf32>
    %c1_186 = arith.constant 1 : index
    %556 = memref.load %arg2[%c1_186] : memref<98xf32, #tpu.memory_space<smem>>
    %c127_i32_187 = arith.constant 127 : i32
    %557 = tpu.dynamic_rotate %551 by %c127_i32_187 dim 1 : vector<16x128xf32>, i32 -> vector<16x128xf32>
    %558 = vector.broadcast %556 : f32 to vector<16x128xf32>
    %559 = arith.mulf %558, %557 : vector<16x128xf32>
    %560 = arith.addf %555, %559 : vector<16x128xf32>
    %c2_188 = arith.constant 2 : index
    %561 = memref.load %arg2[%c2_188] : memref<98xf32, #tpu.memory_space<smem>>
    %c126_i32_189 = arith.constant 126 : i32
    %562 = tpu.dynamic_rotate %551 by %c126_i32_189 dim 1 : vector<16x128xf32>, i32 -> vector<16x128xf32>
    %563 = vector.broadcast %561 : f32 to vector<16x128xf32>
    %564 = arith.mulf %563, %562 : vector<16x128xf32>
    %565 = arith.addf %560, %564 : vector<16x128xf32>
    %c3_190 = arith.constant 3 : index
    %566 = memref.load %arg2[%c3_190] : memref<98xf32, #tpu.memory_space<smem>>
    %c125_i32_191 = arith.constant 125 : i32
    %567 = tpu.dynamic_rotate %551 by %c125_i32_191 dim 1 : vector<16x128xf32>, i32 -> vector<16x128xf32>
    %568 = vector.broadcast %566 : f32 to vector<16x128xf32>
    %569 = arith.mulf %568, %567 : vector<16x128xf32>
    %570 = arith.addf %565, %569 : vector<16x128xf32>
    %c4_192 = arith.constant 4 : index
    %571 = memref.load %arg2[%c4_192] : memref<98xf32, #tpu.memory_space<smem>>
    %c124_i32_193 = arith.constant 124 : i32
    %572 = tpu.dynamic_rotate %551 by %c124_i32_193 dim 1 : vector<16x128xf32>, i32 -> vector<16x128xf32>
    %573 = vector.broadcast %571 : f32 to vector<16x128xf32>
    %574 = arith.mulf %573, %572 : vector<16x128xf32>
    %575 = arith.addf %570, %574 : vector<16x128xf32>
    %c5_194 = arith.constant 5 : index
    %576 = memref.load %arg2[%c5_194] : memref<98xf32, #tpu.memory_space<smem>>
    %c123_i32_195 = arith.constant 123 : i32
    %577 = tpu.dynamic_rotate %551 by %c123_i32_195 dim 1 : vector<16x128xf32>, i32 -> vector<16x128xf32>
    %578 = vector.broadcast %576 : f32 to vector<16x128xf32>
    %579 = arith.mulf %578, %577 : vector<16x128xf32>
    %580 = arith.addf %575, %579 : vector<16x128xf32>
    %c6_196 = arith.constant 6 : index
    %581 = memref.load %arg2[%c6_196] : memref<98xf32, #tpu.memory_space<smem>>
    %c122_i32_197 = arith.constant 122 : i32
    %582 = tpu.dynamic_rotate %551 by %c122_i32_197 dim 1 : vector<16x128xf32>, i32 -> vector<16x128xf32>
    %583 = vector.broadcast %581 : f32 to vector<16x128xf32>
    %584 = arith.mulf %583, %582 : vector<16x128xf32>
    %585 = arith.addf %580, %584 : vector<16x128xf32>
    %c1_198 = arith.constant 1 : index
    %c0_199 = arith.constant 0 : index
    %c1_200 = arith.constant 1 : index
    %c0_201 = arith.constant 0 : index
    %586 = vector.load %arg4[%c1_198, %c0_199, %c1_200, %c0_201] : memref<2x2x22x128xf32, #tpu.memory_space<vmem>>, vector<1x1x16x128xf32>
    %587 = vector.shape_cast %586 : vector<1x1x16x128xf32> to vector<16x128xf32>
    %c7_202 = arith.constant 7 : index
    %588 = memref.load %arg2[%c7_202] : memref<98xf32, #tpu.memory_space<smem>>
    %589 = vector.broadcast %588 : f32 to vector<16x128xf32>
    %590 = arith.mulf %589, %587 : vector<16x128xf32>
    %591 = arith.addf %547, %590 : vector<16x128xf32>
    %c8_203 = arith.constant 8 : index
    %592 = memref.load %arg2[%c8_203] : memref<98xf32, #tpu.memory_space<smem>>
    %c127_i32_204 = arith.constant 127 : i32
    %593 = tpu.dynamic_rotate %587 by %c127_i32_204 dim 1 : vector<16x128xf32>, i32 -> vector<16x128xf32>
    %594 = vector.broadcast %592 : f32 to vector<16x128xf32>
    %595 = arith.mulf %594, %593 : vector<16x128xf32>
    %596 = arith.addf %591, %595 : vector<16x128xf32>
    %c9_205 = arith.constant 9 : index
    %597 = memref.load %arg2[%c9_205] : memref<98xf32, #tpu.memory_space<smem>>
    %c126_i32_206 = arith.constant 126 : i32
    %598 = tpu.dynamic_rotate %587 by %c126_i32_206 dim 1 : vector<16x128xf32>, i32 -> vector<16x128xf32>
    %599 = vector.broadcast %597 : f32 to vector<16x128xf32>
    %600 = arith.mulf %599, %598 : vector<16x128xf32>
    %601 = arith.addf %596, %600 : vector<16x128xf32>
    %c10_207 = arith.constant 10 : index
    %602 = memref.load %arg2[%c10_207] : memref<98xf32, #tpu.memory_space<smem>>
    %c125_i32_208 = arith.constant 125 : i32
    %603 = tpu.dynamic_rotate %587 by %c125_i32_208 dim 1 : vector<16x128xf32>, i32 -> vector<16x128xf32>
    %604 = vector.broadcast %602 : f32 to vector<16x128xf32>
    %605 = arith.mulf %604, %603 : vector<16x128xf32>
    %606 = arith.addf %601, %605 : vector<16x128xf32>
    %c11_209 = arith.constant 11 : index
    %607 = memref.load %arg2[%c11_209] : memref<98xf32, #tpu.memory_space<smem>>
    %c124_i32_210 = arith.constant 124 : i32
    %608 = tpu.dynamic_rotate %587 by %c124_i32_210 dim 1 : vector<16x128xf32>, i32 -> vector<16x128xf32>
    %609 = vector.broadcast %607 : f32 to vector<16x128xf32>
    %610 = arith.mulf %609, %608 : vector<16x128xf32>
    %611 = arith.addf %606, %610 : vector<16x128xf32>
    %c12_211 = arith.constant 12 : index
    %612 = memref.load %arg2[%c12_211] : memref<98xf32, #tpu.memory_space<smem>>
    %c123_i32_212 = arith.constant 123 : i32
    %613 = tpu.dynamic_rotate %587 by %c123_i32_212 dim 1 : vector<16x128xf32>, i32 -> vector<16x128xf32>
    %614 = vector.broadcast %612 : f32 to vector<16x128xf32>
    %615 = arith.mulf %614, %613 : vector<16x128xf32>
    %616 = arith.addf %611, %615 : vector<16x128xf32>
    %c13_213 = arith.constant 13 : index
    %617 = memref.load %arg2[%c13_213] : memref<98xf32, #tpu.memory_space<smem>>
    %c122_i32_214 = arith.constant 122 : i32
    %618 = tpu.dynamic_rotate %587 by %c122_i32_214 dim 1 : vector<16x128xf32>, i32 -> vector<16x128xf32>
    %619 = vector.broadcast %617 : f32 to vector<16x128xf32>
    %620 = arith.mulf %619, %618 : vector<16x128xf32>
    %621 = arith.addf %616, %620 : vector<16x128xf32>
    %c1_215 = arith.constant 1 : index
    %c0_216 = arith.constant 0 : index
    %c2_217 = arith.constant 2 : index
    %c0_218 = arith.constant 0 : index
    %622 = vector.load %arg4[%c1_215, %c0_216, %c2_217, %c0_218] : memref<2x2x22x128xf32, #tpu.memory_space<vmem>>, vector<1x1x16x128xf32>
    %623 = vector.shape_cast %622 : vector<1x1x16x128xf32> to vector<16x128xf32>
    %c14_219 = arith.constant 14 : index
    %624 = memref.load %arg2[%c14_219] : memref<98xf32, #tpu.memory_space<smem>>
    %625 = vector.broadcast %624 : f32 to vector<16x128xf32>
    %626 = arith.mulf %625, %623 : vector<16x128xf32>
    %627 = arith.addf %585, %626 : vector<16x128xf32>
    %c15_220 = arith.constant 15 : index
    %628 = memref.load %arg2[%c15_220] : memref<98xf32, #tpu.memory_space<smem>>
    %c127_i32_221 = arith.constant 127 : i32
    %629 = tpu.dynamic_rotate %623 by %c127_i32_221 dim 1 : vector<16x128xf32>, i32 -> vector<16x128xf32>
    %630 = vector.broadcast %628 : f32 to vector<16x128xf32>
    %631 = arith.mulf %630, %629 : vector<16x128xf32>
    %632 = arith.addf %627, %631 : vector<16x128xf32>
    %c16_222 = arith.constant 16 : index
    %633 = memref.load %arg2[%c16_222] : memref<98xf32, #tpu.memory_space<smem>>
    %c126_i32_223 = arith.constant 126 : i32
    %634 = tpu.dynamic_rotate %623 by %c126_i32_223 dim 1 : vector<16x128xf32>, i32 -> vector<16x128xf32>
    %635 = vector.broadcast %633 : f32 to vector<16x128xf32>
    %636 = arith.mulf %635, %634 : vector<16x128xf32>
    %637 = arith.addf %632, %636 : vector<16x128xf32>
    %c17_224 = arith.constant 17 : index
    %638 = memref.load %arg2[%c17_224] : memref<98xf32, #tpu.memory_space<smem>>
    %c125_i32_225 = arith.constant 125 : i32
    %639 = tpu.dynamic_rotate %623 by %c125_i32_225 dim 1 : vector<16x128xf32>, i32 -> vector<16x128xf32>
    %640 = vector.broadcast %638 : f32 to vector<16x128xf32>
    %641 = arith.mulf %640, %639 : vector<16x128xf32>
    %642 = arith.addf %637, %641 : vector<16x128xf32>
    %c18_226 = arith.constant 18 : index
    %643 = memref.load %arg2[%c18_226] : memref<98xf32, #tpu.memory_space<smem>>
    %c124_i32_227 = arith.constant 124 : i32
    %644 = tpu.dynamic_rotate %623 by %c124_i32_227 dim 1 : vector<16x128xf32>, i32 -> vector<16x128xf32>
    %645 = vector.broadcast %643 : f32 to vector<16x128xf32>
    %646 = arith.mulf %645, %644 : vector<16x128xf32>
    %647 = arith.addf %642, %646 : vector<16x128xf32>
    %c19_228 = arith.constant 19 : index
    %648 = memref.load %arg2[%c19_228] : memref<98xf32, #tpu.memory_space<smem>>
    %c123_i32_229 = arith.constant 123 : i32
    %649 = tpu.dynamic_rotate %623 by %c123_i32_229 dim 1 : vector<16x128xf32>, i32 -> vector<16x128xf32>
    %650 = vector.broadcast %648 : f32 to vector<16x128xf32>
    %651 = arith.mulf %650, %649 : vector<16x128xf32>
    %652 = arith.addf %647, %651 : vector<16x128xf32>
    %c20_230 = arith.constant 20 : index
    %653 = memref.load %arg2[%c20_230] : memref<98xf32, #tpu.memory_space<smem>>
    %c122_i32_231 = arith.constant 122 : i32
    %654 = tpu.dynamic_rotate %623 by %c122_i32_231 dim 1 : vector<16x128xf32>, i32 -> vector<16x128xf32>
    %655 = vector.broadcast %653 : f32 to vector<16x128xf32>
    %656 = arith.mulf %655, %654 : vector<16x128xf32>
    %657 = arith.addf %652, %656 : vector<16x128xf32>
    %c1_232 = arith.constant 1 : index
    %c0_233 = arith.constant 0 : index
    %c3_234 = arith.constant 3 : index
    %c0_235 = arith.constant 0 : index
    %658 = vector.load %arg4[%c1_232, %c0_233, %c3_234, %c0_235] : memref<2x2x22x128xf32, #tpu.memory_space<vmem>>, vector<1x1x16x128xf32>
    %659 = vector.shape_cast %658 : vector<1x1x16x128xf32> to vector<16x128xf32>
    %c21_236 = arith.constant 21 : index
    %660 = memref.load %arg2[%c21_236] : memref<98xf32, #tpu.memory_space<smem>>
    %661 = vector.broadcast %660 : f32 to vector<16x128xf32>
    %662 = arith.mulf %661, %659 : vector<16x128xf32>
    %663 = arith.addf %621, %662 : vector<16x128xf32>
    %c22_237 = arith.constant 22 : index
    %664 = memref.load %arg2[%c22_237] : memref<98xf32, #tpu.memory_space<smem>>
    %c127_i32_238 = arith.constant 127 : i32
    %665 = tpu.dynamic_rotate %659 by %c127_i32_238 dim 1 : vector<16x128xf32>, i32 -> vector<16x128xf32>
    %666 = vector.broadcast %664 : f32 to vector<16x128xf32>
    %667 = arith.mulf %666, %665 : vector<16x128xf32>
    %668 = arith.addf %663, %667 : vector<16x128xf32>
    %c23_239 = arith.constant 23 : index
    %669 = memref.load %arg2[%c23_239] : memref<98xf32, #tpu.memory_space<smem>>
    %c126_i32_240 = arith.constant 126 : i32
    %670 = tpu.dynamic_rotate %659 by %c126_i32_240 dim 1 : vector<16x128xf32>, i32 -> vector<16x128xf32>
    %671 = vector.broadcast %669 : f32 to vector<16x128xf32>
    %672 = arith.mulf %671, %670 : vector<16x128xf32>
    %673 = arith.addf %668, %672 : vector<16x128xf32>
    %c24_241 = arith.constant 24 : index
    %674 = memref.load %arg2[%c24_241] : memref<98xf32, #tpu.memory_space<smem>>
    %c125_i32_242 = arith.constant 125 : i32
    %675 = tpu.dynamic_rotate %659 by %c125_i32_242 dim 1 : vector<16x128xf32>, i32 -> vector<16x128xf32>
    %676 = vector.broadcast %674 : f32 to vector<16x128xf32>
    %677 = arith.mulf %676, %675 : vector<16x128xf32>
    %678 = arith.addf %673, %677 : vector<16x128xf32>
    %c25_243 = arith.constant 25 : index
    %679 = memref.load %arg2[%c25_243] : memref<98xf32, #tpu.memory_space<smem>>
    %c124_i32_244 = arith.constant 124 : i32
    %680 = tpu.dynamic_rotate %659 by %c124_i32_244 dim 1 : vector<16x128xf32>, i32 -> vector<16x128xf32>
    %681 = vector.broadcast %679 : f32 to vector<16x128xf32>
    %682 = arith.mulf %681, %680 : vector<16x128xf32>
    %683 = arith.addf %678, %682 : vector<16x128xf32>
    %c26_245 = arith.constant 26 : index
    %684 = memref.load %arg2[%c26_245] : memref<98xf32, #tpu.memory_space<smem>>
    %c123_i32_246 = arith.constant 123 : i32
    %685 = tpu.dynamic_rotate %659 by %c123_i32_246 dim 1 : vector<16x128xf32>, i32 -> vector<16x128xf32>
    %686 = vector.broadcast %684 : f32 to vector<16x128xf32>
    %687 = arith.mulf %686, %685 : vector<16x128xf32>
    %688 = arith.addf %683, %687 : vector<16x128xf32>
    %c27_247 = arith.constant 27 : index
    %689 = memref.load %arg2[%c27_247] : memref<98xf32, #tpu.memory_space<smem>>
    %c122_i32_248 = arith.constant 122 : i32
    %690 = tpu.dynamic_rotate %659 by %c122_i32_248 dim 1 : vector<16x128xf32>, i32 -> vector<16x128xf32>
    %691 = vector.broadcast %689 : f32 to vector<16x128xf32>
    %692 = arith.mulf %691, %690 : vector<16x128xf32>
    %693 = arith.addf %688, %692 : vector<16x128xf32>
    %c1_249 = arith.constant 1 : index
    %c0_250 = arith.constant 0 : index
    %c4_251 = arith.constant 4 : index
    %c0_252 = arith.constant 0 : index
    %694 = vector.load %arg4[%c1_249, %c0_250, %c4_251, %c0_252] : memref<2x2x22x128xf32, #tpu.memory_space<vmem>>, vector<1x1x16x128xf32>
    %695 = vector.shape_cast %694 : vector<1x1x16x128xf32> to vector<16x128xf32>
    %c28_253 = arith.constant 28 : index
    %696 = memref.load %arg2[%c28_253] : memref<98xf32, #tpu.memory_space<smem>>
    %697 = vector.broadcast %696 : f32 to vector<16x128xf32>
    %698 = arith.mulf %697, %695 : vector<16x128xf32>
    %699 = arith.addf %657, %698 : vector<16x128xf32>
    %c29_254 = arith.constant 29 : index
    %700 = memref.load %arg2[%c29_254] : memref<98xf32, #tpu.memory_space<smem>>
    %c127_i32_255 = arith.constant 127 : i32
    %701 = tpu.dynamic_rotate %695 by %c127_i32_255 dim 1 : vector<16x128xf32>, i32 -> vector<16x128xf32>
    %702 = vector.broadcast %700 : f32 to vector<16x128xf32>
    %703 = arith.mulf %702, %701 : vector<16x128xf32>
    %704 = arith.addf %699, %703 : vector<16x128xf32>
    %c30_256 = arith.constant 30 : index
    %705 = memref.load %arg2[%c30_256] : memref<98xf32, #tpu.memory_space<smem>>
    %c126_i32_257 = arith.constant 126 : i32
    %706 = tpu.dynamic_rotate %695 by %c126_i32_257 dim 1 : vector<16x128xf32>, i32 -> vector<16x128xf32>
    %707 = vector.broadcast %705 : f32 to vector<16x128xf32>
    %708 = arith.mulf %707, %706 : vector<16x128xf32>
    %709 = arith.addf %704, %708 : vector<16x128xf32>
    %c31_258 = arith.constant 31 : index
    %710 = memref.load %arg2[%c31_258] : memref<98xf32, #tpu.memory_space<smem>>
    %c125_i32_259 = arith.constant 125 : i32
    %711 = tpu.dynamic_rotate %695 by %c125_i32_259 dim 1 : vector<16x128xf32>, i32 -> vector<16x128xf32>
    %712 = vector.broadcast %710 : f32 to vector<16x128xf32>
    %713 = arith.mulf %712, %711 : vector<16x128xf32>
    %714 = arith.addf %709, %713 : vector<16x128xf32>
    %c32_260 = arith.constant 32 : index
    %715 = memref.load %arg2[%c32_260] : memref<98xf32, #tpu.memory_space<smem>>
    %c124_i32_261 = arith.constant 124 : i32
    %716 = tpu.dynamic_rotate %695 by %c124_i32_261 dim 1 : vector<16x128xf32>, i32 -> vector<16x128xf32>
    %717 = vector.broadcast %715 : f32 to vector<16x128xf32>
    %718 = arith.mulf %717, %716 : vector<16x128xf32>
    %719 = arith.addf %714, %718 : vector<16x128xf32>
    %c33_262 = arith.constant 33 : index
    %720 = memref.load %arg2[%c33_262] : memref<98xf32, #tpu.memory_space<smem>>
    %c123_i32_263 = arith.constant 123 : i32
    %721 = tpu.dynamic_rotate %695 by %c123_i32_263 dim 1 : vector<16x128xf32>, i32 -> vector<16x128xf32>
    %722 = vector.broadcast %720 : f32 to vector<16x128xf32>
    %723 = arith.mulf %722, %721 : vector<16x128xf32>
    %724 = arith.addf %719, %723 : vector<16x128xf32>
    %c34_264 = arith.constant 34 : index
    %725 = memref.load %arg2[%c34_264] : memref<98xf32, #tpu.memory_space<smem>>
    %c122_i32_265 = arith.constant 122 : i32
    %726 = tpu.dynamic_rotate %695 by %c122_i32_265 dim 1 : vector<16x128xf32>, i32 -> vector<16x128xf32>
    %727 = vector.broadcast %725 : f32 to vector<16x128xf32>
    %728 = arith.mulf %727, %726 : vector<16x128xf32>
    %729 = arith.addf %724, %728 : vector<16x128xf32>
    %c1_266 = arith.constant 1 : index
    %c0_267 = arith.constant 0 : index
    %c5_268 = arith.constant 5 : index
    %c0_269 = arith.constant 0 : index
    %730 = vector.load %arg4[%c1_266, %c0_267, %c5_268, %c0_269] : memref<2x2x22x128xf32, #tpu.memory_space<vmem>>, vector<1x1x16x128xf32>
    %731 = vector.shape_cast %730 : vector<1x1x16x128xf32> to vector<16x128xf32>
    %c35_270 = arith.constant 35 : index
    %732 = memref.load %arg2[%c35_270] : memref<98xf32, #tpu.memory_space<smem>>
    %733 = vector.broadcast %732 : f32 to vector<16x128xf32>
    %734 = arith.mulf %733, %731 : vector<16x128xf32>
    %735 = arith.addf %693, %734 : vector<16x128xf32>
    %c36_271 = arith.constant 36 : index
    %736 = memref.load %arg2[%c36_271] : memref<98xf32, #tpu.memory_space<smem>>
    %c127_i32_272 = arith.constant 127 : i32
    %737 = tpu.dynamic_rotate %731 by %c127_i32_272 dim 1 : vector<16x128xf32>, i32 -> vector<16x128xf32>
    %738 = vector.broadcast %736 : f32 to vector<16x128xf32>
    %739 = arith.mulf %738, %737 : vector<16x128xf32>
    %740 = arith.addf %735, %739 : vector<16x128xf32>
    %c37_273 = arith.constant 37 : index
    %741 = memref.load %arg2[%c37_273] : memref<98xf32, #tpu.memory_space<smem>>
    %c126_i32_274 = arith.constant 126 : i32
    %742 = tpu.dynamic_rotate %731 by %c126_i32_274 dim 1 : vector<16x128xf32>, i32 -> vector<16x128xf32>
    %743 = vector.broadcast %741 : f32 to vector<16x128xf32>
    %744 = arith.mulf %743, %742 : vector<16x128xf32>
    %745 = arith.addf %740, %744 : vector<16x128xf32>
    %c38_275 = arith.constant 38 : index
    %746 = memref.load %arg2[%c38_275] : memref<98xf32, #tpu.memory_space<smem>>
    %c125_i32_276 = arith.constant 125 : i32
    %747 = tpu.dynamic_rotate %731 by %c125_i32_276 dim 1 : vector<16x128xf32>, i32 -> vector<16x128xf32>
    %748 = vector.broadcast %746 : f32 to vector<16x128xf32>
    %749 = arith.mulf %748, %747 : vector<16x128xf32>
    %750 = arith.addf %745, %749 : vector<16x128xf32>
    %c39_277 = arith.constant 39 : index
    %751 = memref.load %arg2[%c39_277] : memref<98xf32, #tpu.memory_space<smem>>
    %c124_i32_278 = arith.constant 124 : i32
    %752 = tpu.dynamic_rotate %731 by %c124_i32_278 dim 1 : vector<16x128xf32>, i32 -> vector<16x128xf32>
    %753 = vector.broadcast %751 : f32 to vector<16x128xf32>
    %754 = arith.mulf %753, %752 : vector<16x128xf32>
    %755 = arith.addf %750, %754 : vector<16x128xf32>
    %c40_279 = arith.constant 40 : index
    %756 = memref.load %arg2[%c40_279] : memref<98xf32, #tpu.memory_space<smem>>
    %c123_i32_280 = arith.constant 123 : i32
    %757 = tpu.dynamic_rotate %731 by %c123_i32_280 dim 1 : vector<16x128xf32>, i32 -> vector<16x128xf32>
    %758 = vector.broadcast %756 : f32 to vector<16x128xf32>
    %759 = arith.mulf %758, %757 : vector<16x128xf32>
    %760 = arith.addf %755, %759 : vector<16x128xf32>
    %c41_281 = arith.constant 41 : index
    %761 = memref.load %arg2[%c41_281] : memref<98xf32, #tpu.memory_space<smem>>
    %c122_i32_282 = arith.constant 122 : i32
    %762 = tpu.dynamic_rotate %731 by %c122_i32_282 dim 1 : vector<16x128xf32>, i32 -> vector<16x128xf32>
    %763 = vector.broadcast %761 : f32 to vector<16x128xf32>
    %764 = arith.mulf %763, %762 : vector<16x128xf32>
    %765 = arith.addf %760, %764 : vector<16x128xf32>
    %c1_283 = arith.constant 1 : index
    %c0_284 = arith.constant 0 : index
    %c6_285 = arith.constant 6 : index
    %c0_286 = arith.constant 0 : index
    %766 = vector.load %arg4[%c1_283, %c0_284, %c6_285, %c0_286] : memref<2x2x22x128xf32, #tpu.memory_space<vmem>>, vector<1x1x16x128xf32>
    %767 = vector.shape_cast %766 : vector<1x1x16x128xf32> to vector<16x128xf32>
    %c42_287 = arith.constant 42 : index
    %768 = memref.load %arg2[%c42_287] : memref<98xf32, #tpu.memory_space<smem>>
    %769 = vector.broadcast %768 : f32 to vector<16x128xf32>
    %770 = arith.mulf %769, %767 : vector<16x128xf32>
    %771 = arith.addf %729, %770 : vector<16x128xf32>
    %c43_288 = arith.constant 43 : index
    %772 = memref.load %arg2[%c43_288] : memref<98xf32, #tpu.memory_space<smem>>
    %c127_i32_289 = arith.constant 127 : i32
    %773 = tpu.dynamic_rotate %767 by %c127_i32_289 dim 1 : vector<16x128xf32>, i32 -> vector<16x128xf32>
    %774 = vector.broadcast %772 : f32 to vector<16x128xf32>
    %775 = arith.mulf %774, %773 : vector<16x128xf32>
    %776 = arith.addf %771, %775 : vector<16x128xf32>
    %c44_290 = arith.constant 44 : index
    %777 = memref.load %arg2[%c44_290] : memref<98xf32, #tpu.memory_space<smem>>
    %c126_i32_291 = arith.constant 126 : i32
    %778 = tpu.dynamic_rotate %767 by %c126_i32_291 dim 1 : vector<16x128xf32>, i32 -> vector<16x128xf32>
    %779 = vector.broadcast %777 : f32 to vector<16x128xf32>
    %780 = arith.mulf %779, %778 : vector<16x128xf32>
    %781 = arith.addf %776, %780 : vector<16x128xf32>
    %c45_292 = arith.constant 45 : index
    %782 = memref.load %arg2[%c45_292] : memref<98xf32, #tpu.memory_space<smem>>
    %c125_i32_293 = arith.constant 125 : i32
    %783 = tpu.dynamic_rotate %767 by %c125_i32_293 dim 1 : vector<16x128xf32>, i32 -> vector<16x128xf32>
    %784 = vector.broadcast %782 : f32 to vector<16x128xf32>
    %785 = arith.mulf %784, %783 : vector<16x128xf32>
    %786 = arith.addf %781, %785 : vector<16x128xf32>
    %c46_294 = arith.constant 46 : index
    %787 = memref.load %arg2[%c46_294] : memref<98xf32, #tpu.memory_space<smem>>
    %c124_i32_295 = arith.constant 124 : i32
    %788 = tpu.dynamic_rotate %767 by %c124_i32_295 dim 1 : vector<16x128xf32>, i32 -> vector<16x128xf32>
    %789 = vector.broadcast %787 : f32 to vector<16x128xf32>
    %790 = arith.mulf %789, %788 : vector<16x128xf32>
    %791 = arith.addf %786, %790 : vector<16x128xf32>
    %c47_296 = arith.constant 47 : index
    %792 = memref.load %arg2[%c47_296] : memref<98xf32, #tpu.memory_space<smem>>
    %c123_i32_297 = arith.constant 123 : i32
    %793 = tpu.dynamic_rotate %767 by %c123_i32_297 dim 1 : vector<16x128xf32>, i32 -> vector<16x128xf32>
    %794 = vector.broadcast %792 : f32 to vector<16x128xf32>
    %795 = arith.mulf %794, %793 : vector<16x128xf32>
    %796 = arith.addf %791, %795 : vector<16x128xf32>
    %c48_298 = arith.constant 48 : index
    %797 = memref.load %arg2[%c48_298] : memref<98xf32, #tpu.memory_space<smem>>
    %c122_i32_299 = arith.constant 122 : i32
    %798 = tpu.dynamic_rotate %767 by %c122_i32_299 dim 1 : vector<16x128xf32>, i32 -> vector<16x128xf32>
    %799 = vector.broadcast %797 : f32 to vector<16x128xf32>
    %800 = arith.mulf %799, %798 : vector<16x128xf32>
    %801 = arith.addf %796, %800 : vector<16x128xf32>
    %c1_300 = arith.constant 1 : index
    %c1_301 = arith.constant 1 : index
    %c0_302 = arith.constant 0 : index
    %c0_303 = arith.constant 0 : index
    %802 = vector.load %arg4[%c1_300, %c1_301, %c0_302, %c0_303] : memref<2x2x22x128xf32, #tpu.memory_space<vmem>>, vector<1x1x16x128xf32>
    %803 = vector.shape_cast %802 : vector<1x1x16x128xf32> to vector<16x128xf32>
    %c49_304 = arith.constant 49 : index
    %804 = memref.load %arg2[%c49_304] : memref<98xf32, #tpu.memory_space<smem>>
    %805 = vector.broadcast %804 : f32 to vector<16x128xf32>
    %806 = arith.mulf %805, %803 : vector<16x128xf32>
    %807 = arith.addf %548, %806 : vector<16x128xf32>
    %c50_305 = arith.constant 50 : index
    %808 = memref.load %arg2[%c50_305] : memref<98xf32, #tpu.memory_space<smem>>
    %c127_i32_306 = arith.constant 127 : i32
    %809 = tpu.dynamic_rotate %803 by %c127_i32_306 dim 1 : vector<16x128xf32>, i32 -> vector<16x128xf32>
    %810 = vector.broadcast %808 : f32 to vector<16x128xf32>
    %811 = arith.mulf %810, %809 : vector<16x128xf32>
    %812 = arith.addf %807, %811 : vector<16x128xf32>
    %c51_307 = arith.constant 51 : index
    %813 = memref.load %arg2[%c51_307] : memref<98xf32, #tpu.memory_space<smem>>
    %c126_i32_308 = arith.constant 126 : i32
    %814 = tpu.dynamic_rotate %803 by %c126_i32_308 dim 1 : vector<16x128xf32>, i32 -> vector<16x128xf32>
    %815 = vector.broadcast %813 : f32 to vector<16x128xf32>
    %816 = arith.mulf %815, %814 : vector<16x128xf32>
    %817 = arith.addf %812, %816 : vector<16x128xf32>
    %c52_309 = arith.constant 52 : index
    %818 = memref.load %arg2[%c52_309] : memref<98xf32, #tpu.memory_space<smem>>
    %c125_i32_310 = arith.constant 125 : i32
    %819 = tpu.dynamic_rotate %803 by %c125_i32_310 dim 1 : vector<16x128xf32>, i32 -> vector<16x128xf32>
    %820 = vector.broadcast %818 : f32 to vector<16x128xf32>
    %821 = arith.mulf %820, %819 : vector<16x128xf32>
    %822 = arith.addf %817, %821 : vector<16x128xf32>
    %c53_311 = arith.constant 53 : index
    %823 = memref.load %arg2[%c53_311] : memref<98xf32, #tpu.memory_space<smem>>
    %c124_i32_312 = arith.constant 124 : i32
    %824 = tpu.dynamic_rotate %803 by %c124_i32_312 dim 1 : vector<16x128xf32>, i32 -> vector<16x128xf32>
    %825 = vector.broadcast %823 : f32 to vector<16x128xf32>
    %826 = arith.mulf %825, %824 : vector<16x128xf32>
    %827 = arith.addf %822, %826 : vector<16x128xf32>
    %c54_313 = arith.constant 54 : index
    %828 = memref.load %arg2[%c54_313] : memref<98xf32, #tpu.memory_space<smem>>
    %c123_i32_314 = arith.constant 123 : i32
    %829 = tpu.dynamic_rotate %803 by %c123_i32_314 dim 1 : vector<16x128xf32>, i32 -> vector<16x128xf32>
    %830 = vector.broadcast %828 : f32 to vector<16x128xf32>
    %831 = arith.mulf %830, %829 : vector<16x128xf32>
    %832 = arith.addf %827, %831 : vector<16x128xf32>
    %c55_315 = arith.constant 55 : index
    %833 = memref.load %arg2[%c55_315] : memref<98xf32, #tpu.memory_space<smem>>
    %c122_i32_316 = arith.constant 122 : i32
    %834 = tpu.dynamic_rotate %803 by %c122_i32_316 dim 1 : vector<16x128xf32>, i32 -> vector<16x128xf32>
    %835 = vector.broadcast %833 : f32 to vector<16x128xf32>
    %836 = arith.mulf %835, %834 : vector<16x128xf32>
    %837 = arith.addf %832, %836 : vector<16x128xf32>
    %c1_317 = arith.constant 1 : index
    %c1_318 = arith.constant 1 : index
    %c1_319 = arith.constant 1 : index
    %c0_320 = arith.constant 0 : index
    %838 = vector.load %arg4[%c1_317, %c1_318, %c1_319, %c0_320] : memref<2x2x22x128xf32, #tpu.memory_space<vmem>>, vector<1x1x16x128xf32>
    %839 = vector.shape_cast %838 : vector<1x1x16x128xf32> to vector<16x128xf32>
    %c56_321 = arith.constant 56 : index
    %840 = memref.load %arg2[%c56_321] : memref<98xf32, #tpu.memory_space<smem>>
    %841 = vector.broadcast %840 : f32 to vector<16x128xf32>
    %842 = arith.mulf %841, %839 : vector<16x128xf32>
    %843 = arith.addf %549, %842 : vector<16x128xf32>
    %c57_322 = arith.constant 57 : index
    %844 = memref.load %arg2[%c57_322] : memref<98xf32, #tpu.memory_space<smem>>
    %c127_i32_323 = arith.constant 127 : i32
    %845 = tpu.dynamic_rotate %839 by %c127_i32_323 dim 1 : vector<16x128xf32>, i32 -> vector<16x128xf32>
    %846 = vector.broadcast %844 : f32 to vector<16x128xf32>
    %847 = arith.mulf %846, %845 : vector<16x128xf32>
    %848 = arith.addf %843, %847 : vector<16x128xf32>
    %c58_324 = arith.constant 58 : index
    %849 = memref.load %arg2[%c58_324] : memref<98xf32, #tpu.memory_space<smem>>
    %c126_i32_325 = arith.constant 126 : i32
    %850 = tpu.dynamic_rotate %839 by %c126_i32_325 dim 1 : vector<16x128xf32>, i32 -> vector<16x128xf32>
    %851 = vector.broadcast %849 : f32 to vector<16x128xf32>
    %852 = arith.mulf %851, %850 : vector<16x128xf32>
    %853 = arith.addf %848, %852 : vector<16x128xf32>
    %c59_326 = arith.constant 59 : index
    %854 = memref.load %arg2[%c59_326] : memref<98xf32, #tpu.memory_space<smem>>
    %c125_i32_327 = arith.constant 125 : i32
    %855 = tpu.dynamic_rotate %839 by %c125_i32_327 dim 1 : vector<16x128xf32>, i32 -> vector<16x128xf32>
    %856 = vector.broadcast %854 : f32 to vector<16x128xf32>
    %857 = arith.mulf %856, %855 : vector<16x128xf32>
    %858 = arith.addf %853, %857 : vector<16x128xf32>
    %c60_328 = arith.constant 60 : index
    %859 = memref.load %arg2[%c60_328] : memref<98xf32, #tpu.memory_space<smem>>
    %c124_i32_329 = arith.constant 124 : i32
    %860 = tpu.dynamic_rotate %839 by %c124_i32_329 dim 1 : vector<16x128xf32>, i32 -> vector<16x128xf32>
    %861 = vector.broadcast %859 : f32 to vector<16x128xf32>
    %862 = arith.mulf %861, %860 : vector<16x128xf32>
    %863 = arith.addf %858, %862 : vector<16x128xf32>
    %c61_330 = arith.constant 61 : index
    %864 = memref.load %arg2[%c61_330] : memref<98xf32, #tpu.memory_space<smem>>
    %c123_i32_331 = arith.constant 123 : i32
    %865 = tpu.dynamic_rotate %839 by %c123_i32_331 dim 1 : vector<16x128xf32>, i32 -> vector<16x128xf32>
    %866 = vector.broadcast %864 : f32 to vector<16x128xf32>
    %867 = arith.mulf %866, %865 : vector<16x128xf32>
    %868 = arith.addf %863, %867 : vector<16x128xf32>
    %c62_332 = arith.constant 62 : index
    %869 = memref.load %arg2[%c62_332] : memref<98xf32, #tpu.memory_space<smem>>
    %c122_i32_333 = arith.constant 122 : i32
    %870 = tpu.dynamic_rotate %839 by %c122_i32_333 dim 1 : vector<16x128xf32>, i32 -> vector<16x128xf32>
    %871 = vector.broadcast %869 : f32 to vector<16x128xf32>
    %872 = arith.mulf %871, %870 : vector<16x128xf32>
    %873 = arith.addf %868, %872 : vector<16x128xf32>
    %c1_334 = arith.constant 1 : index
    %c1_335 = arith.constant 1 : index
    %c2_336 = arith.constant 2 : index
    %c0_337 = arith.constant 0 : index
    %874 = vector.load %arg4[%c1_334, %c1_335, %c2_336, %c0_337] : memref<2x2x22x128xf32, #tpu.memory_space<vmem>>, vector<1x1x16x128xf32>
    %875 = vector.shape_cast %874 : vector<1x1x16x128xf32> to vector<16x128xf32>
    %c63_338 = arith.constant 63 : index
    %876 = memref.load %arg2[%c63_338] : memref<98xf32, #tpu.memory_space<smem>>
    %877 = vector.broadcast %876 : f32 to vector<16x128xf32>
    %878 = arith.mulf %877, %875 : vector<16x128xf32>
    %879 = arith.addf %837, %878 : vector<16x128xf32>
    %c64_339 = arith.constant 64 : index
    %880 = memref.load %arg2[%c64_339] : memref<98xf32, #tpu.memory_space<smem>>
    %c127_i32_340 = arith.constant 127 : i32
    %881 = tpu.dynamic_rotate %875 by %c127_i32_340 dim 1 : vector<16x128xf32>, i32 -> vector<16x128xf32>
    %882 = vector.broadcast %880 : f32 to vector<16x128xf32>
    %883 = arith.mulf %882, %881 : vector<16x128xf32>
    %884 = arith.addf %879, %883 : vector<16x128xf32>
    %c65_341 = arith.constant 65 : index
    %885 = memref.load %arg2[%c65_341] : memref<98xf32, #tpu.memory_space<smem>>
    %c126_i32_342 = arith.constant 126 : i32
    %886 = tpu.dynamic_rotate %875 by %c126_i32_342 dim 1 : vector<16x128xf32>, i32 -> vector<16x128xf32>
    %887 = vector.broadcast %885 : f32 to vector<16x128xf32>
    %888 = arith.mulf %887, %886 : vector<16x128xf32>
    %889 = arith.addf %884, %888 : vector<16x128xf32>
    %c66_343 = arith.constant 66 : index
    %890 = memref.load %arg2[%c66_343] : memref<98xf32, #tpu.memory_space<smem>>
    %c125_i32_344 = arith.constant 125 : i32
    %891 = tpu.dynamic_rotate %875 by %c125_i32_344 dim 1 : vector<16x128xf32>, i32 -> vector<16x128xf32>
    %892 = vector.broadcast %890 : f32 to vector<16x128xf32>
    %893 = arith.mulf %892, %891 : vector<16x128xf32>
    %894 = arith.addf %889, %893 : vector<16x128xf32>
    %c67_345 = arith.constant 67 : index
    %895 = memref.load %arg2[%c67_345] : memref<98xf32, #tpu.memory_space<smem>>
    %c124_i32_346 = arith.constant 124 : i32
    %896 = tpu.dynamic_rotate %875 by %c124_i32_346 dim 1 : vector<16x128xf32>, i32 -> vector<16x128xf32>
    %897 = vector.broadcast %895 : f32 to vector<16x128xf32>
    %898 = arith.mulf %897, %896 : vector<16x128xf32>
    %899 = arith.addf %894, %898 : vector<16x128xf32>
    %c68_347 = arith.constant 68 : index
    %900 = memref.load %arg2[%c68_347] : memref<98xf32, #tpu.memory_space<smem>>
    %c123_i32_348 = arith.constant 123 : i32
    %901 = tpu.dynamic_rotate %875 by %c123_i32_348 dim 1 : vector<16x128xf32>, i32 -> vector<16x128xf32>
    %902 = vector.broadcast %900 : f32 to vector<16x128xf32>
    %903 = arith.mulf %902, %901 : vector<16x128xf32>
    %904 = arith.addf %899, %903 : vector<16x128xf32>
    %c69_349 = arith.constant 69 : index
    %905 = memref.load %arg2[%c69_349] : memref<98xf32, #tpu.memory_space<smem>>
    %c122_i32_350 = arith.constant 122 : i32
    %906 = tpu.dynamic_rotate %875 by %c122_i32_350 dim 1 : vector<16x128xf32>, i32 -> vector<16x128xf32>
    %907 = vector.broadcast %905 : f32 to vector<16x128xf32>
    %908 = arith.mulf %907, %906 : vector<16x128xf32>
    %909 = arith.addf %904, %908 : vector<16x128xf32>
    %c1_351 = arith.constant 1 : index
    %c1_352 = arith.constant 1 : index
    %c3_353 = arith.constant 3 : index
    %c0_354 = arith.constant 0 : index
    %910 = vector.load %arg4[%c1_351, %c1_352, %c3_353, %c0_354] : memref<2x2x22x128xf32, #tpu.memory_space<vmem>>, vector<1x1x16x128xf32>
    %911 = vector.shape_cast %910 : vector<1x1x16x128xf32> to vector<16x128xf32>
    %c70_355 = arith.constant 70 : index
    %912 = memref.load %arg2[%c70_355] : memref<98xf32, #tpu.memory_space<smem>>
    %913 = vector.broadcast %912 : f32 to vector<16x128xf32>
    %914 = arith.mulf %913, %911 : vector<16x128xf32>
    %915 = arith.addf %873, %914 : vector<16x128xf32>
    %c71_356 = arith.constant 71 : index
    %916 = memref.load %arg2[%c71_356] : memref<98xf32, #tpu.memory_space<smem>>
    %c127_i32_357 = arith.constant 127 : i32
    %917 = tpu.dynamic_rotate %911 by %c127_i32_357 dim 1 : vector<16x128xf32>, i32 -> vector<16x128xf32>
    %918 = vector.broadcast %916 : f32 to vector<16x128xf32>
    %919 = arith.mulf %918, %917 : vector<16x128xf32>
    %920 = arith.addf %915, %919 : vector<16x128xf32>
    %c72_358 = arith.constant 72 : index
    %921 = memref.load %arg2[%c72_358] : memref<98xf32, #tpu.memory_space<smem>>
    %c126_i32_359 = arith.constant 126 : i32
    %922 = tpu.dynamic_rotate %911 by %c126_i32_359 dim 1 : vector<16x128xf32>, i32 -> vector<16x128xf32>
    %923 = vector.broadcast %921 : f32 to vector<16x128xf32>
    %924 = arith.mulf %923, %922 : vector<16x128xf32>
    %925 = arith.addf %920, %924 : vector<16x128xf32>
    %c73_360 = arith.constant 73 : index
    %926 = memref.load %arg2[%c73_360] : memref<98xf32, #tpu.memory_space<smem>>
    %c125_i32_361 = arith.constant 125 : i32
    %927 = tpu.dynamic_rotate %911 by %c125_i32_361 dim 1 : vector<16x128xf32>, i32 -> vector<16x128xf32>
    %928 = vector.broadcast %926 : f32 to vector<16x128xf32>
    %929 = arith.mulf %928, %927 : vector<16x128xf32>
    %930 = arith.addf %925, %929 : vector<16x128xf32>
    %c74_362 = arith.constant 74 : index
    %931 = memref.load %arg2[%c74_362] : memref<98xf32, #tpu.memory_space<smem>>
    %c124_i32_363 = arith.constant 124 : i32
    %932 = tpu.dynamic_rotate %911 by %c124_i32_363 dim 1 : vector<16x128xf32>, i32 -> vector<16x128xf32>
    %933 = vector.broadcast %931 : f32 to vector<16x128xf32>
    %934 = arith.mulf %933, %932 : vector<16x128xf32>
    %935 = arith.addf %930, %934 : vector<16x128xf32>
    %c75_364 = arith.constant 75 : index
    %936 = memref.load %arg2[%c75_364] : memref<98xf32, #tpu.memory_space<smem>>
    %c123_i32_365 = arith.constant 123 : i32
    %937 = tpu.dynamic_rotate %911 by %c123_i32_365 dim 1 : vector<16x128xf32>, i32 -> vector<16x128xf32>
    %938 = vector.broadcast %936 : f32 to vector<16x128xf32>
    %939 = arith.mulf %938, %937 : vector<16x128xf32>
    %940 = arith.addf %935, %939 : vector<16x128xf32>
    %c76_366 = arith.constant 76 : index
    %941 = memref.load %arg2[%c76_366] : memref<98xf32, #tpu.memory_space<smem>>
    %c122_i32_367 = arith.constant 122 : i32
    %942 = tpu.dynamic_rotate %911 by %c122_i32_367 dim 1 : vector<16x128xf32>, i32 -> vector<16x128xf32>
    %943 = vector.broadcast %941 : f32 to vector<16x128xf32>
    %944 = arith.mulf %943, %942 : vector<16x128xf32>
    %945 = arith.addf %940, %944 : vector<16x128xf32>
    %c1_368 = arith.constant 1 : index
    %c1_369 = arith.constant 1 : index
    %c4_370 = arith.constant 4 : index
    %c0_371 = arith.constant 0 : index
    %946 = vector.load %arg4[%c1_368, %c1_369, %c4_370, %c0_371] : memref<2x2x22x128xf32, #tpu.memory_space<vmem>>, vector<1x1x16x128xf32>
    %947 = vector.shape_cast %946 : vector<1x1x16x128xf32> to vector<16x128xf32>
    %c77_372 = arith.constant 77 : index
    %948 = memref.load %arg2[%c77_372] : memref<98xf32, #tpu.memory_space<smem>>
    %949 = vector.broadcast %948 : f32 to vector<16x128xf32>
    %950 = arith.mulf %949, %947 : vector<16x128xf32>
    %951 = arith.addf %909, %950 : vector<16x128xf32>
    %c78_373 = arith.constant 78 : index
    %952 = memref.load %arg2[%c78_373] : memref<98xf32, #tpu.memory_space<smem>>
    %c127_i32_374 = arith.constant 127 : i32
    %953 = tpu.dynamic_rotate %947 by %c127_i32_374 dim 1 : vector<16x128xf32>, i32 -> vector<16x128xf32>
    %954 = vector.broadcast %952 : f32 to vector<16x128xf32>
    %955 = arith.mulf %954, %953 : vector<16x128xf32>
    %956 = arith.addf %951, %955 : vector<16x128xf32>
    %c79_375 = arith.constant 79 : index
    %957 = memref.load %arg2[%c79_375] : memref<98xf32, #tpu.memory_space<smem>>
    %c126_i32_376 = arith.constant 126 : i32
    %958 = tpu.dynamic_rotate %947 by %c126_i32_376 dim 1 : vector<16x128xf32>, i32 -> vector<16x128xf32>
    %959 = vector.broadcast %957 : f32 to vector<16x128xf32>
    %960 = arith.mulf %959, %958 : vector<16x128xf32>
    %961 = arith.addf %956, %960 : vector<16x128xf32>
    %c80_377 = arith.constant 80 : index
    %962 = memref.load %arg2[%c80_377] : memref<98xf32, #tpu.memory_space<smem>>
    %c125_i32_378 = arith.constant 125 : i32
    %963 = tpu.dynamic_rotate %947 by %c125_i32_378 dim 1 : vector<16x128xf32>, i32 -> vector<16x128xf32>
    %964 = vector.broadcast %962 : f32 to vector<16x128xf32>
    %965 = arith.mulf %964, %963 : vector<16x128xf32>
    %966 = arith.addf %961, %965 : vector<16x128xf32>
    %c81_379 = arith.constant 81 : index
    %967 = memref.load %arg2[%c81_379] : memref<98xf32, #tpu.memory_space<smem>>
    %c124_i32_380 = arith.constant 124 : i32
    %968 = tpu.dynamic_rotate %947 by %c124_i32_380 dim 1 : vector<16x128xf32>, i32 -> vector<16x128xf32>
    %969 = vector.broadcast %967 : f32 to vector<16x128xf32>
    %970 = arith.mulf %969, %968 : vector<16x128xf32>
    %971 = arith.addf %966, %970 : vector<16x128xf32>
    %c82_381 = arith.constant 82 : index
    %972 = memref.load %arg2[%c82_381] : memref<98xf32, #tpu.memory_space<smem>>
    %c123_i32_382 = arith.constant 123 : i32
    %973 = tpu.dynamic_rotate %947 by %c123_i32_382 dim 1 : vector<16x128xf32>, i32 -> vector<16x128xf32>
    %974 = vector.broadcast %972 : f32 to vector<16x128xf32>
    %975 = arith.mulf %974, %973 : vector<16x128xf32>
    %976 = arith.addf %971, %975 : vector<16x128xf32>
    %c83_383 = arith.constant 83 : index
    %977 = memref.load %arg2[%c83_383] : memref<98xf32, #tpu.memory_space<smem>>
    %c122_i32_384 = arith.constant 122 : i32
    %978 = tpu.dynamic_rotate %947 by %c122_i32_384 dim 1 : vector<16x128xf32>, i32 -> vector<16x128xf32>
    %979 = vector.broadcast %977 : f32 to vector<16x128xf32>
    %980 = arith.mulf %979, %978 : vector<16x128xf32>
    %981 = arith.addf %976, %980 : vector<16x128xf32>
    %c1_385 = arith.constant 1 : index
    %c1_386 = arith.constant 1 : index
    %c5_387 = arith.constant 5 : index
    %c0_388 = arith.constant 0 : index
    %982 = vector.load %arg4[%c1_385, %c1_386, %c5_387, %c0_388] : memref<2x2x22x128xf32, #tpu.memory_space<vmem>>, vector<1x1x16x128xf32>
    %983 = vector.shape_cast %982 : vector<1x1x16x128xf32> to vector<16x128xf32>
    %c84_389 = arith.constant 84 : index
    %984 = memref.load %arg2[%c84_389] : memref<98xf32, #tpu.memory_space<smem>>
    %985 = vector.broadcast %984 : f32 to vector<16x128xf32>
    %986 = arith.mulf %985, %983 : vector<16x128xf32>
    %987 = arith.addf %945, %986 : vector<16x128xf32>
    %c85_390 = arith.constant 85 : index
    %988 = memref.load %arg2[%c85_390] : memref<98xf32, #tpu.memory_space<smem>>
    %c127_i32_391 = arith.constant 127 : i32
    %989 = tpu.dynamic_rotate %983 by %c127_i32_391 dim 1 : vector<16x128xf32>, i32 -> vector<16x128xf32>
    %990 = vector.broadcast %988 : f32 to vector<16x128xf32>
    %991 = arith.mulf %990, %989 : vector<16x128xf32>
    %992 = arith.addf %987, %991 : vector<16x128xf32>
    %c86_392 = arith.constant 86 : index
    %993 = memref.load %arg2[%c86_392] : memref<98xf32, #tpu.memory_space<smem>>
    %c126_i32_393 = arith.constant 126 : i32
    %994 = tpu.dynamic_rotate %983 by %c126_i32_393 dim 1 : vector<16x128xf32>, i32 -> vector<16x128xf32>
    %995 = vector.broadcast %993 : f32 to vector<16x128xf32>
    %996 = arith.mulf %995, %994 : vector<16x128xf32>
    %997 = arith.addf %992, %996 : vector<16x128xf32>
    %c87_394 = arith.constant 87 : index
    %998 = memref.load %arg2[%c87_394] : memref<98xf32, #tpu.memory_space<smem>>
    %c125_i32_395 = arith.constant 125 : i32
    %999 = tpu.dynamic_rotate %983 by %c125_i32_395 dim 1 : vector<16x128xf32>, i32 -> vector<16x128xf32>
    %1000 = vector.broadcast %998 : f32 to vector<16x128xf32>
    %1001 = arith.mulf %1000, %999 : vector<16x128xf32>
    %1002 = arith.addf %997, %1001 : vector<16x128xf32>
    %c88_396 = arith.constant 88 : index
    %1003 = memref.load %arg2[%c88_396] : memref<98xf32, #tpu.memory_space<smem>>
    %c124_i32_397 = arith.constant 124 : i32
    %1004 = tpu.dynamic_rotate %983 by %c124_i32_397 dim 1 : vector<16x128xf32>, i32 -> vector<16x128xf32>
    %1005 = vector.broadcast %1003 : f32 to vector<16x128xf32>
    %1006 = arith.mulf %1005, %1004 : vector<16x128xf32>
    %1007 = arith.addf %1002, %1006 : vector<16x128xf32>
    %c89_398 = arith.constant 89 : index
    %1008 = memref.load %arg2[%c89_398] : memref<98xf32, #tpu.memory_space<smem>>
    %c123_i32_399 = arith.constant 123 : i32
    %1009 = tpu.dynamic_rotate %983 by %c123_i32_399 dim 1 : vector<16x128xf32>, i32 -> vector<16x128xf32>
    %1010 = vector.broadcast %1008 : f32 to vector<16x128xf32>
    %1011 = arith.mulf %1010, %1009 : vector<16x128xf32>
    %1012 = arith.addf %1007, %1011 : vector<16x128xf32>
    %c90_400 = arith.constant 90 : index
    %1013 = memref.load %arg2[%c90_400] : memref<98xf32, #tpu.memory_space<smem>>
    %c122_i32_401 = arith.constant 122 : i32
    %1014 = tpu.dynamic_rotate %983 by %c122_i32_401 dim 1 : vector<16x128xf32>, i32 -> vector<16x128xf32>
    %1015 = vector.broadcast %1013 : f32 to vector<16x128xf32>
    %1016 = arith.mulf %1015, %1014 : vector<16x128xf32>
    %1017 = arith.addf %1012, %1016 : vector<16x128xf32>
    %c1_402 = arith.constant 1 : index
    %c1_403 = arith.constant 1 : index
    %c6_404 = arith.constant 6 : index
    %c0_405 = arith.constant 0 : index
    %1018 = vector.load %arg4[%c1_402, %c1_403, %c6_404, %c0_405] : memref<2x2x22x128xf32, #tpu.memory_space<vmem>>, vector<1x1x16x128xf32>
    %1019 = vector.shape_cast %1018 : vector<1x1x16x128xf32> to vector<16x128xf32>
    %c91_406 = arith.constant 91 : index
    %1020 = memref.load %arg2[%c91_406] : memref<98xf32, #tpu.memory_space<smem>>
    %1021 = vector.broadcast %1020 : f32 to vector<16x128xf32>
    %1022 = arith.mulf %1021, %1019 : vector<16x128xf32>
    %1023 = arith.addf %981, %1022 : vector<16x128xf32>
    %c92_407 = arith.constant 92 : index
    %1024 = memref.load %arg2[%c92_407] : memref<98xf32, #tpu.memory_space<smem>>
    %c127_i32_408 = arith.constant 127 : i32
    %1025 = tpu.dynamic_rotate %1019 by %c127_i32_408 dim 1 : vector<16x128xf32>, i32 -> vector<16x128xf32>
    %1026 = vector.broadcast %1024 : f32 to vector<16x128xf32>
    %1027 = arith.mulf %1026, %1025 : vector<16x128xf32>
    %1028 = arith.addf %1023, %1027 : vector<16x128xf32>
    %c93_409 = arith.constant 93 : index
    %1029 = memref.load %arg2[%c93_409] : memref<98xf32, #tpu.memory_space<smem>>
    %c126_i32_410 = arith.constant 126 : i32
    %1030 = tpu.dynamic_rotate %1019 by %c126_i32_410 dim 1 : vector<16x128xf32>, i32 -> vector<16x128xf32>
    %1031 = vector.broadcast %1029 : f32 to vector<16x128xf32>
    %1032 = arith.mulf %1031, %1030 : vector<16x128xf32>
    %1033 = arith.addf %1028, %1032 : vector<16x128xf32>
    %c94_411 = arith.constant 94 : index
    %1034 = memref.load %arg2[%c94_411] : memref<98xf32, #tpu.memory_space<smem>>
    %c125_i32_412 = arith.constant 125 : i32
    %1035 = tpu.dynamic_rotate %1019 by %c125_i32_412 dim 1 : vector<16x128xf32>, i32 -> vector<16x128xf32>
    %1036 = vector.broadcast %1034 : f32 to vector<16x128xf32>
    %1037 = arith.mulf %1036, %1035 : vector<16x128xf32>
    %1038 = arith.addf %1033, %1037 : vector<16x128xf32>
    %c95_413 = arith.constant 95 : index
    %1039 = memref.load %arg2[%c95_413] : memref<98xf32, #tpu.memory_space<smem>>
    %c124_i32_414 = arith.constant 124 : i32
    %1040 = tpu.dynamic_rotate %1019 by %c124_i32_414 dim 1 : vector<16x128xf32>, i32 -> vector<16x128xf32>
    %1041 = vector.broadcast %1039 : f32 to vector<16x128xf32>
    %1042 = arith.mulf %1041, %1040 : vector<16x128xf32>
    %1043 = arith.addf %1038, %1042 : vector<16x128xf32>
    %c96_415 = arith.constant 96 : index
    %1044 = memref.load %arg2[%c96_415] : memref<98xf32, #tpu.memory_space<smem>>
    %c123_i32_416 = arith.constant 123 : i32
    %1045 = tpu.dynamic_rotate %1019 by %c123_i32_416 dim 1 : vector<16x128xf32>, i32 -> vector<16x128xf32>
    %1046 = vector.broadcast %1044 : f32 to vector<16x128xf32>
    %1047 = arith.mulf %1046, %1045 : vector<16x128xf32>
    %1048 = arith.addf %1043, %1047 : vector<16x128xf32>
    %c97_417 = arith.constant 97 : index
    %1049 = memref.load %arg2[%c97_417] : memref<98xf32, #tpu.memory_space<smem>>
    %c122_i32_418 = arith.constant 122 : i32
    %1050 = tpu.dynamic_rotate %1019 by %c122_i32_418 dim 1 : vector<16x128xf32>, i32 -> vector<16x128xf32>
    %1051 = vector.broadcast %1049 : f32 to vector<16x128xf32>
    %1052 = arith.mulf %1051, %1050 : vector<16x128xf32>
    %1053 = arith.addf %1048, %1052 : vector<16x128xf32>
    %1054 = arith.addf %801, %765 : vector<16x128xf32>
    %1055 = arith.addf %1053, %1017 : vector<16x128xf32>
    %1056 = arith.addf %1054, %1055 : vector<16x128xf32>
    %1057 = vector.extract_strided_slice %1056 {offsets = [0, 0], sizes = [16, 16], strides = [1, 1]} : vector<16x128xf32> to vector<16x16xf32>
    %1058 = arith.negf %1057 : vector<16x16xf32>
    %1059 = math.exp %1058 : vector<16x16xf32>
    %cst_419 = arith.constant 1.000000e+00 : f32
    %1060 = vector.broadcast %cst_419 : f32 to vector<16x16xf32>
    %1061 = arith.addf %1060, %1059 : vector<16x16xf32>
    %1062 = arith.divf %1060, %1061 : vector<16x16xf32>
    %c1_420 = arith.constant 1 : index
    %c0_421 = arith.constant 0 : index
    %c0_422 = arith.constant 0 : index
    %c0_423 = arith.constant 0 : index
    %1063 = vector.load %arg3[%c1_420, %c0_421, %c0_422, %c0_423] : memref<2x1x16x16xf32, #tpu.memory_space<vmem>>, vector<1x1x16x16xf32>
    %1064 = vector.shape_cast %1063 : vector<1x1x16x16xf32> to vector<16x16xf32>
    %1065 = vector.shape_cast %1062 : vector<16x16xf32> to vector<1x1x16x16xf32>
    tpu.vector_store %arg3[%c1_420, %c0_421, %c0_422, %c0_423], %1065 {strides = array<i32>} : memref<2x1x16x16xf32, #tpu.memory_space<vmem>>, vector<1x1x16x16xf32>,
    return
  }
  func.func @transform_0(%arg0: i32) -> (i32, i32, i32, i32) {
    %c0_i32 = arith.constant 0 : i32
    %c0_i32_0 = arith.constant 0 : i32
    %c0_i32_1 = arith.constant 0 : i32
    %c0_i32_2 = arith.constant 0 : i32
    return %arg0, %c0_i32, %c0_i32_0, %c0_i32_1 : i32, i32, i32, i32
  }
  func.func @transform_1(%arg0: i32) -> i32 {
    %c0_i32 = arith.constant 0 : i32
    %c0_i32_0 = arith.constant 0 : i32
    return %c0_i32 : i32
  }
  func.func @transform_2(%arg0: i32) -> (i32, i32, i32, i32) {
    %c0_i32 = arith.constant 0 : i32
    %c0_i32_0 = arith.constant 0 : i32
    %c0_i32_1 = arith.constant 0 : i32
    %c0_i32_2 = arith.constant 0 : i32
    return %arg0, %c0_i32, %c0_i32_0, %c0_i32_1 : i32, i32, i32, i32
  }
}

</mosaic_0001>

<bundles_post_ra>
// kernel: tpu_custom_call.1
= control target key start
LH: loop header
LB: loop body
LE: loop exit
PB: predicated region body
PF: predicated region fallthrough
CT: control target
= control target key end

     0   :  { %7 = vsyncpa [#allocation4], 0  ;;  %s4706_s0 = inlined_call_operand.hbm [shape: f32[2,4,16,16], index: 0, kind: input, shape index: {}]   ;;  %s4707_s1 = inlined_call_operand.vmem [shape: f32[98], index: 1, kind: input, shape index: {}]   ;;  %s4708_s2 = inlined_call_operand.hbm [shape: f32[2,1,16,16], index: 2, kind: output, shape index: {}]  }
   0x1   :  { %8 = vsyncpa [#allocation6], 0 }
   0x2   :  { %9 = vsyncpa [#allocation5], 0  ;;  %s2438_s9 = smov [#allocation3]   ;;  %s28_s13 = sshll.u32 %s4707_s1, 4  ;;  %s29_s13 = int_to_ptr.vmem [resolvable:$true] %s28_s13 }
   0x3   :  { %s15_s10 = sshll.u32 %s2438_s9, 4  ;;  %s2376_s16 = scalar_lea.hbm %s4706_s0, 2048  ;;  %s16_s10 = int_to_ptr.vmem [resolvable:$true] %s15_s10 }
   0x4   :  { %p2377_p0 = scmp.ne.s32.totalorder %s4706_s0, %s2376_s16  ;;  %p2380_p1 = scmp.lt.u32.totalorder %s2376_s16, %s4706_s0 }
   0x6   :  { %p2382_p2 = pnand %p2380_p1, %p2377_p0 }
   0x8   :  { %2385 = shalt.err (!%p2382_p2)
}
   0x9   :  { %s2386_s21 = scalar_lea.vmem %s16_s10, 2048  ;;  %p2391_p4 = scmp.lt.s32.totalorder %s16_s10, %s16_s10 }
   0xa   :  { %p2387_p3 = scmp.ne.s32.totalorder %s16_s10, %s2386_s21  ;;  %p2392_p5 = scmp.lt.s32.totalorder %s2386_s21, %s2386_s21 }
   0xc   :  { %p2393_p6 = por %p2392_p5, %p2391_p4 }
   0xe   :  { %p2394_p7 = pnand %p2393_p6, %p2387_p3 }
  0x10   :  { %2397 = shalt.err (!%p2394_p7)
}
  0x11   :  { %s2439_s1 = smov 128   ;;  %s2440_s22 = smov 8  }
  0x12   :  { %21 = dma.hbm_to_vmem [thread:$0]  %s4706_s0, 2048, %s16_s10, [#allocation4], %s2439_s1, %s2439_s1, %s2440_s22  }
  0x13   :  { %s2398_s25 = scalar_lea.vmem %s29_s13, 16  ;;  %p2403_p9 = scmp.lt.s32.totalorder %s29_s13, %s29_s13 }
  0x14   :  { %p2399_p8 = scmp.ne.s32.totalorder %s29_s13, %s2398_s25  ;;  %p2404_p10 = scmp.lt.s32.totalorder %s2398_s25, %s2398_s25 }
  0x16   :  { %p2405_p11 = por %p2404_p10, %p2403_p9 }
  0x18   :  { %p2406_p12 = pnand %p2405_p11, %p2399_p8 }
  0x1a   :  { %2409 = shalt.err (!%p2406_p12)
}
  0x1b   :  { %s2441_s26 = smov [#allocation7]  }
  0x1c   :  { %31 = dma.vmem_to_smem %s29_s13, 16, %s2441_s26, [#allocation6]  }
  0x1d   :  { %2432 = dma.done.wait [#allocation4], 2048  }
  0x1e   :  { %2433 = vsyncadd [#allocation4], 4294965248 }
  0x1f   :  { %2434 = dma.done.wait [#allocation6], 16  }
  0x20   :  { %2435 = vsyncadd [#allocation6], 4294967280 }
  0x21   :  { %38 = sfence }
  0x22   :  { %v51_v0 = vld [vmem:[#allocation3] sm:$0xff]  ;;  %v53_v1 = vld [vmem:[#allocation3 + $0x10] sm:$0xff]  ;;  %vm59_vm0 = vcmask 130048   ;;  %v52_v7 = vld [vmem:[#allocation3 + $0x8] sm:$0xff]  ;;  %s2442_s0 = smov 3   ;;  %v2443_v48 = vmov 0.0  }
  0x23   :  { %v55_v2 = vld [vmem:[#allocation3 + $0x20] sm:$0xff]  ;;  %v57_v3 = vld [vmem:[#allocation3 + $0x30] sm:$0xff]  ;;  %v60_v4 = vsel %vm59_vm0, %v51_v0, 0.0  ;;  %v61_v5 = vsel %vm59_vm0, %v53_v1, 0.0  ;;  %v54_v8 = vld [vmem:[#allocation3 + $0x18] sm:$0xff]  ;;  %v67_v13 = vsel %vm59_vm0, %v52_v7, 0.0 }
  0x24   :  { %v63_v6 = vsel %vm59_vm0, %v55_v2, 0.0  ;;  %v62_v9 = vadd.f32 %v61_v5, %v60_v4  ;;  %v65_v10 = vsel %vm59_vm0, %v57_v3, 0.0  ;;  %v56_v11 = vld [vmem:[#allocation3 + $0x28] sm:$0xff]  ;;  %v58_v12 = vld [vmem:[#allocation3 + $0x38] sm:$0xff]  ;;  %v68_v14 = vsel %vm59_vm0, %v54_v8, 0.0  ;;  %v113_v27 = vld [vmem:[#allocation3 + $0x40] sm:$0xff] }
  0x25   :  { %v69_v15 = vadd.f32 %v68_v14, %v67_v13  ;;  %v70_v16 = vsel %vm59_vm0, %v56_v11, 0.0  ;;  %v72_v17 = vsel %vm59_vm0, %v58_v12, 0.0  ;;  %v87_v18 = vsel %vm59_vm0, %v51_v0, -inf  ;;  %v115_v28 = vld [vmem:[#allocation3 + $0x50] sm:$0xff]  ;;  %v117_v33 = vld [vmem:[#allocation3 + $0x60] sm:$0xff]  ;;  %v114_v39 = vld [vmem:[#allocation3 + $0x48] sm:$0xff] }
  0x26   :  { %v64_v19 = vadd.f32 %v63_v6, %v62_v9  ;;  %v88_v20 = vsel %vm59_vm0, %v53_v1, -inf  ;;  %v89_v21 = vsel %vm59_vm0, %v55_v2, -inf  ;;  %v91_v22 = vsel %vm59_vm0, %v57_v3, -inf  ;;  %v119_v34 = vld [vmem:[#allocation3 + $0x70] sm:$0xff]  ;;  %v116_v40 = vld [vmem:[#allocation3 + $0x58] sm:$0xff]  ;;  %v118_v41 = vld [vmem:[#allocation3 + $0x68] sm:$0xff] }
  0x27   :  { %v71_v23 = vadd.f32 %v70_v16, %v69_v15  ;;  %v90_v24 = vmax.f32 %v87_v18, %v89_v21  ;;  %v92_v25 = vmax.f32 %v88_v20, %v91_v22  ;;  %v94_v26 = vsel %vm59_vm0, %v52_v7, -inf  ;;  %v120_v45 = vld [vmem:[#allocation3 + $0x78] sm:$0xff]  ;;  %39 = vst [vmem:[#allocation2] sm:$0xff] %v2443_v48  ;;  %40 = vst [vmem:[#allocation2 + $0x8] sm:$0xff] %v2443_v48  ;;  %s2444_s27 = smov 127   ;;  %s2445_s28 = smov 126  }
  0x28   :  { %v66_v29 = vadd.f32 %v65_v10, %v64_v19  ;;  %v95_v30 = vsel %vm59_vm0, %v54_v8, -inf  ;;  %v96_v31 = vsel %vm59_vm0, %v56_v11, -inf  ;;  %v98_v32 = vsel %vm59_vm0, %v58_v12, -inf  ;;  %41 = vst [vmem:[#allocation2 + $0x10] sm:$0x3f] %v2443_v48  ;;  %42 = vst [vmem:[#allocation2 + $0x18] sm:$0xff] %v2443_v48 }
  0x29   :  { %v73_v35 = vadd.f32 %v72_v17, %v71_v23  ;;  %v93_v36 = vmax.f32 %v90_v24, %v92_v25  ;;  %v97_v37 = vmax.f32 %v94_v26, %v96_v31  ;;  %v99_v38 = vmax.f32 %v95_v30, %v98_v32  ;;  %43 = vst [vmem:[#allocation2 + $0x20] sm:$0xff] %v2443_v48  ;;  %s2446_s29 = smov 125   ;;  %s2447_s30 = smov 124  }
  0x2a   :  { %v74_v42 = vmul.f32 0.25, %v66_v29  ;;  %v121_v43 = vsel %vm59_vm0, %v113_v27, 0.0  ;;  %v122_v44 = vsel %vm59_vm0, %v115_v28, 0.0  ;;  %44 = vst [vmem:[#allocation2 + $0x28] sm:$0x3f] %v2443_v48  ;;  %45 = vst [vmem:[#allocation2 + $0x30] sm:$0xff] %v2443_v48 }
  0x2b   :  { %v75_v46 = vmul.f32 0.25, %v73_v35  ;;  %103 = vrot.lane.b32.xlu1 %v93_v36, %s2442_s0  ;;  %v100_v47 = vmax.f32 %v97_v37, %v99_v38  ;;  %46 = vst [vmem:[#allocation2 + $0x38] sm:$0xff] %v2443_v48  ;;  %47 = vst [vmem:[#allocation2 + $0x40] sm:$0x3f] %v2443_v48  ;;  %v123_v49 = vadd.f32 %v122_v44, %v121_v43  ;;  %v124_v50 = vsel %vm59_vm0, %v117_v33, 0.0  ;;  %s2448_s3 = smov 123  }
  0x2c   :  { %48 = vst [vmem:[#allocation2 + $0x48] sm:$0xff] %v2443_v48  ;;  %49 = vst [vmem:[#allocation2 + $0x50] sm:$0xff] %v2443_v48  ;;  %78 = vrot.lane.b32.xlu0 %v74_v42, %s2442_s0  ;;  %v126_v51 = vsel %vm59_vm0, %v119_v34, 0.0  ;;  %v128_v52 = vsel %vm59_vm0, %v114_v39, 0.0  ;;  %v129_v53 = vsel %vm59_vm0, %v116_v40, 0.0  ;;  %v131_v54 = vsel %vm59_vm0, %v118_v41, 0.0 }
  0x2d   :  { %50 = vst [vmem:[#allocation2 + $0x58] sm:$0x3f] %v2443_v48  ;;  %v125_v55 = vadd.f32 %v124_v50, %v123_v49  ;;  %v130_v56 = vadd.f32 %v129_v53, %v128_v52  ;;  %v133_v57 = vsel %vm59_vm0, %v120_v45, 0.0  ;;  %v148_v58 = vsel %vm59_vm0, %v113_v27, -inf  ;;  %s2449_s4 = smov 122   ;;  %s2841_s5 = sld [smem:[#allocation7 + $0x1]] }
  0x2e   :  { %v149_v59 = vsel %vm59_vm0, %v115_v28, -inf  ;;  %v150_v60 = vsel %vm59_vm0, %v117_v33, -inf  ;;  %v152_v61 = vsel %vm59_vm0, %v119_v34, -inf  ;;  %v155_v62 = vsel %vm59_vm0, %v114_v39, -inf  ;;  %s2845_s6 = sld [smem:[#allocation7]]  ;;  %s2847_s7 = sld [smem:[#allocation7 + $0x2]] }
  0x2f   :  { %105 = vrot.lane.b32.xlu1 %v100_v47, %s2442_s0  ;;  %v127_v63 = vadd.f32 %v126_v51, %v125_v55  ;;  %v132_v0 = vadd.f32 %v131_v54, %v130_v56  ;;  %v151_v1 = vmax.f32 %v148_v58, %v150_v60  ;;  %v153_v2 = vmax.f32 %v149_v59, %v152_v61  ;;  %s2853_s8 = sld [smem:[#allocation7 + $0x3]]  ;;  %s2857_s9 = sld [smem:[#allocation7 + $0x4]] }
  0x30   :  { %80 = vrot.lane.b32.xlu0 %v75_v46, %s2442_s0  ;;  %v156_v3 = vsel %vm59_vm0, %v116_v40, -inf  ;;  %v157_v4 = vsel %vm59_vm0, %v118_v41, -inf  ;;  %v159_v5 = vsel %vm59_vm0, %v120_v45, -inf  ;;  %vm84_vm1 = vcmask 154648   ;;  %s2863_s10 = sld [smem:[#allocation7 + $0x7]]  ;;  %s2868_s11 = sld [smem:[#allocation7 + $0x5]] }
  0x31   :  { %v135_v6 = vmul.f32 0.25, %v127_v63  ;;  %v134_v7 = vadd.f32 %v133_v57, %v132_v0  ;;  %v158_v8 = vmax.f32 %v155_v62, %v157_v4  ;;  %v160_v9 = vmax.f32 %v156_v3, %v159_v5  ;;  %s2870_s12 = sld [smem:[#allocation7 + $0xe]]  ;;  %s2879_s14 = sld [smem:[#allocation7 + $0x15]] }
  0x32   :  { %v154_v11 = vmax.f32 %v151_v1, %v153_v2  ;;  %s2877_s13 = sld [smem:[#allocation7 + $0x6]]  ;;  %s2889_s15 = sld [smem:[#allocation7 + $0x8]] }
  0x33   :  { %v136_v10 = vmul.f32 0.25, %v134_v7  ;;  %v161_v12 = vmax.f32 %v158_v8, %v160_v9  ;;  %s2891_s16 = sld [smem:[#allocation7 + $0x1c]]  ;;  %s2907_s17 = sld [smem:[#allocation7 + $0x9]] }
  0x34   :  { %139 = vrot.lane.b32.xlu0 %v135_v6, %s2442_s0  ;;  %s2910_s18 = sld [smem:[#allocation7 + $0xa]]  ;;  %s2913_s19 = sld [smem:[#allocation7 + $0xf]] }
  0x35   :  { %141 = vrot.lane.b32.xlu1 %v136_v10, %s2442_s0  ;;  %s2922_s20 = sld [smem:[#allocation7 + $0xb]]  ;;  %s2925_s21 = sld [smem:[#allocation7 + $0xc]] }
  0x36   :  { %s2927_s23 = sld [smem:[#allocation7 + $0x10]]  ;;  %s2936_s24 = sld [smem:[#allocation7 + $0xd]] }
  0x37   :  { %s2941_s25 = sld [smem:[#allocation7 + $0x11]]  ;;  %s2943_s26 = sld [smem:[#allocation7 + $0x12]] }
  0x38   :  { %164 = vrot.lane.b32.xlu0 %v154_v11, %s2442_s0 }
  0x39   :  { %166 = vrot.lane.b32.xlu1 %v161_v12, %s2442_s0  ;;  %s2956_s0 = sld [smem:[#allocation7 + $0x13]] }
  0x9d   :  { %v104_v13 = vpop.permute.xlu1 %103 }
  0x9e   :  { %v79_v14 = vpop.permute.xlu0 %78  ;;  %110 = vst.msk [vmem:[#allocation2 + $0x1b] sm:$0xff] %vm84_vm1, %v104_v13 }
  0x9f   :  { %85 = vst.msk [vmem:[#allocation2 + $0x3] sm:$0xff] %vm84_vm1, %v79_v14 }
  0xa1   :  { %v106_v15 = vpop.permute.xlu1 %105 }
  0xa2   :  { %v81_v16 = vpop.permute.xlu0 %80  ;;  %111 = vst.msk [vmem:[#allocation2 + $0x23] sm:$0xff] %vm84_vm1, %v106_v15 }
  0xa3   :  { %86 = vst.msk [vmem:[#allocation2 + $0xb] sm:$0xff] %vm84_vm1, %v81_v16 }
  0xa5   :  { %v649_v62 = vld [vmem:[#allocation2 + $0x18] sm:$0xff] }
  0xa6   :  { %v2528_v17 = vld [vmem:[#allocation2] sm:$0xff]  ;;  %v140_v18 = vpop.permute.xlu0 %139 }
  0xa7   :  { %182 = vrot.lane.b32.xlu0 %v2528_v17, %s2444_s27  ;;  %146 = vst.msk [vmem:[#allocation2 + $0x33] sm:$0xff] %vm84_vm1, %v140_v18  ;;  %v142_v19 = vpop.permute.xlu1 %141  ;;  %v2558_v23 = vld [vmem:[#allocation2 + $0x1] sm:$0xff]  ;;  %v717_v12 = vld [vmem:[#allocation2 + $0x19] sm:$0xff] }
  0xa8   :  { %147 = vst.msk [vmem:[#allocation2 + $0x3b] sm:$0xff] %vm84_vm1, %v142_v19  ;;  %v2586_v25 = vld [vmem:[#allocation2 + $0x2] sm:$0xff] }
  0xa9   :  { %v2614_v27 = vld [vmem:[#allocation2 + $0x3] sm:$0xff] }
  0xaa   :  { %v2534_v20 = vld [vmem:[#allocation2 + $0x8] sm:$0xff]  ;;  %v165_v21 = vpop.permute.xlu0 %164  ;;  %v650_v1 = vld [vmem:[#allocation2 + $0x20] sm:$0xff] }
  0xab   :  { %184 = vrot.lane.b32.xlu1 %v2534_v20, %s2444_s27  ;;  %192 = vrot.lane.b32.xlu0 %v2528_v17, %s2445_s28  ;;  %171 = vst.msk [vmem:[#allocation2 + $0x4b] sm:$0xff] %vm84_vm1, %v165_v21  ;;  %v167_v22 = vpop.permute.xlu1 %166  ;;  %v2564_v24 = vld [vmem:[#allocation2 + $0x9] sm:$0xff]  ;;  %v718_v15 = vld [vmem:[#allocation2 + $0x21] sm:$0xff] }
  0xac   :  { %172 = vst.msk [vmem:[#allocation2 + $0x53] sm:$0xff] %vm84_vm1, %v167_v22  ;;  %v2592_v26 = vld [vmem:[#allocation2 + $0xa] sm:$0xff] }
  0xad   :  { %v2620_v28 = vld [vmem:[#allocation2 + $0xb] sm:$0xff] }
  0xae   :  { %v2642_v29 = vld [vmem:[#allocation2 + $0x4] sm:$0xff]  ;;  %v2648_v30 = vld [vmem:[#allocation2 + $0xc] sm:$0xff] }
  0xaf   :  { %194 = vrot.lane.b32.xlu1 %v2534_v20, %s2445_s28  ;;  %202 = vrot.lane.b32.xlu0 %v2528_v17, %s2446_s29  ;;  %v2676_v34 = vld [vmem:[#allocation2 + $0x5] sm:$0xff]  ;;  %v2686_v37 = vld [vmem:[#allocation2 + $0xd] sm:$0xff] }
  0xb0   :  { %4722 = vst [vmem:[#allocation12_spill] sm:$0xff] %v2686_v37  ;;  %v2728_v48 = vld [vmem:[#allocation2 + $0x6] sm:$0xff]  ;;  %v2738_v51 = vld [vmem:[#allocation2 + $0xe] sm:$0xff] }
  0xb1   :  { %4723 = vst [vmem:[#allocation13_spill] sm:$0xff] %v2728_v48  ;;  %4724 = vst [vmem:[#allocation14_spill] sm:$0xff] %v2738_v51 }
  0xb3   :  { %204 = vrot.lane.b32.xlu1 %v2534_v20, %s2446_s29  ;;  %212 = vrot.lane.b32.xlu0 %v2528_v17, %s2447_s30 }
  0xb7   :  { %214 = vrot.lane.b32.xlu1 %v2534_v20, %s2447_s30  ;;  %222 = vrot.lane.b32.xlu0 %v2528_v17, %s2448_s3 }
  0xbb   :  { %224 = vrot.lane.b32.xlu1 %v2534_v20, %s2448_s3  ;;  %232 = vrot.lane.b32.xlu0 %v2528_v17, %s2449_s4 }
  0xbf   :  { %234 = vrot.lane.b32.xlu1 %v2534_v20, %s2449_s4  ;;  %250 = vrot.lane.b32.xlu0 %v2558_v23, %s2444_s27 }
  0xc3   :  { %252 = vrot.lane.b32.xlu1 %v2564_v24, %s2444_s27  ;;  %260 = vrot.lane.b32.xlu0 %v2558_v23, %s2445_s28 }
  0xc7   :  { %262 = vrot.lane.b32.xlu1 %v2564_v24, %s2445_s28  ;;  %270 = vrot.lane.b32.xlu0 %v2558_v23, %s2446_s29 }
  0xcb   :  { %272 = vrot.lane.b32.xlu1 %v2564_v24, %s2446_s29  ;;  %280 = vrot.lane.b32.xlu0 %v2558_v23, %s2447_s30 }
  0xcf   :  { %282 = vrot.lane.b32.xlu1 %v2564_v24, %s2447_s30  ;;  %290 = vrot.lane.b32.xlu0 %v2558_v23, %s2448_s3 }
  0xd3   :  { %292 = vrot.lane.b32.xlu1 %v2564_v24, %s2448_s3  ;;  %300 = vrot.lane.b32.xlu0 %v2558_v23, %s2449_s4 }
  0xd7   :  { %302 = vrot.lane.b32.xlu1 %v2564_v24, %s2449_s4  ;;  %318 = vrot.lane.b32.xlu0 %v2586_v25, %s2444_s27 }
  0xdb   :  { %320 = vrot.lane.b32.xlu1 %v2592_v26, %s2444_s27  ;;  %328 = vrot.lane.b32.xlu0 %v2586_v25, %s2445_s28 }
  0xdf   :  { %330 = vrot.lane.b32.xlu1 %v2592_v26, %s2445_s28  ;;  %338 = vrot.lane.b32.xlu0 %v2586_v25, %s2446_s29 }
  0xe3   :  { %340 = vrot.lane.b32.xlu1 %v2592_v26, %s2446_s29  ;;  %348 = vrot.lane.b32.xlu0 %v2586_v25, %s2447_s30 }
  0xe7   :  { %350 = vrot.lane.b32.xlu1 %v2592_v26, %s2447_s30  ;;  %358 = vrot.lane.b32.xlu0 %v2586_v25, %s2448_s3 }
  0xeb   :  { %360 = vrot.lane.b32.xlu1 %v2592_v26, %s2448_s3  ;;  %368 = vrot.lane.b32.xlu0 %v2586_v25, %s2449_s4 }
  0xef   :  { %370 = vrot.lane.b32.xlu1 %v2592_v26, %s2449_s4  ;;  %386 = vrot.lane.b32.xlu0 %v2614_v27, %s2444_s27 }
  0xf3   :  { %388 = vrot.lane.b32.xlu1 %v2620_v28, %s2444_s27  ;;  %396 = vrot.lane.b32.xlu0 %v2614_v27, %s2445_s28 }
  0xf7   :  { %398 = vrot.lane.b32.xlu1 %v2620_v28, %s2445_s28  ;;  %406 = vrot.lane.b32.xlu0 %v2614_v27, %s2446_s29 }
  0xfb   :  { %408 = vrot.lane.b32.xlu1 %v2620_v28, %s2446_s29  ;;  %416 = vrot.lane.b32.xlu0 %v2614_v27, %s2447_s30 }
  0xff   :  { %418 = vrot.lane.b32.xlu1 %v2620_v28, %s2447_s30  ;;  %426 = vrot.lane.b32.xlu0 %v2614_v27, %s2448_s3 }
 0x103   :  { %428 = vrot.lane.b32.xlu1 %v2620_v28, %s2448_s3  ;;  %436 = vrot.lane.b32.xlu0 %v2614_v27, %s2449_s4 }
 0x107   :  { %438 = vrot.lane.b32.xlu1 %v2620_v28, %s2449_s4  ;;  %454 = vrot.lane.b32.xlu0 %v2642_v29, %s2444_s27 }
 0x10b   :  { %456 = vrot.lane.b32.xlu1 %v2648_v30, %s2444_s27  ;;  %464 = vrot.lane.b32.xlu0 %v2642_v29, %s2445_s28 }
 0x10f   :  { %466 = vrot.lane.b32.xlu1 %v2648_v30, %s2445_s28  ;;  %474 = vrot.lane.b32.xlu0 %v2642_v29, %s2446_s29 }
 0x113   :  { %476 = vrot.lane.b32.xlu1 %v2648_v30, %s2446_s29  ;;  %484 = vrot.lane.b32.xlu0 %v2642_v29, %s2447_s30 }
 0x117   :  { %486 = vrot.lane.b32.xlu1 %v2648_v30, %s2447_s30  ;;  %494 = vrot.lane.b32.xlu0 %v2642_v29, %s2448_s3 }
 0x119   :  { %v2666_v31 = vpop.permute.xlu0 %182 }
 0x11b   :  { %496 = vrot.lane.b32.xlu1 %v2648_v30, %s2448_s3  ;;  %504 = vrot.lane.b32.xlu0 %v2642_v29, %s2449_s4 }
 0x11d   :  { %v2672_v32 = vpop.permute.xlu1 %184  ;;  %v2674_v33 = vpop.permute.xlu0 %192 }
 0x11f   :  { %506 = vrot.lane.b32.xlu1 %v2648_v30, %s2449_s4  ;;  %522 = vrot.lane.b32.xlu0 %v2676_v34, %s2444_s27 }
 0x121   :  { %v2682_v35 = vpop.permute.xlu1 %194  ;;  %v2684_v36 = vpop.permute.xlu0 %202 }
 0x123   :  { %524 = vrot.lane.b32.xlu1 %v2686_v37, %s2444_s27  ;;  %532 = vrot.lane.b32.xlu0 %v2676_v34, %s2445_s28 }
 0x125   :  { %v2692_v38 = vpop.permute.xlu1 %204  ;;  %v2694_v39 = vpop.permute.xlu0 %212 }
 0x127   :  { %534 = vrot.lane.b32.xlu1 %v2686_v37, %s2445_s28  ;;  %542 = vrot.lane.b32.xlu0 %v2676_v34, %s2446_s29 }
 0x129   :  { %v2700_v40 = vpop.permute.xlu1 %214  ;;  %v2702_v41 = vpop.permute.xlu0 %222 }
 0x12b   :  { %544 = vrot.lane.b32.xlu1 %v2686_v37, %s2446_s29  ;;  %552 = vrot.lane.b32.xlu0 %v2676_v34, %s2447_s30 }
 0x12d   :  { %v2708_v42 = vpop.permute.xlu1 %224  ;;  %v2710_v43 = vpop.permute.xlu0 %232 }
 0x12f   :  { %554 = vrot.lane.b32.xlu1 %v2686_v37, %s2447_s30  ;;  %562 = vrot.lane.b32.xlu0 %v2676_v34, %s2448_s3 }
 0x131   :  { %v2716_v44 = vpop.permute.xlu1 %234  ;;  %v2718_v45 = vpop.permute.xlu0 %250 }
 0x133   :  { %564 = vrot.lane.b32.xlu1 %v2686_v37, %s2448_s3  ;;  %572 = vrot.lane.b32.xlu0 %v2676_v34, %s2449_s4 }
 0x135   :  { %v2724_v46 = vpop.permute.xlu1 %252  ;;  %v2726_v47 = vpop.permute.xlu0 %260 }
 0x137   :  { %574 = vrot.lane.b32.xlu1 %v2686_v37, %s2449_s4  ;;  %590 = vrot.lane.b32.xlu0 %v2728_v48, %s2444_s27 }
 0x139   :  { %v2734_v49 = vpop.permute.xlu1 %262  ;;  %v2736_v50 = vpop.permute.xlu0 %270 }
 0x13b   :  { %592 = vrot.lane.b32.xlu1 %v2738_v51, %s2444_s27  ;;  %600 = vrot.lane.b32.xlu0 %v2728_v48, %s2445_s28 }
 0x13d   :  { %v2744_v52 = vpop.permute.xlu1 %272  ;;  %v2746_v53 = vpop.permute.xlu0 %280 }
 0x13f   :  { %602 = vrot.lane.b32.xlu1 %v2738_v51, %s2445_s28  ;;  %610 = vrot.lane.b32.xlu0 %v2728_v48, %s2446_s29 }
 0x141   :  { %v2752_v54 = vpop.permute.xlu1 %282  ;;  %v2754_v55 = vpop.permute.xlu0 %290 }
 0x143   :  { %612 = vrot.lane.b32.xlu1 %v2738_v51, %s2446_s29  ;;  %620 = vrot.lane.b32.xlu0 %v2728_v48, %s2447_s30 }
 0x145   :  { %v2760_v56 = vpop.permute.xlu1 %292  ;;  %v2762_v57 = vpop.permute.xlu0 %300 }
 0x147   :  { %622 = vrot.lane.b32.xlu1 %v2738_v51, %s2447_s30  ;;  %630 = vrot.lane.b32.xlu0 %v2728_v48, %s2448_s3 }
 0x149   :  { %v2768_v58 = vpop.permute.xlu1 %302  ;;  %v2770_v59 = vpop.permute.xlu0 %318 }
 0x14b   :  { %632 = vrot.lane.b32.xlu1 %v2738_v51, %s2448_s3  ;;  %640 = vrot.lane.b32.xlu0 %v2728_v48, %s2449_s4 }
 0x14d   :  { %v2776_v60 = vpop.permute.xlu1 %320  ;;  %v2778_v61 = vpop.permute.xlu0 %328 }
 0x14f   :  { %642 = vrot.lane.b32.xlu1 %v2738_v51, %s2449_s4  ;;  %658 = vrot.lane.b32.xlu0 %v649_v62, %s2444_s27 }
 0x151   :  { %v2783_v63 = vpop.permute.xlu1 %330  ;;  %v2785_v0 = vpop.permute.xlu0 %338 }
 0x153   :  { %660 = vrot.lane.b32.xlu1 %v650_v1, %s2444_s27  ;;  %668 = vrot.lane.b32.xlu0 %v649_v62, %s2445_s28 }
 0x155   :  { %v2789_v2 = vpop.permute.xlu1 %340  ;;  %v2791_v3 = vpop.permute.xlu0 %348 }
 0x157   :  { %670 = vrot.lane.b32.xlu1 %v650_v1, %s2445_s28  ;;  %678 = vrot.lane.b32.xlu0 %v649_v62, %s2446_s29 }
 0x159   :  { %v2795_v4 = vpop.permute.xlu1 %350  ;;  %v2797_v5 = vpop.permute.xlu0 %358 }
 0x15b   :  { %680 = vrot.lane.b32.xlu1 %v650_v1, %s2446_s29  ;;  %688 = vrot.lane.b32.xlu0 %v649_v62, %s2447_s30 }
 0x15d   :  { %v2801_v6 = vpop.permute.xlu1 %360  ;;  %v2803_v7 = vpop.permute.xlu0 %368 }
 0x15f   :  { %690 = vrot.lane.b32.xlu1 %v650_v1, %s2447_s30  ;;  %698 = vrot.lane.b32.xlu0 %v649_v62, %s2448_s3 }
 0x161   :  { %v2807_v8 = vpop.permute.xlu1 %370  ;;  %v2809_v9 = vpop.permute.xlu0 %386 }
 0x163   :  { %700 = vrot.lane.b32.xlu1 %v650_v1, %s2448_s3  ;;  %708 = vrot.lane.b32.xlu0 %v649_v62, %s2449_s4 }
 0x165   :  { %v2813_v10 = vpop.permute.xlu1 %388  ;;  %v2815_v11 = vpop.permute.xlu0 %396 }
 0x166   :  { %4725 = vst [vmem:[#allocation15_spill] sm:$0xff] %v2813_v10  ;;  %4726 = vst [vmem:[#allocation16_spill] sm:$0xff] %v2815_v11  ;;  %v226_v10 = vstv %s2868_s11  ;;  %s3036_s11 = sld [smem:[#allocation7 + $0x19]] }
 0x167   :  { %710 = vrot.lane.b32.xlu1 %v650_v1, %s2449_s4  ;;  %726 = vrot.lane.b32.xlu0 %v717_v12, %s2444_s27 }
 0x169   :  { %v2819_v13 = vpop.permute.xlu1 %398  ;;  %v2821_v14 = vpop.permute.xlu0 %406 }
 0x16a   :  { %4727 = vst [vmem:[#allocation17_spill] sm:$0xff] %v2819_v13  ;;  %4728 = vst [vmem:[#allocation18_spill] sm:$0xff] %v2821_v14 }
 0x16b   :  { %728 = vrot.lane.b32.xlu1 %v718_v15, %s2444_s27  ;;  %736 = vrot.lane.b32.xlu0 %v717_v12, %s2445_s28 }
 0x16d   :  { %v2825_v16 = vpop.permute.xlu1 %408  ;;  %v2827_v18 = vpop.permute.xlu0 %416 }
 0x16e   :  { %4729 = vst [vmem:[#allocation19_spill] sm:$0xff] %v2825_v16  ;;  %4730 = vst [vmem:[#allocation20_spill] sm:$0xff] %v2827_v18 }
 0x16f   :  { %738 = vrot.lane.b32.xlu1 %v718_v15, %s2445_s28  ;;  %746 = vrot.lane.b32.xlu0 %v717_v12, %s2446_s29 }
 0x171   :  { %v2831_v19 = vpop.permute.xlu1 %418  ;;  %v2833_v21 = vpop.permute.xlu0 %426 }
 0x172   :  { %4731 = vst [vmem:[#allocation21_spill] sm:$0xff] %v2831_v19  ;;  %4732 = vst [vmem:[#allocation22_spill] sm:$0xff] %v2833_v21 }
 0x173   :  { %748 = vrot.lane.b32.xlu1 %v718_v15, %s2446_s29  ;;  %756 = vrot.lane.b32.xlu0 %v717_v12, %s2447_s30 }
 0x175   :  { %v2837_v22 = vpop.permute.xlu1 %428  ;;  %v2839_v62 = vpop.permute.xlu0 %436 }
 0x176   :  { %4733 = vst [vmem:[#allocation23_spill] sm:$0xff] %v2837_v22  ;;  %4734 = vst [vmem:[#allocation24_spill] sm:$0xff] %v2839_v62  ;;  %v2865_v62 = vld [vmem:[#allocation2 + $0x1a] sm:$0xff]  ;;  %v196_v22 = vstv %s2847_s7  ;;  %s3010_s7 = sld [smem:[#allocation7 + $0x16]] }
 0x177   :  { %758 = vrot.lane.b32.xlu1 %v718_v15, %s2447_s30  ;;  %766 = vrot.lane.b32.xlu0 %v717_v12, %s2448_s3 }
 0x179   :  { %v2849_v1 = vpop.permute.xlu1 %438  ;;  %v2851_v51 = vpop.permute.xlu0 %454 }
 0x17a   :  { %4735 = vst [vmem:[#allocation25_spill] sm:$0xff] %v2849_v1  ;;  %4736 = vst [vmem:[#allocation26_spill] sm:$0xff] %v2851_v51  ;;  %v186_v1 = vstv %s2841_s5  ;;  %v244_v51 = vstv %s2863_s10  ;;  %s2973_s5 = sld [smem:[#allocation7 + $0x14]]  ;;  %s3027_s10 = sld [smem:[#allocation7 + $0x1d]] }
 0x17b   :  { %768 = vrot.lane.b32.xlu1 %v718_v15, %s2448_s3  ;;  %776 = vrot.lane.b32.xlu0 %v717_v12, %s2449_s4  ;;  %v176_v12 = vstv %s2845_s6  ;;  %v187_v18 = vmul.f32 %v186_v1, %v2666_v31  ;;  %v216_v31 = vstv %s2857_s9  ;;  %v188_v13 = vmul.f32 %v186_v1, %v2672_v32  ;;  %s3000_s6 = sld [smem:[#allocation7 + $0x23]]  ;;  %s3025_s9 = sld [smem:[#allocation7 + $0x18]] }
 0x17c   :  { %v178_v32 = vmul.f32 %v176_v12, %v2534_v20  ;;  %v380_v1 = vstv %s2879_s14  ;;  %s3050_s14 = sld [smem:[#allocation7 + $0x1b]] }
 0x17d   :  { %v2859_v48 = vpop.permute.xlu1 %456  ;;  %v2861_v37 = vpop.permute.xlu0 %464 }
 0x17e   :  { %4737 = vst [vmem:[#allocation27_spill] sm:$0xff] %v2859_v48  ;;  %4738 = vst [vmem:[#allocation28_spill] sm:$0xff] %v2861_v37  ;;  %v2886_v48 = vld [vmem:[#allocation2 + $0x22] sm:$0xff]  ;;  %v190_v20 = vadd.f32 %v188_v13, %v178_v32  ;;  %v2962_v32 = vmul.f32 %v380_v1, %v2620_v28 }
 0x17f   :  { %778 = vrot.lane.b32.xlu1 %v718_v15, %s2449_s4  ;;  %794 = vrot.lane.b32.xlu0 %v2865_v62, %s2444_s27  ;;  %v206_v15 = vstv %s2853_s8  ;;  %s3012_s8 = sld [smem:[#allocation7 + $0x17]] }
 0x180   :  { %v207_v11 = vmul.f32 %v206_v15, %v2684_v36  ;;  %v198_v36 = vmul.f32 %v196_v22, %v2682_v35  ;;  %v227_v35 = vmul.f32 %v226_v10, %v2702_v41 }
 0x181   :  { %v2881_v21 = vpop.permute.xlu1 %466  ;;  %v2883_v19 = vpop.permute.xlu0 %474 }
 0x182   :  { %4739 = vst [vmem:[#allocation29_spill] sm:$0xff] %v2881_v21  ;;  %4740 = vst [vmem:[#allocation30_spill] sm:$0xff] %v2883_v19  ;;  %v177_v21 = vmul.f32 %v176_v12, %v2528_v17  ;;  %v197_v19 = vmul.f32 %v196_v22, %v2674_v33  ;;  %v312_v17 = vstv %s2870_s12  ;;  %v254_v22 = vstv %s2889_s15  ;;  %s3040_s12 = sld [smem:[#allocation7 + $0x1a]]  ;;  %s3055_s15 = sld [smem:[#allocation7 + $0x1f]] }
 0x183   :  { %796 = vrot.lane.b32.xlu1 %v2886_v48, %s2444_s27  ;;  %804 = vrot.lane.b32.xlu0 %v2865_v62, %s2445_s28  ;;  %v313_v12 = vmul.f32 %v312_v17, %v2586_v25  ;;  %v2954_v13 = vmul.f32 %v312_v17, %v2592_v26  ;;  %v264_v26 = vstv %s2907_s17  ;;  %v256_v17 = vmul.f32 %v254_v22, %v2724_v46  ;;  %s3064_s17 = sld [smem:[#allocation7 + $0x20]] }
 0x184   :  { %v189_v37 = vadd.f32 %v187_v18, %v177_v21  ;;  %v217_v18 = vmul.f32 %v216_v31, %v2694_v39  ;;  %v236_v21 = vstv %s2877_s13  ;;  %v245_v39 = vmul.f32 %v244_v51, %v2558_v23  ;;  %s3042_s13 = sld [smem:[#allocation7 + $0x1e]] }
 0x185   :  { %v2900_v16 = vpop.permute.xlu1 %476  ;;  %v2902_v14 = vpop.permute.xlu0 %484  ;;  %v218_v23 = vmul.f32 %v216_v31, %v2700_v40  ;;  %v237_v25 = vmul.f32 %v236_v21, %v2710_v43  ;;  %v274_v31 = vstv %s2910_s18  ;;  %v342_v46 = vstv %s2941_s25  ;;  %s3076_s18 = sld [smem:[#allocation7 + $0x21]]  ;;  %s3146_s25 = sld [smem:[#allocation7 + $0x2c]] }
 0x186   :  { %4741 = vst [vmem:[#allocation31_spill] sm:$0xff] %v2900_v16  ;;  %4742 = vst [vmem:[#allocation32_spill] sm:$0xff] %v2902_v14  ;;  %v199_v33 = vadd.f32 %v197_v19, %v189_v37  ;;  %v208_v19 = vmul.f32 %v206_v15, %v2692_v38  ;;  %v200_v38 = vadd.f32 %v198_v36, %v190_v20  ;;  %v294_v20 = vstv %s2925_s21  ;;  %s3130_s21 = sld [smem:[#allocation7 + $0x25]] }
 0x187   :  { %806 = vrot.lane.b32.xlu1 %v2886_v48, %s2445_s28  ;;  %814 = vrot.lane.b32.xlu0 %v2865_v62, %s2446_s29  ;;  %v2959_v15 = vmul.f32 %v380_v1, %v2614_v27  ;;  %v322_v27 = vstv %s2913_s19  ;;  %v284_v1 = vstv %s2922_s20  ;;  %s3080_s19 = sld [smem:[#allocation7 + $0x22]]  ;;  %s3119_s20 = sld [smem:[#allocation7 + $0x24]] }
 0x188   :  { %v209_v37 = vadd.f32 %v207_v11, %v199_v33  ;;  %v246_v11 = vmul.f32 %v244_v51, %v2564_v24  ;;  %v210_v40 = vadd.f32 %v208_v19, %v200_v38  ;;  %v228_v24 = vmul.f32 %v226_v10, %v2708_v42 }
 0x189   :  { %v2930_v16 = vpop.permute.xlu1 %486  ;;  %v2932_v14 = vpop.permute.xlu0 %494  ;;  %v255_v51 = vmul.f32 %v254_v22, %v2718_v45  ;;  %v238_v45 = vmul.f32 %v236_v21, %v2716_v44  ;;  %v266_v38 = vmul.f32 %v264_v26, %v2734_v49  ;;  %v275_v44 = vmul.f32 %v274_v31, %v2736_v50 }
 0x18a   :  { %4743 = vst [vmem:[#allocation33_spill] sm:$0xff] %v2930_v16  ;;  %v448_v16 = vstv %s2891_s16  ;;  %v219_v41 = vadd.f32 %v217_v18, %v209_v37  ;;  %v220_v42 = vadd.f32 %v218_v23, %v210_v40  ;;  %v265_v18 = vmul.f32 %v264_v26, %v2726_v47  ;;  %s3112_s16 = sld [smem:[#allocation7 + $0x2a]] }
 0x18b   :  { %816 = vrot.lane.b32.xlu1 %v2886_v48, %s2446_s29  ;;  %824 = vrot.lane.b32.xlu0 %v2865_v62, %s2447_s30  ;;  %v2978_v28 = vmul.f32 %v448_v16, %v2642_v29  ;;  %v332_v29 = vstv %s2927_s23  ;;  %v323_v23 = vmul.f32 %v322_v27, %v2770_v59  ;;  %v352_v21 = vstv %s2943_s26  ;;  %s3136_s23 = sld [smem:[#allocation7 + $0x2b]]  ;;  %s3150_s26 = sld [smem:[#allocation7 + $0x27]] }
 0x18c   :  { %v229_v43 = vadd.f32 %v227_v35, %v219_v41  ;;  %v230_v35 = vadd.f32 %v228_v24, %v220_v42  ;;  %v304_v41 = vstv %s2936_s24  ;;  %v258_v22 = vadd.f32 %v256_v17, %v246_v11  ;;  %s3142_s24 = sld [smem:[#allocation7 + $0x26]] }
 0x18d   :  { %v2964_v33 = vpop.permute.xlu1 %496  ;;  %v2966_v36 = vpop.permute.xlu0 %504  ;;  %v333_v40 = vmul.f32 %v332_v29, %v2778_v61  ;;  %v276_v59 = vmul.f32 %v274_v31, %v2744_v52  ;;  %v285_v50 = vmul.f32 %v284_v1, %v2746_v53  ;;  %v343_v61 = vmul.f32 %v342_v46, %v2785_v0 }
 0x18e   :  { %v239_v10 = vadd.f32 %v237_v25, %v229_v43  ;;  %v257_v25 = vadd.f32 %v255_v51, %v245_v39  ;;  %v240_v47 = vadd.f32 %v238_v45, %v230_v35  ;;  %v362_v39 = vstv %s2956_s0  ;;  %v3020_v51 = vld [vmem:[#allocation2 + $0x1b] sm:$0xff]  ;;  %s3156_s0 = sld [smem:[#allocation7 + $0x28]] }
 0x18f   :  { %826 = vrot.lane.b32.xlu1 %v2886_v48, %s2447_s30  ;;  %834 = vrot.lane.b32.xlu0 %v2865_v62, %s2448_s3  ;;  %v286_v53 = vmul.f32 %v284_v1, %v2752_v54  ;;  %v295_v31 = vmul.f32 %v294_v20, %v2754_v55  ;;  %v372_v42 = vstv %s2973_s5  ;;  %v353_v54 = vmul.f32 %v352_v21, %v2791_v3  ;;  %s3163_s5 = sld [smem:[#allocation7 + $0x2d]] }
 0x190   :  { %v315_v49 = vadd.f32 %v313_v12, %v239_v10  ;;  %v267_v43 = vadd.f32 %v265_v18, %v257_v25  ;;  %v324_v12 = vmul.f32 %v322_v27, %v2776_v60  ;;  %v316_v60 = vadd.f32 %v2954_v13, %v240_v47 }
 0x191   :  { %v2990_v37 = vpop.permute.xlu1 %506  ;;  %v2992_v19 = vpop.permute.xlu0 %522  ;;  %v334_v27 = vmul.f32 %v332_v29, %v2783_v63  ;;  %v296_v45 = vmul.f32 %v294_v20, %v2760_v56  ;;  %v305_v17 = vmul.f32 %v304_v41, %v2762_v57  ;;  %v344_v3 = vmul.f32 %v342_v46, %v2789_v2  ;;  %v3052_v56 = vld [vmem:[#allocation2 + $0x23] sm:$0xff] }
 0x192   :  { %v325_v11 = vadd.f32 %v323_v23, %v315_v49  ;;  %v277_v52 = vadd.f32 %v275_v44, %v267_v43  ;;  %v326_v63 = vadd.f32 %v324_v12, %v316_v60  ;;  %v363_v1 = vmul.f32 %v362_v39, %v2797_v5 }
 0x193   :  { %836 = vrot.lane.b32.xlu1 %v2886_v48, %s2448_s3  ;;  %844 = vrot.lane.b32.xlu0 %v2865_v62, %s2449_s4  ;;  %v268_v62 = vadd.f32 %v266_v38, %v258_v22  ;;  %v306_v29 = vmul.f32 %v304_v41, %v2768_v58  ;;  %v516_v35 = vstv %s3000_s6  ;;  %v354_v38 = vmul.f32 %v352_v21, %v2795_v4  ;;  %s3188_s6 = sld [smem:[#allocation7 + $0x2f]] }
 0x194   :  { %v335_v0 = vadd.f32 %v333_v40, %v325_v11  ;;  %v287_v10 = vadd.f32 %v285_v50, %v277_v52  ;;  %v336_v2 = vadd.f32 %v334_v27, %v326_v63  ;;  %v373_v23 = vmul.f32 %v372_v42, %v2803_v7 }
 0x195   :  { %v3014_v24 = vpop.permute.xlu1 %524  ;;  %v3016_v26 = vpop.permute.xlu0 %532  ;;  %v278_v55 = vadd.f32 %v276_v59, %v268_v62  ;;  %v390_v41 = vstv %s3010_s7  ;;  %v400_v25 = vstv %s3012_s8  ;;  %v450_v44 = vmul.f32 %v448_v16, %v2648_v30  ;;  %v4744_v62 = vld [vmem:[#allocation15_spill] sm:$0xff]  ;;  %s3167_s7 = sld [smem:[#allocation7 + $0x29]]  ;;  %s3173_s8 = sld [smem:[#allocation7 + $0x2e]] }
 0x196   :  { %v345_v18 = vadd.f32 %v343_v61, %v335_v0  ;;  %v297_v20 = vadd.f32 %v295_v31, %v287_v10  ;;  %v346_v49 = vadd.f32 %v344_v3, %v336_v2  ;;  %v364_v7 = vmul.f32 %v362_v39, %v2801_v6  ;;  %v4745_v0 = vld [vmem:[#allocation26_spill] sm:$0xff] }
 0x197   :  { %846 = vrot.lane.b32.xlu1 %v2886_v48, %s2449_s4  ;;  %862 = vrot.lane.b32.xlu0 %v3020_v51, %s2444_s27  ;;  %v288_v57 = vadd.f32 %v286_v53, %v278_v55  ;;  %v410_v40 = vstv %s3025_s9  ;;  %v458_v43 = vstv %s3027_s10  ;;  %v3085_v30 = vmul.f32 %v516_v35, %v2676_v34  ;;  %s3206_s9 = sld [smem:[#allocation7 + $0x30]]  ;;  %s3413_s10 = sld [smem:[#allocation7 + $0x32]] }
 0x198   :  { %v355_v5 = vadd.f32 %v353_v54, %v345_v18  ;;  %v307_v22 = vadd.f32 %v305_v17, %v297_v20  ;;  %v356_v6 = vadd.f32 %v354_v38, %v346_v49  ;;  %v374_v59 = vmul.f32 %v372_v42, %v2807_v8  ;;  %v4746_v42 = vld [vmem:[#allocation16_spill] sm:$0xff]  ;;  %v4750_v20 = vld [vmem:[#allocation19_spill] sm:$0xff] }
 0x199   :  { %v3044_v48 = vpop.permute.xlu1 %534  ;;  %v3046_v13 = vpop.permute.xlu0 %542  ;;  %v298_v58 = vadd.f32 %v296_v45, %v288_v57  ;;  %v420_v50 = vstv %s3036_s11  ;;  %v391_v39 = vmul.f32 %v390_v41, %v2809_v9  ;;  %v392_v11 = vmul.f32 %v390_v41, %v4744_v62  ;;  %v4747_v9 = vld [vmem:[#allocation17_spill] sm:$0xff]  ;;  %v4748_v17 = vld [vmem:[#allocation28_spill] sm:$0xff]  ;;  %s3417_s11 = sld [smem:[#allocation7 + $0x31]] }
 0x19a   :  { %v365_v4 = vadd.f32 %v363_v1, %v355_v5  ;;  %v430_v12 = vstv %s3040_s12  ;;  %v468_v61 = vstv %s3042_s13  ;;  %v366_v53 = vadd.f32 %v364_v7, %v356_v6  ;;  %v4749_v1 = vld [vmem:[#allocation18_spill] sm:$0xff]  ;;  %v4754_v6 = vld [vmem:[#allocation29_spill] sm:$0xff]  ;;  %s3419_s12 = sld [smem:[#allocation7 + $0x33]]  ;;  %s3425_s13 = sld [smem:[#allocation7 + $0x34]] }
 0x19b   :  { %864 = vrot.lane.b32.xlu1 %v3052_v56, %s2444_s27  ;;  %872 = vrot.lane.b32.xlu0 %v3020_v51, %s2445_s28  ;;  %v308_v21 = vadd.f32 %v306_v29, %v298_v58  ;;  %v383_v31 = vadd.f32 %v2959_v15, %v307_v22  ;;  %v440_v60 = vstv %s3050_s14  ;;  %v459_v27 = vmul.f32 %v458_v43, %v4745_v0  ;;  %v4757_v0 = vld [vmem:[#allocation22_spill] sm:$0xff]  ;;  %s3429_s14 = sld [smem:[#allocation7 + $0x35]] }
 0x19c   :  { %v375_v16 = vadd.f32 %v373_v23, %v365_v4  ;;  %v401_v54 = vmul.f32 %v400_v25, %v4746_v42  ;;  %v402_v55 = vmul.f32 %v400_v25, %v4747_v9  ;;  %v478_v10 = vstv %s3055_s15  ;;  %v4751_v23 = vld [vmem:[#allocation27_spill] sm:$0xff]  ;;  %v4753_v4 = vld [vmem:[#allocation20_spill] sm:$0xff]  ;;  %s3435_s15 = sld [smem:[#allocation7 + $0x38]] }
 0x19d   :  { %v3071_v46 = vpop.permute.xlu1 %544  ;;  %v3073_v47 = vpop.permute.xlu0 %552  ;;  %v384_v8 = vadd.f32 %v2962_v32, %v308_v21  ;;  %v376_v15 = vadd.f32 %v374_v59, %v366_v53  ;;  %v469_v63 = vmul.f32 %v468_v61, %v4748_v17  ;;  %v488_v32 = vstv %s3064_s17  ;;  %v4755_v59 = vld [vmem:[#allocation32_spill] sm:$0xff]  ;;  %v4756_v53 = vld [vmem:[#allocation21_spill] sm:$0xff]  ;;  %s3440_s17 = sld [smem:[#allocation7 + $0x36]] }
 0x19e   :  { %v451_v45 = vadd.f32 %v2978_v28, %v375_v16  ;;  %v393_v18 = vadd.f32 %v391_v39, %v383_v31  ;;  %v411_v57 = vmul.f32 %v410_v40, %v4749_v1  ;;  %v412_v29 = vmul.f32 %v410_v40, %v4750_v20  ;;  %v4752_v28 = vld [vmem:[#allocation30_spill] sm:$0xff]  ;;  %v4760_v17 = vld [vmem:[#allocation24_spill] sm:$0xff] }
 0x19f   :  { %874 = vrot.lane.b32.xlu1 %v3052_v56, %s2445_s28  ;;  %882 = vrot.lane.b32.xlu0 %v3020_v51, %s2446_s29  ;;  %v394_v3 = vadd.f32 %v392_v11, %v384_v8  ;;  %v460_v58 = vmul.f32 %v458_v43, %v4751_v23  ;;  %v479_v41 = vmul.f32 %v478_v10, %v4752_v28  ;;  %v498_v25 = vstv %s3076_s18  ;;  %s3442_s18 = sld [smem:[#allocation7 + $0x3f]] }
 0x1a0   :  { %v461_v38 = vadd.f32 %v459_v27, %v451_v45  ;;  %v403_v22 = vadd.f32 %v401_v54, %v393_v18  ;;  %v421_v7 = vmul.f32 %v420_v50, %v4753_v4  ;;  %v508_v21 = vstv %s3080_s19  ;;  %v3179_v4 = vld [vmem:[#allocation2 + $0x1c] sm:$0xff]  ;;  %s3449_s19 = sld [smem:[#allocation7 + $0x37]] }
 0x1a1   :  { %v3097_v34 = vpop.permute.xlu1 %554  ;;  %v3099_v52 = vpop.permute.xlu0 %562  ;;  %v404_v49 = vadd.f32 %v402_v55, %v394_v3  ;;  %v452_v40 = vadd.f32 %v450_v44, %v376_v15  ;;  %v470_v16 = vmul.f32 %v468_v61, %v4754_v6  ;;  %v489_v39 = vmul.f32 %v488_v32, %v4755_v59  ;;  %v4758_v61 = vld [vmem:[#allocation31_spill] sm:$0xff]  ;;  %v4761_v3 = vld [vmem:[#allocation33_spill] sm:$0xff] }
 0x1a2   :  { %v471_v43 = vadd.f32 %v469_v63, %v461_v38  ;;  %v413_v62 = vadd.f32 %v411_v57, %v403_v22  ;;  %v422_v31 = vmul.f32 %v420_v50, %v4756_v53  ;;  %v431_v27 = vmul.f32 %v430_v12, %v4757_v0  ;;  %v4759_v50 = vld [vmem:[#allocation23_spill] sm:$0xff]  ;;  %v4762_v38 = vld [vmem:[#allocation12_spill] sm:$0xff] }
 0x1a3   :  { %884 = vrot.lane.b32.xlu1 %v3052_v56, %s2446_s29  ;;  %892 = vrot.lane.b32.xlu0 %v3020_v51, %s2447_s30  ;;  %v414_v11 = vadd.f32 %v412_v29, %v404_v49  ;;  %v462_v44 = vadd.f32 %v460_v58, %v452_v40  ;;  %v480_v9 = vmul.f32 %v478_v10, %v4758_v61  ;;  %v584_v18 = vstv %s3112_s16  ;;  %s3451_s16 = sld [smem:[#allocation7 + $0x46]] }
 0x1a4   :  { %v481_v54 = vadd.f32 %v479_v41, %v471_v43  ;;  %v499_v55 = vmul.f32 %v498_v25, %v2932_v14  ;;  %v423_v15 = vadd.f32 %v421_v7, %v413_v62  ;;  %v432_v45 = vmul.f32 %v430_v12, %v4759_v50  ;;  %v4763_v41 = vld [vmem:[#allocation25_spill] sm:$0xff]  ;;  %v4765_v62 = vld [vmem:[#allocation14_spill] sm:$0xff] }
 0x1a5   :  { %v3121_v2 = vpop.permute.xlu1 %564  ;;  %v3123_v5 = vpop.permute.xlu0 %572  ;;  %v441_v63 = vmul.f32 %v440_v60, %v4760_v17  ;;  %v472_v14 = vadd.f32 %v470_v16, %v462_v44  ;;  %v490_v1 = vmul.f32 %v488_v32, %v4761_v3  ;;  %v509_v12 = vmul.f32 %v508_v21, %v2966_v36  ;;  %v4764_v43 = vld [vmem:[#allocation13_spill] sm:$0xff] }
 0x1a6   :  { %v491_v10 = vadd.f32 %v489_v39, %v481_v54  ;;  %v424_v57 = vadd.f32 %v422_v31, %v414_v11  ;;  %v433_v20 = vadd.f32 %v431_v27, %v423_v15  ;;  %v526_v29 = vstv %s3119_s20  ;;  %s3461_s20 = sld [smem:[#allocation7 + $0x39]] }
 0x1a7   :  { %894 = vrot.lane.b32.xlu1 %v3052_v56, %s2447_s30  ;;  %902 = vrot.lane.b32.xlu0 %v3020_v51, %s2448_s3  ;;  %v518_v23 = vmul.f32 %v516_v35, %v4762_v38  ;;  %v442_v22 = vmul.f32 %v440_v60, %v4763_v41  ;;  %v482_v32 = vadd.f32 %v480_v9, %v472_v14  ;;  %v536_v40 = vstv %s3130_s21  ;;  %v3196_v9 = vld [vmem:[#allocation2 + $0x24] sm:$0xff]  ;;  %s3463_s21 = sld [smem:[#allocation7 + $0x4d]] }
 0x1a8   :  { %v501_v49 = vadd.f32 %v499_v55, %v491_v10  ;;  %v500_v36 = vmul.f32 %v498_v25, %v2964_v33  ;;  %v443_v7 = vadd.f32 %v441_v63, %v433_v20  ;;  %v585_v6 = vmul.f32 %v584_v18, %v4764_v43 }
 0x1a9   :  { %v3144_v8 = vpop.permute.xlu1 %574  ;;  %v591_v42 = vpop.permute.xlu0 %590  ;;  %v594_v35 = vstv %s3136_s23  ;;  %v434_v60 = vadd.f32 %v432_v45, %v424_v57  ;;  %v492_v16 = vadd.f32 %v490_v1, %v482_v32  ;;  %v510_v25 = vmul.f32 %v508_v21, %v2990_v37  ;;  %s3478_s23 = sld [smem:[#allocation7 + $0x3a]] }
 0x1aa   :  { %v511_v33 = vadd.f32 %v509_v12, %v501_v49  ;;  %v527_v59 = vmul.f32 %v526_v29, %v2992_v19  ;;  %v546_v39 = vstv %s3142_s24  ;;  %v586_v11 = vmul.f32 %v584_v18, %v4765_v62  ;;  %s3481_s24 = sld [smem:[#allocation7 + $0x3b]] }
 0x1ab   :  { %904 = vrot.lane.b32.xlu1 %v3052_v56, %s2448_s3  ;;  %912 = vrot.lane.b32.xlu0 %v3020_v51, %s2449_s4  ;;  %v604_v53 = vstv %s3146_s25  ;;  %v444_v27 = vadd.f32 %v442_v22, %v434_v60  ;;  %v502_v44 = vadd.f32 %v500_v36, %v492_v16  ;;  %v556_v54 = vstv %s3150_s26  ;;  %s3484_s25 = sld [smem:[#allocation7 + $0x40]]  ;;  %s3492_s26 = sld [smem:[#allocation7 + $0x3c]] }
 0x1ac   :  { %v595_v61 = vmul.f32 %v594_v35, %v591_v42  ;;  %v519_v55 = vadd.f32 %v3085_v30, %v443_v7  ;;  %v537_v37 = vmul.f32 %v536_v40, %v3016_v26  ;;  %v566_v21 = vstv %s3156_s0  ;;  %s3495_s0 = sld [smem:[#allocation7 + $0x3d]] }
 0x1ad   :  { %v593_v58 = vpop.permute.xlu1 %592  ;;  %v601_v28 = vpop.permute.xlu0 %600  ;;  %v614_v19 = vstv %s3163_s5  ;;  %v512_v15 = vadd.f32 %v510_v25, %v502_v44  ;;  %v576_v50 = vstv %s3167_s7  ;;  %v587_v42 = vadd.f32 %v585_v6, %v511_v33  ;;  %s3497_s5 = sld [smem:[#allocation7 + $0x41]]  ;;  %s3506_s7 = sld [smem:[#allocation7 + $0x3e]] }
 0x1ae   :  { %v605_v45 = vmul.f32 %v604_v53, %v601_v28  ;;  %v529_v17 = vadd.f32 %v527_v59, %v519_v55  ;;  %v528_v30 = vmul.f32 %v526_v29, %v3014_v24  ;;  %v547_v26 = vmul.f32 %v546_v39, %v3046_v13 }
 0x1af   :  { %914 = vrot.lane.b32.xlu1 %v3052_v56, %s2449_s4  ;;  %930 = vrot.lane.b32.xlu0 %v3179_v4, %s2444_s27  ;;  %v624_v18 = vstv %s3173_s8  ;;  %v520_v10 = vadd.f32 %v518_v23, %v444_v27  ;;  %v597_v3 = vadd.f32 %v595_v61, %v587_v42  ;;  %v596_v1 = vmul.f32 %v594_v35, %v593_v58  ;;  %s3509_s8 = sld [smem:[#allocation7 + $0x42]] }
 0x1b0   :  { %v539_v57 = vadd.f32 %v537_v37, %v529_v17  ;;  %v538_v20 = vmul.f32 %v536_v40, %v3044_v48  ;;  %v557_v38 = vmul.f32 %v556_v54, %v3073_v47  ;;  %v634_v24 = vstv %s3188_s6  ;;  %s3511_s6 = sld [smem:[#allocation7 + $0x43]] }
 0x1b1   :  { %v603_v31 = vpop.permute.xlu1 %602  ;;  %v611_v0 = vpop.permute.xlu0 %610  ;;  %v588_v13 = vadd.f32 %v586_v11, %v512_v15  ;;  %v607_v29 = vadd.f32 %v605_v45, %v597_v3  ;;  %v530_v23 = vadd.f32 %v528_v30, %v520_v10  ;;  %v548_v22 = vmul.f32 %v546_v39, %v3071_v46  ;;  %v3248_v30 = vld [vmem:[#allocation2 + $0x1d] sm:$0xff] }
 0x1b2   :  { %v615_v12 = vmul.f32 %v614_v19, %v611_v0  ;;  %v606_v28 = vmul.f32 %v604_v53, %v603_v31  ;;  %v549_v58 = vadd.f32 %v547_v26, %v539_v57  ;;  %v567_v48 = vmul.f32 %v566_v21, %v3099_v52 }
 0x1b3   :  { %932 = vrot.lane.b32.xlu1 %v3196_v9, %s2444_s27  ;;  %940 = vrot.lane.b32.xlu0 %v3179_v4, %s2445_s28  ;;  %v598_v49 = vadd.f32 %v596_v1, %v588_v13  ;;  %v540_v43 = vadd.f32 %v538_v20, %v530_v23  ;;  %v558_v35 = vmul.f32 %v556_v54, %v3097_v34  ;;  %v644_v60 = vstv %s3206_s9  ;;  %v3310_v23 = vld [vmem:[#allocation2 + $0x26] sm:$0xff]  ;;  %s3522_s9 = sld [smem:[#allocation7 + $0x44]] }
 0x1b4   :  { %v617_v36 = vadd.f32 %v615_v12, %v607_v29  ;;  %v559_v6 = vadd.f32 %v557_v38, %v549_v58  ;;  %v577_v46 = vmul.f32 %v576_v50, %v3123_v5  ;;  %v568_v39 = vmul.f32 %v566_v21, %v3121_v2  ;;  %v3300_v29 = vld [vmem:[#allocation2 + $0x1e] sm:$0xff]  ;;  %4770 = vst [vmem:[#allocation28_spill] sm:$0xff] %v3310_v23 }
 0x1b5   :  { %v613_v63 = vpop.permute.xlu1 %612  ;;  %v621_v14 = vpop.permute.xlu0 %620  ;;  %v608_v52 = vadd.f32 %v606_v28, %v598_v49  ;;  %v550_v25 = vadd.f32 %v548_v22, %v540_v43  ;;  %v578_v44 = vmul.f32 %v576_v50, %v3144_v8  ;;  %4769 = vst [vmem:[#allocation17_spill] sm:$0xff] %v3300_v29 }
 0x1b6   :  { %v625_v41 = vmul.f32 %v624_v18, %v621_v14  ;;  %v616_v7 = vmul.f32 %v614_v19, %v613_v63  ;;  %v569_v59 = vadd.f32 %v567_v48, %v559_v6  ;;  %v1145_v6 = vld [vmem:[#allocation2 + $0x30] sm:$0xff] }
 0x1b7   :  { %942 = vrot.lane.b32.xlu1 %v3196_v9, %s2445_s28  ;;  %950 = vrot.lane.b32.xlu0 %v3179_v4, %s2446_s29  ;;  %v560_v27 = vadd.f32 %v558_v35, %v550_v25 }
 0x1b8   :  { %v627_v16 = vadd.f32 %v625_v41, %v617_v36  ;;  %v618_v53 = vadd.f32 %v616_v7, %v608_v52  ;;  %v579_v5 = vadd.f32 %v577_v46, %v569_v59  ;;  %v1146_v46 = vld [vmem:[#allocation2 + $0x38] sm:$0xff] }
 0x1b9   :  { %v623_v32 = vpop.permute.xlu1 %622  ;;  %v631_v47 = vpop.permute.xlu0 %630  ;;  %v570_v37 = vadd.f32 %v568_v39, %v560_v27 }
 0x1ba   :  { %v635_v40 = vmul.f32 %v634_v24, %v631_v47  ;;  %v626_v33 = vmul.f32 %v624_v18, %v623_v32  ;;  %v3258_v18 = vld [vmem:[#allocation2 + $0x25] sm:$0xff] }
 0x1bb   :  { %952 = vrot.lane.b32.xlu1 %v3196_v9, %s2446_s29  ;;  %960 = vrot.lane.b32.xlu0 %v3179_v4, %s2447_s30  ;;  %v580_v42 = vadd.f32 %v578_v44, %v570_v37  ;;  %4768 = vst [vmem:[#allocation16_spill] sm:$0xff] %v3258_v18 }
 0x1bc   :  { %v637_v34 = vadd.f32 %v635_v40, %v627_v16  ;;  %v628_v54 = vadd.f32 %v626_v33, %v618_v53 }
 0x1bd   :  { %v633_v62 = vpop.permute.xlu1 %632  ;;  %v641_v11 = vpop.permute.xlu0 %640 }
 0x1be   :  { %v636_v31 = vmul.f32 %v634_v24, %v633_v62  ;;  %v645_v0 = vmul.f32 %v644_v60, %v641_v11 }
 0x1bf   :  { %962 = vrot.lane.b32.xlu1 %v3196_v9, %s2447_s30  ;;  %970 = vrot.lane.b32.xlu0 %v3179_v4, %s2448_s3 }
 0x1c0   :  { %v647_v61 = vadd.f32 %v645_v0, %v637_v34  ;;  %v638_v21 = vadd.f32 %v636_v31, %v628_v54  ;;  %v1213_v31 = vld [vmem:[#allocation2 + $0x31] sm:$0xff] }
 0x1c1   :  { %v643_v55 = vpop.permute.xlu1 %642  ;;  %v3234_v2 = vpop.permute.xlu0 %658 }
 0x1c2   :  { %v3236_v19 = vadd.f32 %v647_v61, %v579_v5  ;;  %v646_v15 = vmul.f32 %v644_v60, %v643_v55  ;;  %v1214_v5 = vld [vmem:[#allocation2 + $0x39] sm:$0xff] }
 0x1c3   :  { %972 = vrot.lane.b32.xlu1 %v3196_v9, %s2448_s3  ;;  %980 = vrot.lane.b32.xlu0 %v3179_v4, %s2449_s4 }
 0x1c4   :  { %4766 = vst [vmem:[#allocation15_spill] sm:$0xff] %v3236_v19  ;;  %v648_v45 = vadd.f32 %v646_v15, %v638_v21  ;;  %v672_v19 = vstv %s3419_s12  ;;  %s3576_s12 = sld [smem:[#allocation7 + $0x47]] }
 0x1c5   :  { %v3242_v17 = vpop.permute.xlu1 %660  ;;  %v3244_v8 = vpop.permute.xlu0 %668 }
 0x1c6   :  { %v3246_v50 = vadd.f32 %v648_v45, %v580_v42 }
 0x1c7   :  { %982 = vrot.lane.b32.xlu1 %v3196_v9, %s2449_s4  ;;  %998 = vrot.lane.b32.xlu0 %v3248_v30, %s2444_s27 }
 0x1c8   :  { %4767 = vst [vmem:[#allocation26_spill] sm:$0xff] %v3246_v50  ;;  %v662_v50 = vstv %s3413_s10  ;;  %s3539_s10 = sld [smem:[#allocation7 + $0x45]] }
 0x1c9   :  { %v3254_v26 = vpop.permute.xlu1 %670  ;;  %v3256_v63 = vpop.permute.xlu0 %678 }
 0x1cb   :  { %1000 = vrot.lane.b32.xlu1 %v3258_v18, %s2444_s27  ;;  %1008 = vrot.lane.b32.xlu0 %v3248_v30, %s2445_s28 }
 0x1cd   :  { %v3264_v14 = vpop.permute.xlu1 %680  ;;  %v3266_v10 = vpop.permute.xlu0 %688 }
 0x1cf   :  { %1010 = vrot.lane.b32.xlu1 %v3258_v18, %s2445_s28  ;;  %1018 = vrot.lane.b32.xlu0 %v3248_v30, %s2446_s29 }
 0x1d1   :  { %v3272_v3 = vpop.permute.xlu1 %690  ;;  %v3274_v1 = vpop.permute.xlu0 %698 }
 0x1d3   :  { %1020 = vrot.lane.b32.xlu1 %v3258_v18, %s2446_s29  ;;  %1028 = vrot.lane.b32.xlu0 %v3248_v30, %s2447_s30 }
 0x1d5   :  { %v3280_v12 = vpop.permute.xlu1 %700  ;;  %v3282_v57 = vpop.permute.xlu0 %708 }
 0x1d7   :  { %1030 = vrot.lane.b32.xlu1 %v3258_v18, %s2447_s30  ;;  %1038 = vrot.lane.b32.xlu0 %v3248_v30, %s2448_s3 }
 0x1d9   :  { %v3288_v20 = vpop.permute.xlu1 %710  ;;  %v3290_v38 = vpop.permute.xlu0 %726 }
 0x1db   :  { %1040 = vrot.lane.b32.xlu1 %v3258_v18, %s2448_s3  ;;  %1048 = vrot.lane.b32.xlu0 %v3248_v30, %s2449_s4 }
 0x1dd   :  { %v3296_v24 = vpop.permute.xlu1 %728  ;;  %v3298_v13 = vpop.permute.xlu0 %736 }
 0x1df   :  { %1050 = vrot.lane.b32.xlu1 %v3258_v18, %s2449_s4  ;;  %1066 = vrot.lane.b32.xlu0 %v3300_v29, %s2444_s27  ;;  %v3458_v18 = vld [vmem:[#allocation2 + $0x3a] sm:$0xff] }
 0x1e1   :  { %v3306_v28 = vpop.permute.xlu1 %738  ;;  %v3308_v41 = vpop.permute.xlu0 %746 }
 0x1e3   :  { %1068 = vrot.lane.b32.xlu1 %v3310_v23, %s2444_s27  ;;  %1076 = vrot.lane.b32.xlu0 %v3300_v29, %s2445_s28 }
 0x1e5   :  { %v3316_v58 = vpop.permute.xlu1 %748  ;;  %v3318_v22 = vpop.permute.xlu0 %756 }
 0x1e7   :  { %1078 = vrot.lane.b32.xlu1 %v3310_v23, %s2445_s28  ;;  %1086 = vrot.lane.b32.xlu0 %v3300_v29, %s2446_s29 }
 0x1e9   :  { %v3324_v48 = vpop.permute.xlu1 %758  ;;  %v3326_v32 = vpop.permute.xlu0 %766 }
 0x1eb   :  { %1088 = vrot.lane.b32.xlu1 %v3310_v23, %s2446_s29  ;;  %1096 = vrot.lane.b32.xlu0 %v3300_v29, %s2447_s30 }
 0x1ed   :  { %v3332_v47 = vpop.permute.xlu1 %768  ;;  %v3334_v49 = vpop.permute.xlu0 %776 }
 0x1ef   :  { %1098 = vrot.lane.b32.xlu1 %v3310_v23, %s2447_s30  ;;  %1106 = vrot.lane.b32.xlu0 %v3300_v29, %s2448_s3 }
 0x1f1   :  { %v3340_v36 = vpop.permute.xlu1 %778  ;;  %v3342_v7 = vpop.permute.xlu0 %794 }
 0x1f3   :  { %1108 = vrot.lane.b32.xlu1 %v3310_v23, %s2448_s3  ;;  %1116 = vrot.lane.b32.xlu0 %v3300_v29, %s2449_s4 }
 0x1f5   :  { %v3348_v40 = vpop.permute.xlu1 %796  ;;  %v3350_v43 = vpop.permute.xlu0 %804 }
 0x1f7   :  { %1118 = vrot.lane.b32.xlu1 %v3310_v23, %s2449_s4  ;;  %1154 = vrot.lane.b32.xlu0 %v1145_v6, %s2444_s27 }
 0x1f9   :  { %v3355_v35 = vpop.permute.xlu1 %806  ;;  %v3357_v60 = vpop.permute.xlu0 %814 }
 0x1fb   :  { %1156 = vrot.lane.b32.xlu1 %v1146_v46, %s2444_s27  ;;  %1164 = vrot.lane.b32.xlu0 %v1145_v6, %s2445_s28 }
 0x1fd   :  { %v3361_v52 = vpop.permute.xlu1 %816  ;;  %v3363_v16 = vpop.permute.xlu0 %824 }
 0x1ff   :  { %1166 = vrot.lane.b32.xlu1 %v1146_v46, %s2445_s28  ;;  %1174 = vrot.lane.b32.xlu0 %v1145_v6, %s2446_s29 }
 0x201   :  { %v3367_v33 = vpop.permute.xlu1 %826  ;;  %v3369_v25 = vpop.permute.xlu0 %834 }
 0x203   :  { %1176 = vrot.lane.b32.xlu1 %v1146_v46, %s2446_s29  ;;  %1184 = vrot.lane.b32.xlu0 %v1145_v6, %s2447_s30 }
 0x205   :  { %v3373_v59 = vpop.permute.xlu1 %836  ;;  %v3375_v39 = vpop.permute.xlu0 %844 }
 0x207   :  { %1186 = vrot.lane.b32.xlu1 %v1146_v46, %s2447_s30  ;;  %1194 = vrot.lane.b32.xlu0 %v1145_v6, %s2448_s3 }
 0x209   :  { %v3379_v62 = vpop.permute.xlu1 %846  ;;  %v3381_v11 = vpop.permute.xlu0 %862 }
 0x20b   :  { %1196 = vrot.lane.b32.xlu1 %v1146_v46, %s2448_s3  ;;  %1204 = vrot.lane.b32.xlu0 %v1145_v6, %s2449_s4 }
 0x20d   :  { %v3385_v53 = vpop.permute.xlu1 %864  ;;  %v3387_v34 = vpop.permute.xlu0 %872 }
 0x20e   :  { %4771 = vst [vmem:[#allocation18_spill] sm:$0xff] %v3387_v34 }
 0x20f   :  { %1206 = vrot.lane.b32.xlu1 %v1146_v46, %s2449_s4  ;;  %1222 = vrot.lane.b32.xlu0 %v1213_v31, %s2444_s27  ;;  %v3437_v46 = vld [vmem:[#allocation2 + $0x32] sm:$0xff] }
 0x211   :  { %v3391_v0 = vpop.permute.xlu1 %874  ;;  %v3393_v27 = vpop.permute.xlu0 %882 }
 0x212   :  { %4772 = vst [vmem:[#allocation19_spill] sm:$0xff] %v3391_v0  ;;  %4773 = vst [vmem:[#allocation27_spill] sm:$0xff] %v3393_v27  ;;  %v702_v27 = vstv %s3440_s17  ;;  %v2366_v0 = vld [vmem:[#allocation2 + $0x1a] sm:$0xff]  ;;  %s3602_s17 = sld [smem:[#allocation7 + $0x4a]] }
 0x213   :  { %1224 = vrot.lane.b32.xlu1 %v1214_v5, %s2444_s27  ;;  %1232 = vrot.lane.b32.xlu0 %v1213_v31, %s2445_s28 }
 0x215   :  { %v3397_v44 = vpop.permute.xlu1 %884  ;;  %v3399_v54 = vpop.permute.xlu0 %892 }
 0x216   :  { %4774 = vst [vmem:[#allocation30_spill] sm:$0xff] %v3397_v44  ;;  %4775 = vst [vmem:[#allocation20_spill] sm:$0xff] %v3399_v54  ;;  %v720_v44 = vstv %s3435_s15  ;;  %s3593_s15 = sld [smem:[#allocation7 + $0x4e]] }
 0x217   :  { %1234 = vrot.lane.b32.xlu1 %v1214_v5, %s2445_s28  ;;  %1242 = vrot.lane.b32.xlu0 %v1213_v31, %s2446_s29 }
 0x219   :  { %v3403_v61 = vpop.permute.xlu1 %894  ;;  %v3405_v55 = vpop.permute.xlu0 %902 }
 0x21a   :  { %4776 = vst [vmem:[#allocation29_spill] sm:$0xff] %v3403_v61  ;;  %4777 = vst [vmem:[#allocation32_spill] sm:$0xff] %v3405_v55  ;;  %v692_v55 = vstv %s3429_s14  ;;  %s3591_s14 = sld [smem:[#allocation7 + $0x49]] }
 0x21b   :  { %1244 = vrot.lane.b32.xlu1 %v1214_v5, %s2446_s29  ;;  %1252 = vrot.lane.b32.xlu0 %v1213_v31, %s2447_s30 }
 0x21d   :  { %v3409_v37 = vpop.permute.xlu1 %904  ;;  %v3411_v21 = vpop.permute.xlu0 %912 }
 0x21e   :  { %4778 = vst [vmem:[#allocation21_spill] sm:$0xff] %v3409_v37  ;;  %4779 = vst [vmem:[#allocation22_spill] sm:$0xff] %v3411_v21  ;;  %v2363_v21 = vld [vmem:[#allocation2 + $0x18] sm:$0xff] }
 0x21f   :  { %1254 = vrot.lane.b32.xlu1 %v1214_v5, %s2447_s30  ;;  %1262 = vrot.lane.b32.xlu0 %v1213_v31, %s2448_s3 }
 0x221   :  { %v3421_v15 = vpop.permute.xlu1 %914  ;;  %v3423_v42 = vpop.permute.xlu0 %930 }
 0x222   :  { %4780 = vst [vmem:[#allocation31_spill] sm:$0xff] %v3421_v15  ;;  %v663_v15 = vmul.f32 %v662_v50, %v3234_v2  ;;  %v673_v2 = vmul.f32 %v672_v19, %v3244_v8 }
 0x223   :  { %1264 = vrot.lane.b32.xlu1 %v1214_v5, %s2448_s3  ;;  %1272 = vrot.lane.b32.xlu0 %v1213_v31, %s2449_s4  ;;  %v652_v31 = vstv %s3417_s11  ;;  %s3566_s11 = sld [smem:[#allocation7 + $0x54]] }
 0x224   :  { %v653_v37 = vmul.f32 %v2363_v21, %v652_v31  ;;  %v788_v21 = vstv %s3442_s18  ;;  %s3606_s18 = sld [smem:[#allocation7 + $0x4b]] }
 0x225   :  { %v3431_v45 = vpop.permute.xlu1 %932  ;;  %v3433_v6 = vpop.permute.xlu0 %940  ;;  %v789_v34 = vmul.f32 %v2366_v0, %v788_v21  ;;  %v2367_v0 = vld [vmem:[#allocation2 + $0x21] sm:$0xff] }
 0x226   :  { %4781 = vst [vmem:[#allocation23_spill] sm:$0xff] %v3431_v45  ;;  %4782 = vst [vmem:[#allocation24_spill] sm:$0xff] %v3433_v6  ;;  %v665_v54 = vadd.f32 %v663_v15, %v653_v37  ;;  %v693_v37 = vmul.f32 %v692_v55, %v3266_v10  ;;  %v712_v15 = vstv %s3449_s19  ;;  %v2365_v10 = vld [vmem:[#allocation2 + $0x19] sm:$0xff]  ;;  %s3608_s19 = sld [smem:[#allocation7 + $0x4f]] }
 0x227   :  { %1274 = vrot.lane.b32.xlu1 %v1214_v5, %s2449_s4  ;;  %1290 = vrot.lane.b32.xlu0 %v3437_v46, %s2444_s27  ;;  %v682_v5 = vstv %s3425_s13  ;;  %s3578_s13 = sld [smem:[#allocation7 + $0x48]] }
 0x228   :  { %v683_v45 = vmul.f32 %v682_v5, %v3256_v63  ;;  %v674_v63 = vmul.f32 %v672_v19, %v3254_v26  ;;  %v684_v19 = vmul.f32 %v682_v5, %v3264_v14  ;;  %v703_v26 = vmul.f32 %v702_v27, %v3274_v1 }
 0x229   :  { %v3453_v23 = vpop.permute.xlu1 %942  ;;  %v3455_v29 = vpop.permute.xlu0 %950  ;;  %v722_v5 = vmul.f32 %v2367_v0, %v720_v44 }
 0x22a   :  { %4783 = vst [vmem:[#allocation33_spill] sm:$0xff] %v3453_v23  ;;  %4784 = vst [vmem:[#allocation12_spill] sm:$0xff] %v3455_v29  ;;  %v664_v29 = vmul.f32 %v662_v50, %v3242_v17  ;;  %v2364_v17 = vld [vmem:[#allocation2 + $0x20] sm:$0xff]  ;;  %v675_v50 = vadd.f32 %v673_v2, %v665_v54  ;;  %v721_v2 = vmul.f32 %v2365_v10, %v720_v44 }
 0x22b   :  { %1292 = vrot.lane.b32.xlu1 %v3458_v18, %s2444_s27  ;;  %1300 = vrot.lane.b32.xlu0 %v3437_v46, %s2445_s28  ;;  %v654_v8 = vmul.f32 %v2364_v17, %v652_v31  ;;  %v730_v17 = vstv %s3461_s20  ;;  %v704_v44 = vmul.f32 %v702_v27, %v3280_v12  ;;  %s3621_s20 = sld [smem:[#allocation7 + $0x50]] }
 0x22c   :  { %v685_v54 = vadd.f32 %v683_v45, %v675_v50  ;;  %v713_v45 = vmul.f32 %v712_v15, %v3282_v57 }
 0x22d   :  { %v3471_v61 = vpop.permute.xlu1 %952  ;;  %v3473_v23 = vpop.permute.xlu0 %960  ;;  %v666_v31 = vadd.f32 %v664_v29, %v654_v8  ;;  %v694_v29 = vmul.f32 %v692_v55, %v3272_v3  ;;  %v2368_v8 = vld [vmem:[#allocation2 + $0x22] sm:$0xff] }
 0x22e   :  { %4785 = vst [vmem:[#allocation25_spill] sm:$0xff] %v3471_v61  ;;  %4786 = vst [vmem:[#allocation13_spill] sm:$0xff] %v3473_v23  ;;  %v856_v61 = vstv %s3451_s16  ;;  %v695_v1 = vadd.f32 %v693_v37, %v685_v54  ;;  %v3520_v50 = vmul.f32 %v2368_v8, %v788_v21  ;;  %v740_v21 = vstv %s3478_s23  ;;  %s3616_s16 = sld [smem:[#allocation7 + $0x4c]]  ;;  %s3630_s23 = sld [smem:[#allocation7 + $0x51]] }
 0x22f   :  { %1302 = vrot.lane.b32.xlu1 %v3458_v18, %s2445_s28  ;;  %1310 = vrot.lane.b32.xlu0 %v3437_v46, %s2446_s29  ;;  %v676_v14 = vadd.f32 %v674_v63, %v666_v31  ;;  %v3525_v10 = vmul.f32 %v856_v61, %v3020_v51  ;;  %v3528_v63 = vmul.f32 %v856_v61, %v3052_v56  ;;  %v750_v54 = vstv %s3481_s24  ;;  %s3642_s24 = sld [smem:[#allocation7 + $0x52]] }
 0x230   :  { %v705_v55 = vadd.f32 %v703_v26, %v695_v1  ;;  %v731_v31 = vmul.f32 %v730_v17, %v3290_v38  ;;  %v798_v51 = vstv %s3484_s25  ;;  %v714_v38 = vmul.f32 %v712_v15, %v3288_v20  ;;  %s3646_s25 = sld [smem:[#allocation7 + $0x53]] }
 0x231   :  { %v3500_v23 = vpop.permute.xlu1 %962  ;;  %v3502_v6 = vpop.permute.xlu0 %970  ;;  %v686_v57 = vadd.f32 %v684_v19, %v676_v14  ;;  %v732_v61 = vmul.f32 %v730_v17, %v3296_v24  ;;  %v741_v19 = vmul.f32 %v740_v21, %v3298_v13  ;;  %v760_v26 = vstv %s3492_s26  ;;  %s3685_s26 = sld [smem:[#allocation7 + $0x55]] }
 0x232   :  { %4787 = vst [vmem:[#allocation14_spill] sm:$0xff] %v3500_v23  ;;  %v4715_v23 = vstv %s3463_s21  ;;  %v715_v27 = vadd.f32 %v713_v45, %v705_v55  ;;  %v770_v14 = vstv %s3495_s0  ;;  %v799_v45 = vmul.f32 %v798_v51, %v3342_v7  ;;  %s3696_s0 = sld [smem:[#allocation7 + $0x56]] }
 0x233   :  { %1312 = vrot.lane.b32.xlu1 %v3458_v18, %s2446_s29  ;;  %1320 = vrot.lane.b32.xlu0 %v3437_v46, %s2447_s30  ;;  %v3544_v56 = vmul.f32 %v4715_v23, %v3179_v4  ;;  %v696_v12 = vadd.f32 %v694_v29, %v686_v57  ;;  %v808_v4 = vstv %s3497_s5  ;;  %v742_v23 = vmul.f32 %v740_v21, %v3306_v28  ;;  %s3702_s5 = sld [smem:[#allocation7 + $0x5c]] }
 0x234   :  { %v780_v29 = vstv %s3506_s7  ;;  %v733_v57 = vadd.f32 %v731_v31, %v721_v2  ;;  %v751_v20 = vmul.f32 %v750_v54, %v3308_v41  ;;  %v818_v24 = vstv %s3509_s8  ;;  %s3708_s7 = sld [smem:[#allocation7 + $0x57]]  ;;  %s3712_s8 = sld [smem:[#allocation7 + $0x5d]] }
 0x235   :  { %v3530_v37 = vpop.permute.xlu1 %972  ;;  %v3532_v3 = vpop.permute.xlu0 %980  ;;  %v706_v8 = vadd.f32 %v704_v44, %v696_v12  ;;  %v828_v15 = vstv %s3511_s6  ;;  %v734_v17 = vadd.f32 %v732_v61, %v722_v5  ;;  %v791_v28 = vadd.f32 %v789_v34, %v715_v27  ;;  %v3586_v12 = vld [vmem:[#allocation2 + $0x33] sm:$0xff]  ;;  %s3716_s6 = sld [smem:[#allocation7 + $0x58]] }
 0x236   :  { %v809_v55 = vmul.f32 %v808_v4, %v3350_v43  ;;  %v743_v44 = vadd.f32 %v741_v19, %v733_v57  ;;  %v752_v7 = vmul.f32 %v750_v54, %v3316_v58  ;;  %v761_v41 = vmul.f32 %v760_v26, %v3318_v22 }
 0x237   :  { %1322 = vrot.lane.b32.xlu1 %v3458_v18, %s2447_s30  ;;  %1330 = vrot.lane.b32.xlu0 %v3437_v46, %s2448_s3  ;;  %v716_v13 = vadd.f32 %v714_v38, %v706_v8  ;;  %v838_v2 = vstv %s3522_s9  ;;  %v801_v5 = vadd.f32 %v799_v45, %v791_v28  ;;  %v800_v34 = vmul.f32 %v798_v51, %v3348_v40  ;;  %s3722_s9 = sld [smem:[#allocation7 + $0x59]] }
 0x238   :  { %v819_v43 = vmul.f32 %v818_v24, %v3357_v60  ;;  %v753_v58 = vadd.f32 %v751_v20, %v743_v44  ;;  %v762_v22 = vmul.f32 %v760_v26, %v3324_v48  ;;  %v771_v54 = vmul.f32 %v770_v14, %v3326_v32 }
 0x239   :  { %v3556_v1 = vpop.permute.xlu1 %982  ;;  %v3558_v0 = vpop.permute.xlu0 %998  ;;  %v848_v27 = vstv %s3539_s10  ;;  %v811_v40 = vadd.f32 %v809_v55, %v801_v5  ;;  %v810_v60 = vmul.f32 %v808_v4, %v3355_v35  ;;  %v829_v48 = vmul.f32 %v828_v15, %v3363_v16  ;;  %s3729_s10 = sld [smem:[#allocation7 + $0x5e]] }
 0x23a   :  { %v763_v51 = vadd.f32 %v761_v41, %v753_v58  ;;  %v772_v38 = vmul.f32 %v770_v14, %v3332_v47  ;;  %v781_v61 = vmul.f32 %v780_v29, %v3334_v49  ;;  %v820_v16 = vmul.f32 %v818_v24, %v3361_v52  ;;  %v3618_v47 = vld [vmem:[#allocation2 + $0x3b] sm:$0xff] }
 0x23b   :  { %1332 = vrot.lane.b32.xlu1 %v3458_v18, %s2448_s3  ;;  %1340 = vrot.lane.b32.xlu0 %v3437_v46, %s2449_s4  ;;  %v744_v46 = vadd.f32 %v742_v23, %v734_v17  ;;  %v792_v23 = vadd.f32 %v3520_v50, %v716_v13  ;;  %v821_v19 = vadd.f32 %v819_v43, %v811_v40  ;;  %v992_v8 = vstv %s3566_s11  ;;  %s3754_s11 = sld [smem:[#allocation7 + $0x60]] }
 0x23c   :  { %v839_v26 = vmul.f32 %v838_v2, %v3369_v25  ;;  %v773_v14 = vadd.f32 %v771_v54, %v763_v51  ;;  %v782_v4 = vmul.f32 %v780_v29, %v3340_v36  ;;  %v830_v45 = vmul.f32 %v828_v15, %v3367_v33 }
 0x23d   :  { %v3580_v21 = vpop.permute.xlu1 %1000  ;;  %v3582_v31 = vpop.permute.xlu0 %1008  ;;  %v754_v32 = vadd.f32 %v752_v7, %v744_v46  ;;  %v802_v35 = vadd.f32 %v800_v34, %v792_v23  ;;  %v831_v25 = vadd.f32 %v829_v48, %v821_v19  ;;  %v849_v57 = vmul.f32 %v848_v27, %v3375_v39 }
 0x23e   :  { %v866_v29 = vstv %s3576_s12  ;;  %v876_v20 = vstv %s3578_s13  ;;  %v4788_v24 = vstv %s3463_s21  ;;  %v783_v55 = vadd.f32 %v781_v61, %v773_v14  ;;  %s3678_s21 = sld [smem:[#allocation7 + $0x5b]]  ;;  %s3733_s12 = sld [smem:[#allocation7 + $0x5a]] }
 0x23f   :  { %1342 = vrot.lane.b32.xlu1 %v3458_v18, %s2449_s4  ;;  %1358 = vrot.lane.b32.xlu0 %v3586_v12, %s2444_s27  ;;  %v764_v49 = vadd.f32 %v762_v22, %v754_v32  ;;  %v812_v52 = vadd.f32 %v810_v60, %v802_v35  ;;  %v926_v13 = vmul.f32 %v4788_v24, %v3196_v9  ;;  %v886_v7 = vstv %s3591_s14  ;;  %s3739_s13 = sld [smem:[#allocation7 + $0x5f]]  ;;  %s3772_s14 = sld [smem:[#allocation7 + $0x61]] }
 0x240   :  { %v841_v33 = vadd.f32 %v839_v26, %v831_v25  ;;  %v840_v39 = vmul.f32 %v838_v2, %v3373_v59  ;;  %v934_v41 = vstv %s3593_s15  ;;  %v3651_v9 = vmul.f32 %v992_v8, %v3248_v30  ;;  %s3990_s15 = sld [smem:[#allocation7 + $0x1]] }
 0x241   :  { %v3610_v18 = vpop.permute.xlu1 %1010  ;;  %v3612_v50 = vpop.permute.xlu0 %1018  ;;  %v774_v36 = vadd.f32 %v772_v38, %v764_v49  ;;  %v822_v44 = vadd.f32 %v820_v16, %v812_v52  ;;  %v850_v46 = vmul.f32 %v848_v27, %v3379_v62  ;;  %v896_v5 = vstv %s3602_s17  ;;  %v4789_v27 = vld [vmem:[#allocation18_spill] sm:$0xff]  ;;  %v4792_v16 = vld [vmem:[#allocation27_spill] sm:$0xff]  ;;  %s3996_s17 = sld [smem:[#allocation7]] }
 0x242   :  { %v851_v2 = vadd.f32 %v849_v57, %v841_v33  ;;  %v867_v34 = vmul.f32 %v866_v29, %v3381_v11  ;;  %v868_v43 = vmul.f32 %v866_v29, %v3385_v53  ;;  %v906_v58 = vstv %s3606_s18  ;;  %v4790_v11 = vld [vmem:[#allocation19_spill] sm:$0xff]  ;;  %v4793_v49 = vld [vmem:[#allocation30_spill] sm:$0xff]  ;;  %s3998_s18 = sld [smem:[#allocation7 + $0x2]] }
 0x243   :  { %1360 = vrot.lane.b32.xlu1 %v3618_v47, %s2444_s27  ;;  %1368 = vrot.lane.b32.xlu0 %v3586_v12, %s2445_s28  ;;  %v784_v15 = vadd.f32 %v782_v4, %v774_v36  ;;  %v832_v59 = vadd.f32 %v830_v45, %v822_v44  ;;  %v944_v22 = vstv %s3608_s19  ;;  %v859_v40 = vadd.f32 %v3525_v10, %v783_v55  ;;  %v4794_v45 = vld [vmem:[#allocation23_spill] sm:$0xff]  ;;  %v4796_v55 = vld [vmem:[#allocation20_spill] sm:$0xff]  ;;  %s4004_s19 = sld [smem:[#allocation7 + $0x3]] }
 0x244   :  { %v916_v60 = vstv %s3616_s16  ;;  %v935_v48 = vmul.f32 %v934_v41, %v3423_v42  ;;  %v877_v32 = vmul.f32 %v876_v20, %v4789_v27  ;;  %v878_v51 = vmul.f32 %v876_v20, %v4790_v11  ;;  %v4791_v42 = vld [vmem:[#allocation24_spill] sm:$0xff]  ;;  %s4010_s16 = sld [smem:[#allocation7 + $0x4]] }
 0x245   :  { %v3637_v17 = vpop.permute.xlu1 %1020  ;;  %v3639_v28 = vpop.permute.xlu0 %1028  ;;  %v842_v23 = vadd.f32 %v840_v39, %v832_v59  ;;  %v860_v62 = vadd.f32 %v3528_v63, %v784_v15  ;;  %v954_v53 = vstv %s3621_s20  ;;  %v927_v38 = vadd.f32 %v3544_v56, %v851_v2  ;;  %v4795_v56 = vld [vmem:[#allocation12_spill] sm:$0xff]  ;;  %v4798_v59 = vld [vmem:[#allocation13_spill] sm:$0xff]  ;;  %s4021_s20 = sld [smem:[#allocation7 + $0x5]] }
 0x246   :  { %v945_v61 = vmul.f32 %v944_v22, %v4791_v42  ;;  %v964_v63 = vstv %s3630_s23  ;;  %v869_v35 = vadd.f32 %v867_v34, %v859_v40  ;;  %v887_v26 = vmul.f32 %v886_v7, %v4792_v16  ;;  %v4800_v40 = vld [vmem:[#allocation32_spill] sm:$0xff]  ;;  %v4803_v42 = vld [vmem:[#allocation22_spill] sm:$0xff]  ;;  %s4029_s23 = sld [smem:[#allocation7 + $0x6]] }
 0x247   :  { %1370 = vrot.lane.b32.xlu1 %v3618_v47, %s2445_s28  ;;  %1378 = vrot.lane.b32.xlu0 %v3586_v12, %s2446_s29  ;;  %v852_v10 = vadd.f32 %v850_v46, %v842_v23  ;;  %v870_v19 = vadd.f32 %v868_v43, %v860_v62  ;;  %v888_v14 = vmul.f32 %v886_v7, %v4793_v49  ;;  %v974_v29 = vstv %s3642_s24  ;;  %v4797_v7 = vld [vmem:[#allocation33_spill] sm:$0xff]  ;;  %s4050_s24 = sld [smem:[#allocation7 + $0xe]] }
 0x248   :  { %v937_v25 = vadd.f32 %v935_v48, %v927_v38  ;;  %v936_v57 = vmul.f32 %v934_v41, %v4794_v45  ;;  %v955_v36 = vmul.f32 %v954_v53, %v4795_v56  ;;  %v879_v20 = vadd.f32 %v877_v32, %v869_v35  ;;  %v4799_v43 = vld [vmem:[#allocation29_spill] sm:$0xff] }
 0x249   :  { %v3663_v30 = vpop.permute.xlu1 %1030  ;;  %v3665_v54 = vpop.permute.xlu0 %1038  ;;  %v880_v24 = vadd.f32 %v878_v51, %v870_v19  ;;  %v897_v44 = vmul.f32 %v896_v5, %v4796_v55  ;;  %v984_v33 = vstv %s3646_s25  ;;  %v928_v39 = vadd.f32 %v926_v13, %v852_v10  ;;  %v4804_v19 = vld [vmem:[#allocation14_spill] sm:$0xff]  ;;  %s4052_s25 = sld [smem:[#allocation7 + $0xf]] }
 0x24a   :  { %v947_v15 = vadd.f32 %v945_v61, %v937_v25  ;;  %v946_v41 = vmul.f32 %v944_v22, %v4797_v7  ;;  %v965_v2 = vmul.f32 %v964_v63, %v4798_v59  ;;  %v889_v46 = vadd.f32 %v887_v26, %v879_v20  ;;  %v4801_v22 = vld [vmem:[#allocation25_spill] sm:$0xff]  ;;  %v4805_v25 = vld [vmem:[#allocation16_spill] sm:$0xff]  ;;  %v3745_v55 = vld [vmem:[#allocation2 + $0x34] sm:$0xff] }
 0x24b   :  { %1380 = vrot.lane.b32.xlu1 %v3618_v47, %s2446_s29  ;;  %1388 = vrot.lane.b32.xlu0 %v3586_v12, %s2447_s30  ;;  %v890_v34 = vadd.f32 %v888_v14, %v880_v24  ;;  %v898_v23 = vmul.f32 %v896_v5, %v4799_v43  ;;  %v907_v48 = vmul.f32 %v906_v58, %v4800_v40  ;;  %v4802_v5 = vld [vmem:[#allocation21_spill] sm:$0xff]  ;;  %v1060_v35 = vstv %s3678_s21  ;;  %s4061_s21 = sld [smem:[#allocation7 + $0x10]] }
 0x24c   :  { %v938_v13 = vadd.f32 %v936_v57, %v928_v39  ;;  %v957_v32 = vadd.f32 %v955_v36, %v947_v15  ;;  %v956_v11 = vmul.f32 %v954_v53, %v4801_v22  ;;  %v975_v51 = vmul.f32 %v974_v29, %v3502_v6  ;;  %v4806_v36 = vld [vmem:[#allocation31_spill] sm:$0xff]  ;;  %v4807_v15 = vld [vmem:[#allocation17_spill] sm:$0xff] }
 0x24d   :  { %v3687_v4 = vpop.permute.xlu1 %1040  ;;  %v3689_v52 = vpop.permute.xlu0 %1048  ;;  %v899_v10 = vadd.f32 %v897_v44, %v889_v46  ;;  %v908_v38 = vmul.f32 %v906_v58, %v4802_v5  ;;  %v917_v61 = vmul.f32 %v916_v60, %v4803_v42  ;;  %v966_v16 = vmul.f32 %v964_v63, %v4804_v19  ;;  %v4808_v46 = vld [vmem:[#allocation28_spill] sm:$0xff] }
 0x24e   :  { %v948_v6 = vadd.f32 %v946_v41, %v938_v13  ;;  %v967_v53 = vadd.f32 %v965_v2, %v957_v32  ;;  %v985_v58 = vmul.f32 %v984_v33, %v3532_v3  ;;  %v900_v26 = vadd.f32 %v898_v23, %v890_v34  ;;  %v3762_v22 = vld [vmem:[#allocation2 + $0x3c] sm:$0xff] }
 0x24f   :  { %1390 = vrot.lane.b32.xlu1 %v3618_v47, %s2447_s30  ;;  %1398 = vrot.lane.b32.xlu0 %v3586_v12, %s2448_s3  ;;  %v909_v49 = vadd.f32 %v907_v48, %v899_v10  ;;  %v1002_v14 = vstv %s3685_s26  ;;  %v994_v45 = vmul.f32 %v992_v8, %v4805_v25  ;;  %v918_v20 = vmul.f32 %v916_v60, %v4806_v36  ;;  %s4069_s26 = sld [smem:[#allocation7 + $0x7]] }
 0x250   :  { %v958_v63 = vadd.f32 %v956_v11, %v948_v6  ;;  %v977_v24 = vadd.f32 %v975_v51, %v967_v53  ;;  %v976_v3 = vmul.f32 %v974_v29, %v3530_v37  ;;  %v1012_v39 = vstv %s3696_s0  ;;  %s4071_s0 = sld [smem:[#allocation7 + $0x11]] }
 0x251   :  { %v3710_v62 = vpop.permute.xlu1 %1050  ;;  %v1067_v27 = vpop.permute.xlu0 %1066  ;;  %v919_v44 = vadd.f32 %v917_v61, %v909_v49  ;;  %v1061_v7 = vmul.f32 %v1060_v35, %v4807_v15  ;;  %v1070_v8 = vstv %s3702_s5  ;;  %v910_v60 = vadd.f32 %v908_v38, %v900_v26  ;;  %s4079_s5 = sld [smem:[#allocation7 + $0x15]] }
 0x252   :  { %v968_v41 = vadd.f32 %v966_v16, %v958_v63  ;;  %v987_v37 = vadd.f32 %v985_v58, %v977_v24  ;;  %v986_v29 = vmul.f32 %v984_v33, %v3556_v1  ;;  %v1003_v59 = vmul.f32 %v1002_v14, %v3558_v0 }
 0x253   :  { %1400 = vrot.lane.b32.xlu1 %v3618_v47, %s2448_s3  ;;  %1408 = vrot.lane.b32.xlu0 %v3586_v12, %s2449_s4  ;;  %v1022_v2 = vstv %s3708_s7  ;;  %v1062_v34 = vmul.f32 %v1060_v35, %v4808_v46  ;;  %v1080_v43 = vstv %s3712_s8  ;;  %v920_v40 = vadd.f32 %v918_v20, %v910_v60  ;;  %s4081_s7 = sld [smem:[#allocation7 + $0x1c]]  ;;  %s4083_s8 = sld [smem:[#allocation7 + $0x12]] }
 0x254   :  { %v978_v48 = vadd.f32 %v976_v3, %v968_v41  ;;  %v1032_v13 = vstv %s3716_s6  ;;  %v1071_v32 = vmul.f32 %v1070_v8, %v1067_v27  ;;  %v995_v11 = vadd.f32 %v3651_v9, %v919_v44  ;;  %s4089_s6 = sld [smem:[#allocation7 + $0x2a]] }
 0x255   :  { %v1069_v57 = vpop.permute.xlu1 %1068  ;;  %v1077_v56 = vpop.permute.xlu0 %1076  ;;  %v1013_v1 = vmul.f32 %v1012_v39, %v3582_v31  ;;  %v1042_v33 = vstv %s3722_s9  ;;  %v1090_v0 = vstv %s3729_s10  ;;  %v1052_v10 = vstv %s3733_s12  ;;  %s4092_s9 = sld [smem:[#allocation7 + $0x8]]  ;;  %s4094_s10 = sld [smem:[#allocation7 + $0x9]] }
 0x256   :  { %v988_v51 = vadd.f32 %v986_v29, %v978_v48  ;;  %v1063_v27 = vadd.f32 %v1061_v7, %v987_v37  ;;  %v1081_v5 = vmul.f32 %v1080_v43, %v1077_v56  ;;  %v1005_v38 = vadd.f32 %v1003_v59, %v995_v11  ;;  %s4098_s12 = sld [smem:[#allocation7 + $0x13]] }
 0x257   :  { %1410 = vrot.lane.b32.xlu1 %v3618_v47, %s2449_s4  ;;  %1426 = vrot.lane.b32.xlu0 %v3745_v55, %s2444_s27  ;;  %v1004_v9 = vmul.f32 %v1002_v14, %v3580_v21  ;;  %v1023_v31 = vmul.f32 %v1022_v2, %v3612_v50  ;;  %v1100_v61 = vstv %s3739_s13  ;;  %v996_v6 = vadd.f32 %v994_v45, %v920_v40  ;;  %s4105_s13 = sld [smem:[#allocation7 + $0xa]] }
 0x258   :  { %v1073_v53 = vadd.f32 %v1071_v32, %v1063_v27  ;;  %v1072_v19 = vmul.f32 %v1070_v8, %v1069_v57  ;;  %v1015_v58 = vadd.f32 %v1013_v1, %v1005_v38  ;;  %v1014_v26 = vmul.f32 %v1012_v39, %v3610_v18  ;;  %v4809_v27 = vld [vmem:[#allocation15_spill] sm:$0xff] }
 0x259   :  { %v1079_v47 = vpop.permute.xlu1 %1078  ;;  %v1087_v23 = vpop.permute.xlu0 %1086  ;;  %v1033_v49 = vmul.f32 %v1032_v13, %v3639_v28  ;;  %v1110_v21 = vstv %s3754_s11  ;;  %v1064_v50 = vadd.f32 %v1062_v34, %v988_v51  ;;  %v1006_v45 = vadd.f32 %v1004_v9, %v996_v6  ;;  %s4108_s11 = sld [smem:[#allocation7 + $0x14]] }
 0x25a   :  { %v1091_v16 = vmul.f32 %v1090_v0, %v1087_v23  ;;  %v1083_v14 = vadd.f32 %v1081_v5, %v1073_v53  ;;  %v1082_v25 = vmul.f32 %v1080_v43, %v1079_v47  ;;  %v1025_v57 = vadd.f32 %v1023_v31, %v1015_v58 }
 0x25b   :  { %1428 = vrot.lane.b32.xlu1 %v3762_v22, %s2444_s27  ;;  %1436 = vrot.lane.b32.xlu0 %v3745_v55, %s2445_s28  ;;  %v1024_v36 = vmul.f32 %v1022_v2, %v3637_v17  ;;  %v1043_v18 = vmul.f32 %v1042_v33, %v3665_v54  ;;  %v1074_v63 = vadd.f32 %v1072_v19, %v1064_v50  ;;  %v1120_v8 = vstv %s3772_s14  ;;  %s4116_s14 = sld [smem:[#allocation7 + $0xb]] }
 0x25c   :  { %v1093_v24 = vadd.f32 %v1091_v16, %v1083_v14  ;;  %v1016_v39 = vadd.f32 %v1014_v26, %v1006_v45  ;;  %v1035_v15 = vadd.f32 %v1033_v49, %v1025_v57  ;;  %v1034_v7 = vmul.f32 %v1032_v13, %v3663_v30  ;;  %v3822_v16 = vld [vmem:[#allocation2 + $0x3d] sm:$0xff] }
 0x25d   :  { %v1089_v42 = vpop.permute.xlu1 %1088  ;;  %v1097_v35 = vpop.permute.xlu0 %1096  ;;  %v1053_v17 = vmul.f32 %v1052_v10, %v3689_v52  ;;  %v1084_v54 = vadd.f32 %v1082_v25, %v1074_v63  ;;  %v1044_v59 = vmul.f32 %v1042_v33, %v3687_v4  ;;  %v1054_v40 = vmul.f32 %v1052_v10, %v3710_v62  ;;  %4812 = vst [vmem:[#allocation19_spill] sm:$0xff] %v3822_v16  ;;  %v3864_v63 = vld [vmem:[#allocation2 + $0x36] sm:$0xff] }
 0x25e   :  { %v1101_v56 = vmul.f32 %v1100_v61, %v1097_v35  ;;  %v1092_v3 = vmul.f32 %v1090_v0, %v1089_v42  ;;  %v1026_v37 = vadd.f32 %v1024_v36, %v1016_v39  ;;  %v1045_v29 = vadd.f32 %v1043_v18, %v1035_v15  ;;  %v3811_v42 = vld [vmem:[#allocation2 + $0x35] sm:$0xff]  ;;  %4813 = vst [vmem:[#allocation24_spill] sm:$0xff] %v3864_v63  ;;  %v3875_v39 = vld [vmem:[#allocation2 + $0x3e] sm:$0xff] }
 0x25f   :  { %1438 = vrot.lane.b32.xlu1 %v3762_v22, %s2445_s28  ;;  %1446 = vrot.lane.b32.xlu0 %v3745_v55, %s2446_s29  ;;  %4810 = vst [vmem:[#allocation18_spill] sm:$0xff] %v3811_v42  ;;  %4814 = vst [vmem:[#allocation27_spill] sm:$0xff] %v3875_v39 }
 0x260   :  { %v1103_v60 = vadd.f32 %v1101_v56, %v1093_v24  ;;  %v1094_v34 = vadd.f32 %v1092_v3, %v1084_v54  ;;  %v1036_v23 = vadd.f32 %v1034_v7, %v1026_v37  ;;  %v1055_v52 = vadd.f32 %v1053_v17, %v1045_v29 }
 0x261   :  { %v1099_v20 = vpop.permute.xlu1 %1098  ;;  %v1107_v28 = vpop.permute.xlu0 %1106 }
 0x262   :  { %v1111_v44 = vmul.f32 %v1110_v21, %v1107_v28  ;;  %v1102_v41 = vmul.f32 %v1100_v61, %v1099_v20  ;;  %v1046_v11 = vadd.f32 %v1044_v59, %v1036_v23  ;;  %v4811_v61 = vld [vmem:[#allocation26_spill] sm:$0xff] }
 0x263   :  { %1448 = vrot.lane.b32.xlu1 %v3762_v22, %s2446_s29  ;;  %1456 = vrot.lane.b32.xlu0 %v3745_v55, %s2447_s30 }
 0x264   :  { %v1113_v30 = vadd.f32 %v1111_v44, %v1103_v60  ;;  %v1104_v48 = vadd.f32 %v1102_v41, %v1094_v34  ;;  %v1056_v51 = vadd.f32 %v1054_v40, %v1046_v11 }
 0x265   :  { %v1109_v2 = vpop.permute.xlu1 %1108  ;;  %v1117_v46 = vpop.permute.xlu0 %1116 }
 0x266   :  { %v1112_v43 = vmul.f32 %v1110_v21, %v1109_v2  ;;  %v1121_v47 = vmul.f32 %v1120_v8, %v1117_v46  ;;  %v3918_v46 = vld [vmem:[#allocation2 + $0x48] sm:$0xff] }
 0x267   :  { %1458 = vrot.lane.b32.xlu1 %v3762_v22, %s2447_s30  ;;  %1466 = vrot.lane.b32.xlu0 %v3745_v55, %s2448_s3  ;;  %4815 = vst [vmem:[#allocation30_spill] sm:$0xff] %v3918_v46 }
 0x268   :  { %v1123_v13 = vadd.f32 %v1121_v47, %v1113_v30  ;;  %v1114_v1 = vadd.f32 %v1112_v43, %v1104_v48  ;;  %v3928_v43 = vld [vmem:[#allocation2 + $0x50] sm:$0xff] }
 0x269   :  { %v1119_v32 = vpop.permute.xlu1 %1118  ;;  %v3800_v4 = vpop.permute.xlu0 %1154  ;;  %4816 = vst [vmem:[#allocation23_spill] sm:$0xff] %v3928_v43 }
 0x26a   :  { %v1127_v33 = vadd.f32 %v1123_v13, %v1055_v52  ;;  %v1122_v0 = vmul.f32 %v1120_v8, %v1119_v32 }
 0x26b   :  { %1468 = vrot.lane.b32.xlu1 %v3762_v22, %s2448_s3  ;;  %1476 = vrot.lane.b32.xlu0 %v3745_v55, %s2449_s4 }
 0x26c   :  { %v1129_v5 = vadd.f32 %v1127_v33, %v4809_v27  ;;  %v1124_v38 = vadd.f32 %v1122_v0, %v1114_v1  ;;  %v3970_v0 = vld [vmem:[#allocation2 + $0x49] sm:$0xff] }
 0x26d   :  { %v3807_v62 = vpop.permute.xlu1 %1156  ;;  %v3809_v10 = vpop.permute.xlu0 %1164 }
 0x26e   :  { %v2233_v9 = vmul.f32 -1.442695, %v1129_v5  ;;  %v1128_v31 = vadd.f32 %v1124_v38, %v1056_v51  ;;  %v3980_v5 = vld [vmem:[#allocation2 + $0x51] sm:$0xff] }
 0x26f   :  { %1478 = vrot.lane.b32.xlu1 %v3762_v22, %s2449_s4  ;;  %1494 = vrot.lane.b32.xlu0 %v3811_v42, %s2444_s27 }
 0x270   :  { %2347 = vpow2.f32 %v2233_v9  ;;  %v1130_v35 = vadd.f32 %v1128_v31, %v4811_v61 }
 0x271   :  { %v3818_v6 = vpop.permute.xlu1 %1166  ;;  %v3820_v53 = vpop.permute.xlu0 %1174 }
 0x272   :  { %v2234_v19 = vmul.f32 -1.442695, %v1130_v35 }
 0x273   :  { %1496 = vrot.lane.b32.xlu1 %v3822_v16, %s2444_s27  ;;  %1504 = vrot.lane.b32.xlu0 %v3811_v42, %s2445_s28 }
 0x274   :  { %2349 = vpow2.f32 %v2234_v19 }
 0x275   :  { %v3828_v58 = vpop.permute.xlu1 %1176  ;;  %v3830_v26 = vpop.permute.xlu0 %1184 }
 0x277   :  { %1506 = vrot.lane.b32.xlu1 %v3822_v16, %s2445_s28  ;;  %1514 = vrot.lane.b32.xlu0 %v3811_v42, %s2446_s29 }
 0x279   :  { %v3836_v49 = vpop.permute.xlu1 %1186  ;;  %v3838_v21 = vpop.permute.xlu0 %1194 }
 0x27a   :  { %v2348_v50 = vpop.eup %2347 }
 0x27b   :  { %v1137_v14 = vadd.f32 1.0, %v2348_v50  ;;  %1516 = vrot.lane.b32.xlu1 %v3822_v16, %s2446_s29  ;;  %1524 = vrot.lane.b32.xlu0 %v3811_v42, %s2447_s30  ;;  %v4016_v50 = vld [vmem:[#allocation2 + $0x4a] sm:$0xff] }
 0x27d   :  { %2351 = vrcp.f32 %v1137_v14  ;;  %v3844_v25 = vpop.permute.xlu1 %1196  ;;  %v3846_v56 = vpop.permute.xlu0 %1204  ;;  %v4018_v14 = vld [vmem:[#allocation2 + $0x52] sm:$0xff] }
 0x27e   :  { %v2350_v45 = vpop.eup %2349 }
 0x27f   :  { %v1138_v57 = vadd.f32 1.0, %v2350_v45  ;;  %1526 = vrot.lane.b32.xlu1 %v3822_v16, %s2447_s30  ;;  %1534 = vrot.lane.b32.xlu0 %v3811_v42, %s2448_s3  ;;  %v1158_v45 = vstv %s3990_s15  ;;  %s4125_s15 = sld [smem:[#allocation7 + $0xc]] }
 0x281   :  { %2353 = vrcp.f32 %v1138_v57  ;;  %v3852_v36 = vpop.permute.xlu1 %1206  ;;  %v3854_v18 = vpop.permute.xlu0 %1222  ;;  %v1148_v57 = vstv %s3996_s17  ;;  %s4138_s17 = sld [smem:[#allocation7 + $0xd]] }
 0x283   :  { %1536 = vrot.lane.b32.xlu1 %v3822_v16, %s2448_s3  ;;  %1544 = vrot.lane.b32.xlu0 %v3811_v42, %s2449_s4  ;;  %v2369_v42 = vld [vmem:[#allocation2 + $0x30] sm:$0xff] }
 0x285   :  { %v3860_v20 = vpop.permute.xlu1 %1224  ;;  %v3862_v28 = vpop.permute.xlu0 %1232 }
 0x287   :  { %v2352_v24 = vpop.eup %2351  ;;  %1546 = vrot.lane.b32.xlu1 %v3822_v16, %s2449_s4  ;;  %1562 = vrot.lane.b32.xlu0 %v3864_v63, %s2444_s27  ;;  %v1178_v16 = vstv %s4004_s19  ;;  %s4152_s19 = sld [smem:[#allocation7 + $0x1e]] }
 0x288   :  { %1143 = vst.msk [vmem:[#allocation8] sm:$0xff] %vm59_vm0, %v2352_v24  ;;  %v1168_v24 = vstv %s3998_s18  ;;  %s4141_s18 = sld [smem:[#allocation7 + $0x1d]] }
 0x289   :  { %v3871_v3 = vpop.permute.xlu1 %1234  ;;  %v3873_v44 = vpop.permute.xlu0 %1242 }
 0x28b   :  { %v2354_v15 = vpop.eup %2353  ;;  %1564 = vrot.lane.b32.xlu1 %v3875_v39, %s2444_s27  ;;  %1572 = vrot.lane.b32.xlu0 %v3864_v63, %s2445_s28 }
 0x28c   :  { %1144 = vst.msk [vmem:[#allocation8 + $0x8] sm:$0xff] %vm59_vm0, %v2354_v15 }
 0x28d   :  { %v3882_v7 = vpop.permute.xlu1 %1244  ;;  %v3884_v8 = vpop.permute.xlu0 %1252 }
 0x28f   :  { %1574 = vrot.lane.b32.xlu1 %v3875_v39, %s2445_s28  ;;  %1582 = vrot.lane.b32.xlu0 %v3864_v63, %s2446_s29 }
 0x291   :  { %v3890_v17 = vpop.permute.xlu1 %1254  ;;  %v3892_v54 = vpop.permute.xlu0 %1262 }
 0x293   :  { %1584 = vrot.lane.b32.xlu1 %v3875_v39, %s2446_s29  ;;  %1592 = vrot.lane.b32.xlu0 %v3864_v63, %s2447_s30 }
 0x295   :  { %v3898_v60 = vpop.permute.xlu1 %1264  ;;  %v3900_v41 = vpop.permute.xlu0 %1272 }
 0x297   :  { %1594 = vrot.lane.b32.xlu1 %v3875_v39, %s2447_s30  ;;  %1602 = vrot.lane.b32.xlu0 %v3864_v63, %s2448_s3 }
 0x299   :  { %v3906_v37 = vpop.permute.xlu1 %1274  ;;  %v3908_v29 = vpop.permute.xlu0 %1290 }
 0x29b   :  { %1604 = vrot.lane.b32.xlu1 %v3875_v39, %s2448_s3  ;;  %1612 = vrot.lane.b32.xlu0 %v3864_v63, %s2449_s4  ;;  %v1179_v63 = vmul.f32 %v1178_v16, %v3820_v53 }
 0x29d   :  { %v3914_v59 = vpop.permute.xlu1 %1292  ;;  %v3916_v2 = vpop.permute.xlu0 %1300 }
 0x29f   :  { %1614 = vrot.lane.b32.xlu1 %v3875_v39, %s2449_s4  ;;  %1630 = vrot.lane.b32.xlu0 %v3918_v46, %s2444_s27  ;;  %v1149_v39 = vmul.f32 %v2369_v42, %v1148_v57 }
 0x2a1   :  { %v3924_v34 = vpop.permute.xlu1 %1302  ;;  %v3926_v30 = vpop.permute.xlu0 %1310 }
 0x2a3   :  { %1632 = vrot.lane.b32.xlu1 %v3928_v43, %s2444_s27  ;;  %1640 = vrot.lane.b32.xlu0 %v3918_v46, %s2445_s28 }
 0x2a5   :  { %v3934_v47 = vpop.permute.xlu1 %1312  ;;  %v3936_v23 = vpop.permute.xlu0 %1320 }
 0x2a7   :  { %1642 = vrot.lane.b32.xlu1 %v3928_v43, %s2445_s28  ;;  %1650 = vrot.lane.b32.xlu0 %v3918_v46, %s2446_s29 }
 0x2a9   :  { %v3942_v52 = vpop.permute.xlu1 %1322  ;;  %v3944_v40 = vpop.permute.xlu0 %1330 }
 0x2ab   :  { %1652 = vrot.lane.b32.xlu1 %v3928_v43, %s2446_s29  ;;  %1660 = vrot.lane.b32.xlu0 %v3918_v46, %s2447_s30 }
 0x2ad   :  { %v3950_v48 = vpop.permute.xlu1 %1332  ;;  %v3952_v13 = vpop.permute.xlu0 %1340 }
 0x2af   :  { %1662 = vrot.lane.b32.xlu1 %v3928_v43, %s2447_s30  ;;  %1670 = vrot.lane.b32.xlu0 %v3918_v46, %s2448_s3 }
 0x2b1   :  { %v3958_v32 = vpop.permute.xlu1 %1342  ;;  %v3960_v11 = vpop.permute.xlu0 %1358 }
 0x2b3   :  { %1672 = vrot.lane.b32.xlu1 %v3928_v43, %s2448_s3  ;;  %1680 = vrot.lane.b32.xlu0 %v3918_v46, %s2449_s4  ;;  %v1159_v46 = vmul.f32 %v1158_v45, %v3800_v4  ;;  %v1160_v4 = vmul.f32 %v1158_v45, %v3807_v62 }
 0x2b5   :  { %v3966_v1 = vpop.permute.xlu1 %1360  ;;  %v3968_v33 = vpop.permute.xlu0 %1368 }
 0x2b6   :  { %4817 = vst [vmem:[#allocation12_spill] sm:$0xff] %v3966_v1  ;;  %4818 = vst [vmem:[#allocation20_spill] sm:$0xff] %v3968_v33  ;;  %v1180_v1 = vmul.f32 %v1178_v16, %v3828_v58 }
 0x2b7   :  { %1682 = vrot.lane.b32.xlu1 %v3928_v43, %s2449_s4  ;;  %1698 = vrot.lane.b32.xlu0 %v3970_v0, %s2444_s27 }
 0x2b9   :  { %v3976_v51 = vpop.permute.xlu1 %1370  ;;  %v3978_v27 = vpop.permute.xlu0 %1378 }
 0x2ba   :  { %4819 = vst [vmem:[#allocation33_spill] sm:$0xff] %v3976_v51  ;;  %4820 = vst [vmem:[#allocation13_spill] sm:$0xff] %v3978_v27 }
 0x2bb   :  { %1700 = vrot.lane.b32.xlu1 %v3980_v5, %s2444_s27  ;;  %1708 = vrot.lane.b32.xlu0 %v3970_v0, %s2445_s28 }
 0x2bd   :  { %v3986_v38 = vpop.permute.xlu1 %1380  ;;  %v3988_v9 = vpop.permute.xlu0 %1388 }
 0x2be   :  { %4821 = vst [vmem:[#allocation29_spill] sm:$0xff] %v3986_v38  ;;  %4822 = vst [vmem:[#allocation32_spill] sm:$0xff] %v3988_v9  ;;  %v1198_v38 = vstv %s4021_s20  ;;  %s4176_s20 = sld [smem:[#allocation7 + $0x16]] }
 0x2bf   :  { %1710 = vrot.lane.b32.xlu1 %v3980_v5, %s2445_s28  ;;  %1718 = vrot.lane.b32.xlu0 %v3970_v0, %s2446_s29  ;;  %v1199_v33 = vmul.f32 %v1198_v38, %v3838_v21 }
 0x2c1   :  { %v4000_v31 = vpop.permute.xlu1 %1390  ;;  %v4002_v61 = vpop.permute.xlu0 %1398 }
 0x2c2   :  { %4823 = vst [vmem:[#allocation25_spill] sm:$0xff] %v4000_v31  ;;  %4824 = vst [vmem:[#allocation21_spill] sm:$0xff] %v4002_v61  ;;  %v1161_v61 = vadd.f32 %v1159_v46, %v1149_v39  ;;  %v1170_v39 = vmul.f32 %v1168_v24, %v3818_v6  ;;  %v1208_v46 = vstv %s4029_s23  ;;  %s4183_s23 = sld [smem:[#allocation7 + $0x20]] }
 0x2c3   :  { %1720 = vrot.lane.b32.xlu1 %v3980_v5, %s2446_s29  ;;  %1728 = vrot.lane.b32.xlu0 %v3970_v0, %s2447_s30  ;;  %v1209_v16 = vmul.f32 %v1208_v46, %v3846_v56  ;;  %v1294_v56 = vstv %s4052_s25  ;;  %s4198_s25 = sld [smem:[#allocation7 + $0x21]] }
 0x2c5   :  { %v4012_v35 = vpop.permute.xlu1 %1400  ;;  %v4014_v19 = vpop.permute.xlu0 %1408 }
 0x2c6   :  { %4825 = vst [vmem:[#allocation22_spill] sm:$0xff] %v4012_v35  ;;  %4826 = vst [vmem:[#allocation14_spill] sm:$0xff] %v4014_v19  ;;  %v1169_v35 = vmul.f32 %v1168_v24, %v3809_v10  ;;  %v1188_v19 = vstv %s4010_s16  ;;  %v2370_v10 = vld [vmem:[#allocation2 + $0x38] sm:$0xff]  ;;  %s4168_s16 = sld [smem:[#allocation7 + $0x1f]] }
 0x2c7   :  { %1766 = vrot.lane.b32.xlu1 %v4016_v50, %s2444_s27  ;;  %1768 = vrot.lane.b32.xlu0 %v4018_v14, %s2444_s27  ;;  %v1150_v42 = vmul.f32 %v2370_v10, %v1148_v57  ;;  %v1189_v62 = vmul.f32 %v1188_v19, %v3830_v26  ;;  %v2371_v57 = vld [vmem:[#allocation2 + $0x32] sm:$0xff]  ;;  %v1216_v10 = vstv %s4069_s26  ;;  %s4224_s26 = sld [smem:[#allocation7 + $0x18]] }
 0x2c8   :  { %v1171_v9 = vadd.f32 %v1169_v35, %v1161_v61 }
 0x2c9   :  { %v4031_v15 = vpop.permute.xlu1 %1410  ;;  %v4033_v43 = vpop.permute.xlu0 %1426  ;;  %v1162_v51 = vadd.f32 %v1160_v4, %v1150_v42  ;;  %v1295_v4 = vmul.f32 %v1294_v56, %v3908_v29  ;;  %v2372_v29 = vld [vmem:[#allocation2 + $0x3a] sm:$0xff] }
 0x2ca   :  { %4827 = vst [vmem:[#allocation16_spill] sm:$0xff] %v4031_v15  ;;  %v1181_v27 = vadd.f32 %v1179_v63, %v1171_v9  ;;  %v1190_v63 = vmul.f32 %v1188_v19, %v3836_v49  ;;  %v1284_v49 = vstv %s4050_s24  ;;  %s4191_s24 = sld [smem:[#allocation7 + $0x17]] }
 0x2cb   :  { %1776 = vrot.lane.b32.xlu1 %v4016_v50, %s2445_s28  ;;  %1778 = vrot.lane.b32.xlu0 %v4018_v14, %s2445_s28  ;;  %v1172_v6 = vadd.f32 %v1170_v39, %v1162_v51  ;;  %v1285_v24 = vmul.f32 %v2371_v57, %v1284_v49  ;;  %v1236_v57 = vstv %s4094_s10  ;;  %s4284_s10 = sld [smem:[#allocation7 + $0x23]] }
 0x2cc   :  { %v1191_v26 = vadd.f32 %v1189_v62, %v1181_v27  ;;  %v1200_v27 = vmul.f32 %v1198_v38, %v3844_v25  ;;  %v1210_v25 = vmul.f32 %v1208_v46, %v3852_v36  ;;  %v1304_v38 = vstv %s4061_s21  ;;  %s4208_s21 = sld [smem:[#allocation7 + $0x22]] }
 0x2cd   :  { %v4043_v31 = vpop.permute.xlu1 %1428  ;;  %v4045_v15 = vpop.permute.xlu0 %1436  ;;  %v1182_v51 = vadd.f32 %v1180_v1, %v1172_v6  ;;  %v1314_v36 = vstv %s4071_s0  ;;  %v1305_v62 = vmul.f32 %v1304_v38, %v3916_v2  ;;  %v1286_v6 = vmul.f32 %v2372_v29, %v1284_v49  ;;  %s4234_s0 = sld [smem:[#allocation7 + $0x19]] }
 0x2ce   :  { %v1201_v9 = vadd.f32 %v1199_v33, %v1191_v26  ;;  %v1324_v26 = vstv %s4083_s8  ;;  %v1315_v2 = vmul.f32 %v1314_v36, %v3926_v30  ;;  %v1334_v49 = vstv %s4098_s12  ;;  %s4254_s8 = sld [smem:[#allocation7 + $0x2b]]  ;;  %s4293_s12 = sld [smem:[#allocation7 + $0x24]] }
 0x2cf   :  { %1786 = vrot.lane.b32.xlu1 %v4016_v50, %s2446_s29  ;;  %1788 = vrot.lane.b32.xlu0 %v4018_v14, %s2446_s29  ;;  %v1192_v1 = vadd.f32 %v1190_v63, %v1182_v51  ;;  %v1306_v30 = vmul.f32 %v1304_v38, %v3924_v34  ;;  %v1316_v34 = vmul.f32 %v1314_v36, %v3934_v47 }
 0x2d0   :  { %v1211_v33 = vadd.f32 %v1209_v16, %v1201_v9  ;;  %v1344_v9 = vstv %s4108_s11  ;;  %v1237_v38 = vmul.f32 %v1236_v57, %v3862_v28  ;;  %v1326_v36 = vmul.f32 %v1324_v26, %v3942_v52  ;;  %s4306_s11 = sld [smem:[#allocation7 + $0x25]] }
 0x2d1   :  { %v4063_v53 = vpop.permute.xlu1 %1438  ;;  %v4065_v45 = vpop.permute.xlu0 %1446  ;;  %v1202_v19 = vadd.f32 %v1200_v27, %v1192_v1  ;;  %v1226_v27 = vstv %s4092_s9  ;;  %v1238_v52 = vmul.f32 %v1236_v57, %v3871_v3  ;;  %s4261_s9 = sld [smem:[#allocation7 + $0x1b]] }
 0x2d2   :  { %v1287_v39 = vadd.f32 %v1285_v24, %v1211_v33  ;;  %v1296_v33 = vmul.f32 %v1294_v56, %v3914_v59  ;;  %v1325_v56 = vmul.f32 %v1324_v26, %v3936_v23  ;;  %v1335_v23 = vmul.f32 %v1334_v49, %v3944_v40 }
 0x2d3   :  { %1730 = vrot.lane.b32.xlu1 %v3980_v5, %s2447_s30  ;;  %1796 = vrot.lane.b32.xlu0 %v4016_v50, %s2447_s30  ;;  %v1212_v42 = vadd.f32 %v1210_v25, %v1202_v19  ;;  %v2373_v25 = vld [vmem:[#allocation2 + $0x31] sm:$0xff] }
 0x2d4   :  { %v1297_v1 = vadd.f32 %v1295_v4, %v1287_v39  ;;  %v1217_v19 = vmul.f32 %v2373_v25, %v1216_v10  ;;  %v1227_v4 = vmul.f32 %v1226_v27, %v3854_v18  ;;  %v2374_v39 = vld [vmem:[#allocation2 + $0x39] sm:$0xff]  ;;  %v1246_v25 = vstv %s4105_s13  ;;  %s4300_s13 = sld [smem:[#allocation7 + $0x2d]] }
 0x2d5   :  { %v4085_v58 = vpop.permute.xlu1 %1448  ;;  %v4087_v21 = vpop.permute.xlu0 %1456  ;;  %v1288_v24 = vadd.f32 %v1286_v6, %v1212_v42  ;;  %v1218_v29 = vmul.f32 %v2374_v39, %v1216_v10  ;;  %v1228_v18 = vmul.f32 %v1226_v27, %v3860_v20  ;;  %v1256_v10 = vstv %s4116_s14  ;;  %s4315_s14 = sld [smem:[#allocation7 + $0x26]] }
 0x2d6   :  { %v1307_v59 = vadd.f32 %v1305_v62, %v1297_v1  ;;  %v4828_v6 = vstv %s4079_s5  ;;  %v1345_v20 = vmul.f32 %v1344_v9, %v3952_v13  ;;  %v1229_v28 = vadd.f32 %v1227_v4, %v1217_v19 }
 0x2d7   :  { %1798 = vrot.lane.b32.xlu1 %v4018_v14, %s2447_s30  ;;  %1738 = vrot.lane.b32.xlu0 %v3970_v0, %s2448_s3  ;;  %v1298_v42 = vadd.f32 %v1296_v33, %v1288_v24  ;;  %v4166_v1 = vmul.f32 %v4828_v6, %v3586_v12  ;;  %v1247_v12 = vmul.f32 %v1246_v25, %v3873_v44  ;;  %v1266_v27 = vstv %s4125_s15  ;;  %v4193_v44 = vld [vmem:[#allocation2 + $0x4b] sm:$0xff]  ;;  %v4218_v6 = vld [vmem:[#allocation2 + $0x53] sm:$0xff]  ;;  %s4322_s15 = sld [smem:[#allocation7 + $0x2e]] }
 0x2d8   :  { %v1317_v62 = vadd.f32 %v1315_v2, %v1307_v59  ;;  %v4829_v33 = vstv %s4081_s7  ;;  %v1239_v19 = vadd.f32 %v1237_v38, %v1229_v28  ;;  %v1430_v4 = vstv %s4141_s18  ;;  %s4236_s7 = sld [smem:[#allocation7 + $0x1a]]  ;;  %s4334_s18 = sld [smem:[#allocation7 + $0x28]] }
 0x2d9   :  { %v4110_v61 = vpop.permute.xlu1 %1458  ;;  %v4112_v35 = vpop.permute.xlu0 %1466  ;;  %v1308_v47 = vadd.f32 %v1306_v30, %v1298_v42  ;;  %v1421_v2 = vmul.f32 %v4829_v33, %v3745_v55  ;;  %v1336_v30 = vmul.f32 %v1334_v49, %v3950_v48  ;;  %v1257_v55 = vmul.f32 %v1256_v10, %v3884_v8 }
 0x2da   :  { %v1327_v40 = vadd.f32 %v1325_v56, %v1317_v62  ;;  %v1276_v56 = vstv %s4138_s17  ;;  %v1230_v3 = vadd.f32 %v1228_v18, %v1218_v29  ;;  %v1346_v49 = vmul.f32 %v1344_v9, %v3958_v32  ;;  %s4327_s17 = sld [smem:[#allocation7 + $0x27]] }
 0x2db   :  { %1740 = vrot.lane.b32.xlu1 %v3980_v5, %s2448_s3  ;;  %1806 = vrot.lane.b32.xlu0 %v4016_v50, %s2448_s3  ;;  %v1318_v13 = vadd.f32 %v1316_v34, %v1308_v47  ;;  %v1249_v39 = vadd.f32 %v1247_v12, %v1239_v19  ;;  %v1248_v42 = vmul.f32 %v1246_v25, %v3882_v7  ;;  %v1440_v62 = vstv %s4152_s19  ;;  %v4220_v7 = vld [vmem:[#allocation2 + $0x4c] sm:$0xff]  ;;  %s4345_s19 = sld [smem:[#allocation7 + $0x29]] }
 0x2dc   :  { %v1337_v26 = vadd.f32 %v1335_v23, %v1327_v40  ;;  %v1267_v8 = vmul.f32 %v1266_v27, %v3892_v54  ;;  %v1240_v38 = vadd.f32 %v1238_v52, %v1230_v3  ;;  %v1431_v18 = vmul.f32 %v1430_v4, %v4033_v43 }
 0x2dd   :  { %v4129_v16 = vpop.permute.xlu1 %1468  ;;  %v4131_v51 = vpop.permute.xlu0 %1476  ;;  %v1328_v48 = vadd.f32 %v1326_v36, %v1318_v13  ;;  %v4830_v32 = vmov %v4829_v33  ;;  %v1259_v54 = vadd.f32 %v1257_v55, %v1249_v39  ;;  %v1258_v25 = vmul.f32 %v1256_v10, %v3890_v17 }
 0x2de   :  { %v1347_v57 = vadd.f32 %v1345_v20, %v1337_v26  ;;  %v1422_v9 = vmul.f32 %v4830_v32, %v3762_v22  ;;  %v1277_v47 = vmul.f32 %v1276_v56, %v3900_v41  ;;  %v1450_v40 = vstv %s4168_s16  ;;  %v4246_v26 = vld [vmem:[#allocation2 + $0x54] sm:$0xff]  ;;  %s4354_s16 = sld [smem:[#allocation7 + $0x30]] }
 0x2df   :  { %1808 = vrot.lane.b32.xlu1 %v4018_v14, %s2448_s3  ;;  %1748 = vrot.lane.b32.xlu0 %v3970_v0, %s2449_s4  ;;  %v1338_v29 = vadd.f32 %v1336_v30, %v1328_v48  ;;  %v1362_v43 = vstv %s4176_s20  ;;  %v1441_v20 = vmul.f32 %v1440_v62, %v4045_v15  ;;  %v1250_v28 = vadd.f32 %v1248_v42, %v1240_v38  ;;  %s4368_s20 = sld [smem:[#allocation7 + $0x32]] }
 0x2e0   :  { %v1423_v36 = vadd.f32 %v1421_v2, %v1347_v57  ;;  %v1269_v17 = vadd.f32 %v1267_v8, %v1259_v54  ;;  %v1268_v41 = vmul.f32 %v1266_v27, %v3898_v60  ;;  %v1460_v10 = vstv %s4183_s23  ;;  %s4373_s23 = sld [smem:[#allocation7 + $0x31]] }
 0x2e1   :  { %v4154_v63 = vpop.permute.xlu1 %1478  ;;  %v4156_v46 = vpop.permute.xlu0 %1494  ;;  %v1348_v22 = vadd.f32 %v1346_v49, %v1338_v29  ;;  %v1372_v52 = vstv %s4191_s24  ;;  %v1432_v2 = vmul.f32 %v1430_v4, %v4043_v31  ;;  %v1451_v15 = vmul.f32 %v1450_v40, %v4065_v45  ;;  %v4832_v29 = vld [vmem:[#allocation20_spill] sm:$0xff]  ;;  %s4382_s24 = sld [smem:[#allocation7 + $0x33]] }
 0x2e2   :  { %v1433_v13 = vadd.f32 %v1431_v18, %v1423_v36  ;;  %v1260_v30 = vadd.f32 %v1258_v25, %v1250_v28  ;;  %v1279_v60 = vadd.f32 %v1277_v47, %v1269_v17  ;;  %v1278_v27 = vmul.f32 %v1276_v56, %v3906_v37  ;;  %v2375_v37 = vld [vmem:[#allocation2 + $0x3b] sm:$0xff]  ;;  %v4834_v28 = vld [vmem:[#allocation13_spill] sm:$0xff] }
 0x2e3   :  { %1750 = vrot.lane.b32.xlu1 %v3980_v5, %s2449_s4  ;;  %1816 = vrot.lane.b32.xlu0 %v4016_v50, %s2449_s4  ;;  %v1470_v19 = vstv %s4198_s25  ;;  %v1424_v31 = vadd.f32 %v1422_v9, %v1348_v22  ;;  %v1442_v45 = vmul.f32 %v1440_v62, %v4063_v53  ;;  %v1461_v4 = vmul.f32 %v1460_v10, %v4087_v21  ;;  %v4833_v47 = vld [vmem:[#allocation12_spill] sm:$0xff]  ;;  %s4391_s25 = sld [smem:[#allocation7 + $0x34]] }
 0x2e4   :  { %v1443_v55 = vadd.f32 %v1441_v20, %v1433_v13  ;;  %v1270_v3 = vadd.f32 %v1268_v41, %v1260_v30  ;;  %v1363_v48 = vmul.f32 %v1362_v43, %v3960_v11  ;;  %v4831_v56 = vstv %s4079_s5  ;;  %s4277_s5 = sld [smem:[#allocation7 + $0x2c]]  ;;  %v4836_v30 = vld [vmem:[#allocation32_spill] sm:$0xff] }
 0x2e5   :  { %v4185_v24 = vpop.permute.xlu1 %1496  ;;  %v4187_v59 = vpop.permute.xlu0 %1504  ;;  %v1354_v57 = vmul.f32 %v2375_v37, %v4831_v56  ;;  %v1480_v49 = vstv %s4208_s21  ;;  %v1434_v8 = vadd.f32 %v1432_v2, %v1424_v31  ;;  %v1452_v53 = vmul.f32 %v1450_v40, %v4085_v58  ;;  %v4835_v2 = vld [vmem:[#allocation33_spill] sm:$0xff]  ;;  %s4402_s21 = sld [smem:[#allocation7 + $0x35]] }
 0x2e6   :  { %v1453_v38 = vadd.f32 %v1451_v15, %v1443_v55  ;;  %v1471_v21 = vmul.f32 %v1470_v19, %v4112_v35  ;;  %v1280_v62 = vadd.f32 %v1278_v27, %v1270_v3  ;;  %v1355_v11 = vadd.f32 %v4166_v1, %v1279_v60  ;;  %v4837_v55 = vld [vmem:[#allocation29_spill] sm:$0xff]  ;;  %v4838_v3 = vld [vmem:[#allocation24_spill] sm:$0xff] }
 0x2e7   :  { %1818 = vrot.lane.b32.xlu1 %v4018_v14, %s2449_s4  ;;  %1834 = vrot.lane.b32.xlu0 %v4193_v44, %s2444_s27  ;;  %v1373_v18 = vmul.f32 %v1372_v52, %v4832_v29  ;;  %v1382_v32 = vstv %s4224_s26  ;;  %v1444_v9 = vadd.f32 %v1442_v45, %v1434_v8  ;;  %v1462_v58 = vmul.f32 %v1460_v10, %v4110_v61  ;;  %v4840_v8 = vld [vmem:[#allocation21_spill] sm:$0xff]  ;;  %s4414_s26 = sld [smem:[#allocation7 + $0x36]] }
 0x2e8   :  { %v1463_v54 = vadd.f32 %v1461_v4, %v1453_v38  ;;  %v1481_v35 = vmul.f32 %v1480_v49, %v4131_v51  ;;  %v1365_v25 = vadd.f32 %v1363_v48, %v1355_v11  ;;  %v1364_v1 = vmul.f32 %v1362_v43, %v4833_v47 }
 0x2e9   :  { %v4210_v34 = vpop.permute.xlu1 %1506  ;;  %v4212_v23 = vpop.permute.xlu0 %1514  ;;  %v1392_v40 = vstv %s4234_s0  ;;  %v1402_v22 = vstv %s4236_s7  ;;  %v1383_v17 = vmul.f32 %v1382_v32, %v4834_v28  ;;  %v1454_v41 = vadd.f32 %v1452_v53, %v1444_v9  ;;  %s4426_s0 = sld [smem:[#allocation7 + $0x37]]  ;;  %s4435_s7 = sld [smem:[#allocation7 + $0x39]] }
 0x2ea   :  { %v1473_v13 = vadd.f32 %v1471_v21, %v1463_v54  ;;  %v1472_v61 = vmul.f32 %v1470_v19, %v4129_v16  ;;  %v1356_v51 = vadd.f32 %v1354_v57, %v1280_v62  ;;  %v1375_v10 = vadd.f32 %v1373_v18, %v1365_v25  ;;  %v4842_v18 = vld [vmem:[#allocation14_spill] sm:$0xff] }
 0x2eb   :  { %1836 = vrot.lane.b32.xlu1 %v4218_v6, %s2444_s27  ;;  %1902 = vrot.lane.b32.xlu0 %v4220_v7, %s2444_s27  ;;  %v1374_v43 = vmul.f32 %v1372_v52, %v4835_v2  ;;  %v1566_v15 = vstv %s4254_s8  ;;  %v1393_v60 = vmul.f32 %v1392_v40, %v4836_v30  ;;  %v1464_v27 = vadd.f32 %v1462_v58, %v1454_v41  ;;  %s4437_s8 = sld [smem:[#allocation7 + $0x38]] }
 0x2ec   :  { %v1483_v16 = vadd.f32 %v1481_v35, %v1473_v13  ;;  %v1482_v19 = vmul.f32 %v1480_v49, %v4154_v63  ;;  %v1366_v31 = vadd.f32 %v1364_v1, %v1356_v51  ;;  %v1384_v52 = vmul.f32 %v1382_v32, %v4837_v55  ;;  %v4841_v49 = vld [vmem:[#allocation25_spill] sm:$0xff]  ;;  %v4843_v35 = vld [vmem:[#allocation22_spill] sm:$0xff]  ;;  %v4844_v1 = vld [vmem:[#allocation27_spill] sm:$0xff] }
 0x2ed   :  { %v4239_v12 = vpop.permute.xlu1 %1516  ;;  %v4241_v33 = vpop.permute.xlu0 %1524  ;;  %v1412_v45 = vstv %s4261_s9  ;;  %v4839_v48 = vstv %s4089_s6  ;;  %v1385_v57 = vadd.f32 %v1383_v17, %v1375_v10  ;;  %v1403_v38 = vmul.f32 %v1402_v22, %v4840_v8  ;;  %s4341_s6 = sld [smem:[#allocation7 + $0x2f]]  ;;  %s4451_s9 = sld [smem:[#allocation7 + $0x3b]] }
 0x2ee   :  { %v1557_v37 = vmul.f32 %v4839_v48, %v4838_v3  ;;  %v1474_v53 = vadd.f32 %v1472_v61, %v1464_v27  ;;  %v1376_v63 = vadd.f32 %v1374_v43, %v1366_v31  ;;  %v1394_v62 = vmul.f32 %v1392_v40, %v4841_v49  ;;  %v4846_v43 = vld [vmem:[#allocation16_spill] sm:$0xff]  ;;  %v4847_v31 = vld [vmem:[#allocation18_spill] sm:$0xff] }
 0x2ef   :  { %1904 = vrot.lane.b32.xlu1 %v4246_v26, %s2444_s27  ;;  %1844 = vrot.lane.b32.xlu0 %v4193_v44, %s2445_s28  ;;  %v1576_v11 = vstv %s4277_s5  ;;  %v1395_v29 = vadd.f32 %v1393_v60, %v1385_v57  ;;  %v1413_v32 = vmul.f32 %v1412_v45, %v4842_v18  ;;  %v1404_v25 = vmul.f32 %v1402_v22, %v4843_v35  ;;  %s4462_s5 = sld [smem:[#allocation7 + $0x3f]] }
 0x2f0   :  { %v1484_v9 = vadd.f32 %v1482_v19, %v1474_v53  ;;  %v1559_v54 = vadd.f32 %v1557_v37, %v1483_v16  ;;  %v1386_v58 = vadd.f32 %v1384_v52, %v1376_v63  ;;  %v1488_v47 = vstv %s4284_s10  ;;  %s4469_s10 = sld [smem:[#allocation7 + $0x40]] }
 0x2f1   :  { %v4264_v39 = vpop.permute.xlu1 %1526  ;;  %v4266_v42 = vpop.permute.xlu0 %1534  ;;  %v4845_v40 = vmov %v4839_v48  ;;  %v1405_v13 = vadd.f32 %v1403_v38, %v1395_v29  ;;  %v1414_v30 = vmul.f32 %v1412_v45, %v4846_v43  ;;  %v1498_v60 = vstv %s4293_s12  ;;  %s2300_s12 = sld [smem:[#allocation7 + $0x42]] }
 0x2f2   :  { %v1558_v28 = vmul.f32 %v4845_v40, %v4844_v1  ;;  %v1396_v2 = vadd.f32 %v1394_v62, %v1386_v58  ;;  %v1586_v22 = vstv %s4300_s13  ;;  %v1489_v55 = vmul.f32 %v1488_v47, %v4847_v31  ;;  %v4848_v62 = vld [vmem:[#allocation19_spill] sm:$0xff]  ;;  %s4498_s13 = sld [smem:[#allocation7 + $0x3d]] }
 0x2f3   :  { %1846 = vrot.lane.b32.xlu1 %v4218_v6, %s2445_s28  ;;  %1912 = vrot.lane.b32.xlu0 %v4220_v7, %s2445_s28  ;;  %v1415_v27 = vadd.f32 %v1413_v32, %v1405_v13  ;;  %v1508_v52 = vstv %s4306_s11  ;;  %v1499_v48 = vmul.f32 %v1498_v60, %v4156_v46  ;;  %v1518_v38 = vstv %s4315_s14  ;;  %s4510_s11 = sld [smem:[#allocation7 + $0x3e]]  ;;  %s4513_s14 = sld [smem:[#allocation7 + $0x45]] }
 0x2f4   :  { %v1560_v16 = vadd.f32 %v1558_v28, %v1484_v9  ;;  %v1406_v19 = vadd.f32 %v1404_v25, %v1396_v2  ;;  %v1596_v53 = vstv %s4322_s15  ;;  %v1509_v63 = vmul.f32 %v1508_v52, %v4187_v59  ;;  %s4515_s15 = sld [smem:[#allocation7 + $0x46]] }
 0x2f5   :  { %v4286_v36 = vpop.permute.xlu1 %1536  ;;  %v4288_v20 = vpop.permute.xlu0 %1544  ;;  %v1500_v29 = vmul.f32 %v1498_v60, %v4185_v24  ;;  %v1528_v18 = vstv %s4327_s17  ;;  %v1519_v58 = vmul.f32 %v1518_v38, %v4212_v23  ;;  %v1510_v40 = vmul.f32 %v1508_v52, %v4210_v34  ;;  %s4520_s17 = sld [smem:[#allocation7 + $0x4d]] }
 0x2f6   :  { %v1416_v8 = vadd.f32 %v1414_v30, %v1406_v19  ;;  %v1538_v59 = vstv %s4334_s18  ;;  %v1606_v24 = vstv %s4341_s6  ;;  %v1529_v28 = vmul.f32 %v1528_v18, %v4241_v33  ;;  %s4523_s18 = sld [smem:[#allocation7 + $0x4e]]  ;;  %s2306_s6 = sld [smem:[#allocation7 + $0x48]] }
 0x2f7   :  { %1914 = vrot.lane.b32.xlu1 %v4246_v26, %s2445_s28  ;;  %1854 = vrot.lane.b32.xlu0 %v4193_v44, %s2446_s29  ;;  %v1520_v13 = vmul.f32 %v1518_v38, %v4239_v12  ;;  %v1548_v34 = vstv %s4345_s19  ;;  %v1539_v2 = vmul.f32 %v1538_v59, %v4266_v42  ;;  %v1616_v12 = vstv %s4354_s16  ;;  %s2313_s19 = sld [smem:[#allocation7 + $0x4f]]  ;;  %s4571_s16 = sld [smem:[#allocation7 + $0x49]] }
 0x2f9   :  { %v4308_v4 = vpop.permute.xlu1 %1546  ;;  %v1563_v56 = vpop.permute.xlu0 %1562 }
 0x2fa   :  { %v1567_v21 = vmul.f32 %v1566_v15, %v1563_v56 }
 0x2fb   :  { %1856 = vrot.lane.b32.xlu1 %v4218_v6, %s2446_s29  ;;  %1922 = vrot.lane.b32.xlu0 %v4220_v7, %s2446_s29 }
 0x2fc   :  { %v1569_v61 = vadd.f32 %v1567_v21, %v1559_v54  ;;  %v1491_v21 = vadd.f32 %v1489_v55, %v1415_v27  ;;  %v1549_v27 = vmul.f32 %v1548_v34, %v4288_v20  ;;  %v1540_v55 = vmul.f32 %v1538_v59, %v4286_v36 }
 0x2fd   :  { %v1565_v17 = vpop.permute.xlu1 %1564  ;;  %v1573_v41 = vpop.permute.xlu0 %1572  ;;  %v1634_v20 = vstv %s4368_s20  ;;  %v1624_v36 = vstv %s4373_s23  ;;  %s4573_s20 = sld [smem:[#allocation7 + $0x50]]  ;;  %s4575_s23 = sld [smem:[#allocation7 + $0x54]] }
 0x2fe   :  { %v1568_v51 = vmul.f32 %v1566_v15, %v1565_v17  ;;  %v1577_v10 = vmul.f32 %v1576_v11, %v1573_v41  ;;  %v1501_v54 = vadd.f32 %v1499_v48, %v1491_v21 }
 0x2ff   :  { %1924 = vrot.lane.b32.xlu1 %v4246_v26, %s2446_s29  ;;  %1864 = vrot.lane.b32.xlu0 %v4193_v44, %s2447_s30 }
 0x300   :  { %v1579_v15 = vadd.f32 %v1577_v10, %v1569_v61  ;;  %v1570_v37 = vadd.f32 %v1568_v51, %v1560_v16 }
 0x301   :  { %v1575_v45 = vpop.permute.xlu1 %1574  ;;  %v1583_v3 = vpop.permute.xlu0 %1582 }
 0x302   :  { %v1578_v56 = vmul.f32 %v1576_v11, %v1575_v45  ;;  %v1587_v57 = vmul.f32 %v1586_v22, %v1583_v3  ;;  %v1490_v11 = vmul.f32 %v1488_v47, %v4848_v62  ;;  %v1511_v47 = vadd.f32 %v1509_v63, %v1501_v54 }
 0x303   :  { %1866 = vrot.lane.b32.xlu1 %v4218_v6, %s2447_s30  ;;  %1932 = vrot.lane.b32.xlu0 %v4220_v7, %s2447_s30 }
 0x304   :  { %v1580_v46 = vadd.f32 %v1578_v56, %v1570_v37  ;;  %v1589_v49 = vadd.f32 %v1587_v57, %v1579_v15  ;;  %v1492_v1 = vadd.f32 %v1490_v11, %v1416_v8  ;;  %v1521_v10 = vadd.f32 %v1519_v58, %v1511_v47  ;;  %v4849_v11 = vld [vmem:[#allocation30_spill] sm:$0xff] }
 0x305   :  { %v1585_v32 = vpop.permute.xlu1 %1584  ;;  %v1593_v9 = vpop.permute.xlu0 %1592  ;;  %v1550_v37 = vmul.f32 %v1548_v34, %v4308_v4  ;;  %v4419_v34 = vld [vmem:[#allocation2 + $0x4e] sm:$0xff] }
 0x306   :  { %v1588_v35 = vmul.f32 %v1586_v22, %v1585_v32  ;;  %v1597_v25 = vmul.f32 %v1596_v53, %v1593_v9  ;;  %v1502_v41 = vadd.f32 %v1500_v29, %v1492_v1  ;;  %v1530_v22 = vmul.f32 %v1528_v18, %v4264_v39 }
 0x307   :  { %1934 = vrot.lane.b32.xlu1 %v4246_v26, %s2447_s30  ;;  %1874 = vrot.lane.b32.xlu0 %v4193_v44, %s2448_s3  ;;  %v1531_v33 = vadd.f32 %v1529_v28, %v1521_v10  ;;  %v1625_v29 = vmul.f32 %v1624_v36, %v4849_v11  ;;  %v1654_v1 = vstv %s4391_s25  ;;  %s4579_s25 = sld [smem:[#allocation7 + $0x5b]] }
 0x308   :  { %v1590_v23 = vadd.f32 %v1588_v35, %v1580_v46  ;;  %v1599_v17 = vadd.f32 %v1597_v25, %v1589_v49  ;;  %v1512_v60 = vadd.f32 %v1510_v40, %v1502_v41  ;;  %v1644_v49 = vstv %s4382_s24  ;;  %v4407_v25 = vld [vmem:[#allocation2 + $0x4d] sm:$0xff]  ;;  %v4850_v40 = vld [vmem:[#allocation23_spill] sm:$0xff]  ;;  %s4577_s24 = sld [smem:[#allocation7 + $0x4a]] }
 0x309   :  { %v1595_v61 = vpop.permute.xlu1 %1594  ;;  %v1603_v51 = vpop.permute.xlu0 %1602  ;;  %v1541_v39 = vadd.f32 %v1539_v2, %v1531_v33  ;;  %v1626_v59 = vmul.f32 %v1624_v36, %v4850_v40 }
 0x30a   :  { %v1598_v43 = vmul.f32 %v1596_v53, %v1595_v61  ;;  %v1607_v30 = vmul.f32 %v1606_v24, %v1603_v51  ;;  %v1522_v15 = vadd.f32 %v1520_v13, %v1512_v60  ;;  %v4417_v13 = vld [vmem:[#allocation2 + $0x55] sm:$0xff]  ;;  %v1664_v61 = vstv %s4402_s21  ;;  %s4581_s21 = sld [smem:[#allocation7 + $0x51]] }
 0x30b   :  { %1876 = vrot.lane.b32.xlu1 %v4218_v6, %s2448_s3  ;;  %1942 = vrot.lane.b32.xlu0 %v4220_v7, %s2448_s3  ;;  %v1551_v48 = vadd.f32 %v1549_v27, %v1541_v39 }
 0x30c   :  { %v1600_v16 = vadd.f32 %v1598_v43, %v1590_v23  ;;  %v1609_v42 = vadd.f32 %v1607_v30, %v1599_v17  ;;  %v1532_v3 = vadd.f32 %v1530_v22, %v1522_v15  ;;  %v4428_v22 = vld [vmem:[#allocation2 + $0x56] sm:$0xff] }
 0x30d   :  { %v1605_v19 = vpop.permute.xlu1 %1604  ;;  %v1613_v31 = vpop.permute.xlu0 %1612 }
 0x30e   :  { %v1608_v52 = vmul.f32 %v1606_v24, %v1605_v19  ;;  %v1617_v45 = vmul.f32 %v1616_v12, %v1613_v31  ;;  %v1542_v53 = vadd.f32 %v1540_v55, %v1532_v3  ;;  %v1684_v31 = vstv %s4426_s0  ;;  %s4589_s0 = sld [smem:[#allocation7 + $0x52]] }
 0x30f   :  { %1944 = vrot.lane.b32.xlu1 %v4246_v26, %s2448_s3  ;;  %1884 = vrot.lane.b32.xlu0 %v4193_v44, %s2449_s4 }
 0x310   :  { %v1610_v56 = vadd.f32 %v1608_v52, %v1600_v16  ;;  %v1619_v57 = vadd.f32 %v1617_v45, %v1609_v42  ;;  %v1552_v4 = vadd.f32 %v1550_v37, %v1542_v53 }
 0x311   :  { %v1615_v8 = vpop.permute.xlu1 %1614  ;;  %v1631_v38 = vpop.permute.xlu0 %1630 }
 0x312   :  { %v4395_v21 = vadd.f32 %v1619_v57, %v1551_v48  ;;  %v1618_v63 = vmul.f32 %v1616_v12, %v1615_v8  ;;  %v1635_v46 = vmul.f32 %v1634_v20, %v1631_v38  ;;  %v1674_v12 = vstv %s4414_s26  ;;  %s4583_s26 = sld [smem:[#allocation7 + $0x4b]] }
 0x313   :  { %1886 = vrot.lane.b32.xlu1 %v4218_v6, %s2449_s4  ;;  %1952 = vrot.lane.b32.xlu0 %v4220_v7, %s2449_s4  ;;  %v1702_v48 = vstv %s4435_s7  ;;  %v1692_v8 = vstv %s4437_s8  ;;  %s4591_s7 = sld [smem:[#allocation7 + $0x4c]]  ;;  %s4593_s8 = sld [smem:[#allocation7 + $0x53]] }
 0x314   :  { %v1620_v62 = vadd.f32 %v1618_v63, %v1610_v56  ;;  %v1637_v54 = vadd.f32 %v1635_v46, %v1625_v29 }
 0x315   :  { %v1633_v18 = vpop.permute.xlu1 %1632  ;;  %v1641_v32 = vpop.permute.xlu0 %1640 }
 0x316   :  { %v4405_v9 = vadd.f32 %v1620_v62, %v1552_v4  ;;  %v1636_v58 = vmul.f32 %v1634_v20, %v1633_v18  ;;  %v1645_v35 = vmul.f32 %v1644_v49, %v1641_v32  ;;  %v1722_v32 = vstv %s4451_s9  ;;  %s4615_s9 = sld [smem:[#allocation7 + $0x5c]] }
 0x317   :  { %1954 = vrot.lane.b32.xlu1 %v4246_v26, %s2449_s4  ;;  %1970 = vrot.lane.b32.xlu0 %v4407_v25, %s2444_s27 }
 0x318   :  { %v1647_v24 = vadd.f32 %v1645_v35, %v1637_v54  ;;  %v1638_v23 = vadd.f32 %v1636_v58, %v1626_v59 }
 0x319   :  { %v1643_v47 = vpop.permute.xlu1 %1642  ;;  %v1651_v28 = vpop.permute.xlu0 %1650 }
 0x31a   :  { %v1646_v17 = vmul.f32 %v1644_v49, %v1643_v47  ;;  %v1655_v41 = vmul.f32 %v1654_v1, %v1651_v28  ;;  %v1693_v49 = vmul.f32 %v1692_v8, %v3970_v0  ;;  %v1694_v0 = vmul.f32 %v1692_v8, %v3980_v5 }
 0x31b   :  { %1972 = vrot.lane.b32.xlu1 %v4417_v13, %s2444_s27  ;;  %2038 = vrot.lane.b32.xlu0 %v4419_v34, %s2444_s27 }
 0x31c   :  { %v1648_v51 = vadd.f32 %v1646_v17, %v1638_v23  ;;  %v1657_v10 = vadd.f32 %v1655_v41, %v1647_v24  ;;  %v1760_v17 = vstv %s4462_s5  ;;  %s4622_s5 = sld [smem:[#allocation7 + $0x5d]] }
 0x31d   :  { %v1653_v2 = vpop.permute.xlu1 %1652  ;;  %v1661_v43 = vpop.permute.xlu0 %1660 }
 0x31e   :  { %v1656_v30 = vmul.f32 %v1654_v1, %v1653_v2  ;;  %v1665_v60 = vmul.f32 %v1664_v61, %v1661_v43  ;;  %v1761_v43 = vmul.f32 %v1760_v17, %v4016_v50 }
 0x31f   :  { %2040 = vrot.lane.b32.xlu1 %v4428_v22, %s2444_s27  ;;  %1980 = vrot.lane.b32.xlu0 %v4407_v25, %s2445_s28  ;;  %s4444_s27 = sld [smem:[#allocation7 + $0x3a]] }
 0x320   :  { %v1658_v33 = vadd.f32 %v1656_v30, %v1648_v51  ;;  %v1667_v27 = vadd.f32 %v1665_v60, %v1657_v10  ;;  %v1770_v51 = vstv %s4469_s10  ;;  %v1762_v30 = vmul.f32 %v1760_v17, %v4018_v14  ;;  %s4627_s10 = sld [smem:[#allocation7 + $0x57]] }
 0x321   :  { %v1663_v16 = vpop.permute.xlu1 %1662  ;;  %v1671_v42 = vpop.permute.xlu0 %1670 }
 0x322   :  { %v1666_v15 = vmul.f32 %v1664_v61, %v1663_v16  ;;  %v1675_v19 = vmul.f32 %v1674_v12, %v1671_v42 }
 0x323   :  { %1982 = vrot.lane.b32.xlu1 %v4417_v13, %s2445_s28  ;;  %2048 = vrot.lane.b32.xlu0 %v4419_v34, %s2445_s28 }
 0x324   :  { %v1668_v39 = vadd.f32 %v1666_v15, %v1658_v33  ;;  %v1677_v55 = vadd.f32 %v1675_v19, %v1667_v27 }
 0x325   :  { %v1673_v52 = vpop.permute.xlu1 %1672  ;;  %v1681_v45 = vpop.permute.xlu0 %1680  ;;  %v1712_v63 = vstv %s4444_s27  ;;  %s4604_s27 = sld [smem:[#allocation7 + $0x55]] }
 0x326   :  { %v1676_v3 = vmul.f32 %v1674_v12, %v1673_v52  ;;  %v1685_v20 = vmul.f32 %v1684_v31, %v1681_v45  ;;  %v1790_v52 = vstv %s2300_s12  ;;  %s4638_s12 = sld [smem:[#allocation7 + $0x58]] }
 0x327   :  { %2050 = vrot.lane.b32.xlu1 %v4428_v22, %s2445_s28  ;;  %1990 = vrot.lane.b32.xlu0 %v4407_v25, %s2446_s29  ;;  %s4459_s28 = sld [smem:[#allocation7 + $0x3c]] }
 0x328   :  { %v1678_v37 = vadd.f32 %v1676_v3, %v1668_v39  ;;  %v1687_v56 = vadd.f32 %v1685_v20, %v1677_v55 }
 0x329   :  { %v1683_v57 = vpop.permute.xlu1 %1682  ;;  %v1699_v36 = vpop.permute.xlu0 %1698 }
 0x32a   :  { %v1686_v38 = vmul.f32 %v1684_v31, %v1683_v57  ;;  %v1703_v53 = vmul.f32 %v1702_v48, %v1699_v36  ;;  %v1763_v33 = vadd.f32 %v1761_v43, %v1687_v56 }
 0x32b   :  { %1992 = vrot.lane.b32.xlu1 %v4417_v13, %s2446_s29  ;;  %2058 = vrot.lane.b32.xlu0 %v4419_v34, %s2446_s29 }
 0x32c   :  { %v1688_v46 = vadd.f32 %v1686_v38, %v1678_v37  ;;  %v1705_v11 = vadd.f32 %v1703_v53, %v1693_v49  ;;  %v1742_v49 = vstv %s4498_s13  ;;  %s4643_s13 = sld [smem:[#allocation7 + $0x59]] }
 0x32d   :  { %v1701_v4 = vpop.permute.xlu1 %1700  ;;  %v1709_v62 = vpop.permute.xlu0 %1708  ;;  %v1732_v24 = vstv %s4459_s28  ;;  %s4620_s28 = sld [smem:[#allocation7 + $0x56]] }
 0x32e   :  { %v1704_v29 = vmul.f32 %v1702_v48, %v1701_v4  ;;  %v1713_v18 = vmul.f32 %v1712_v63, %v1709_v62  ;;  %v1764_v16 = vadd.f32 %v1762_v30, %v1688_v46  ;;  %v1828_v30 = vstv %s4515_s15  ;;  %s2450_s15 = smov [#allocation8]  }
 0x32f   :  { %2060 = vrot.lane.b32.xlu1 %v4428_v22, %s2446_s29  ;;  %2000 = vrot.lane.b32.xlu0 %v4407_v25, %s2447_s30  ;;  %s4477_s29 = sld [smem:[#allocation7 + $0x41]] }
 0x330   :  { %v1715_v54 = vadd.f32 %v1713_v18, %v1705_v11  ;;  %v1706_v1 = vadd.f32 %v1704_v29, %v1694_v0 }
 0x331   :  { %v1711_v58 = vpop.permute.xlu1 %1710  ;;  %v1719_v35 = vpop.permute.xlu0 %1718 }
 0x332   :  { %v1714_v40 = vmul.f32 %v1712_v63, %v1711_v58  ;;  %v1723_v59 = vmul.f32 %v1722_v32, %v1719_v35 }
 0x333   :  { %2002 = vrot.lane.b32.xlu1 %v4417_v13, %s2447_s30  ;;  %2068 = vrot.lane.b32.xlu0 %v4419_v34, %s2447_s30 }
 0x334   :  { %v1716_v47 = vadd.f32 %v1714_v40, %v1706_v1  ;;  %v1725_v28 = vadd.f32 %v1723_v59, %v1715_v54 }
 0x335   :  { %v1721_v23 = vpop.permute.xlu1 %1720  ;;  %v1729_v5 = vpop.permute.xlu0 %1728  ;;  %v1780_v15 = vstv %s4477_s29  ;;  %s4629_s29 = sld [smem:[#allocation7 + $0x5e]] }
 0x336   :  { %v1724_v41 = vmul.f32 %v1722_v32, %v1721_v23  ;;  %v1733_v61 = vmul.f32 %v1732_v24, %v1729_v5 }
 0x337   :  { %2070 = vrot.lane.b32.xlu1 %v4428_v22, %s2447_s30  ;;  %2010 = vrot.lane.b32.xlu0 %v4407_v25, %s2448_s3  ;;  %s4492_s30 = sld [smem:[#allocation7 + $0x43]] }
 0x338   :  { %v1726_v10 = vadd.f32 %v1724_v41, %v1716_v47  ;;  %v1735_v2 = vadd.f32 %v1733_v61, %v1725_v28  ;;  %v1820_v61 = vstv %s4513_s14  ;;  %s4668_s14 = sld [smem:[#allocation7 + $0x61]] }
 0x339   :  { %v1767_v60 = vpop.permute.xlu1 %1766  ;;  %v1769_v12 = vpop.permute.xlu0 %1768 }
 0x33a   :  { %v1771_v27 = vmul.f32 %v1770_v51, %v1767_v60  ;;  %v1772_v42 = vmul.f32 %v1770_v51, %v1769_v12 }
 0x33b   :  { %2012 = vrot.lane.b32.xlu1 %v4417_v13, %s2448_s3  ;;  %2078 = vrot.lane.b32.xlu0 %v4419_v34, %s2448_s3 }
 0x33c   :  { %v1773_v19 = vadd.f32 %v1771_v27, %v1763_v33  ;;  %v1774_v31 = vadd.f32 %v1772_v42, %v1764_v16  ;;  %v1829_v42 = vmul.f32 %v1828_v30, %v4193_v44 }
 0x33d   :  { %v1777_v50 = vpop.permute.xlu1 %1776  ;;  %v1779_v14 = vpop.permute.xlu0 %1778  ;;  %v1800_v57 = vstv %s4492_s30  ;;  %s4641_s30 = sld [smem:[#allocation7 + $0x5f]] }
 0x33e   :  { %v1781_v39 = vmul.f32 %v1780_v15, %v1777_v50  ;;  %v1782_v55 = vmul.f32 %v1780_v15, %v1779_v14 }
 0x33f   :  { %2080 = vrot.lane.b32.xlu1 %v4428_v22, %s2448_s3  ;;  %2020 = vrot.lane.b32.xlu0 %v4407_v25, %s2449_s4  ;;  %s4505_s3 = sld [smem:[#allocation7 + $0x44]] }
 0x340   :  { %v1783_v45 = vadd.f32 %v1781_v39, %v1773_v19  ;;  %v1784_v3 = vadd.f32 %v1782_v55, %v1774_v31  ;;  %v1896_v31 = vstv %s4520_s17  ;;  %v1906_v55 = vstv %s4523_s18 }
 0x341   :  { %v1787_v20 = vpop.permute.xlu1 %1786  ;;  %v1789_v48 = vpop.permute.xlu0 %1788 }
 0x342   :  { %v1791_v37 = vmul.f32 %v1790_v52, %v1787_v20  ;;  %v1792_v56 = vmul.f32 %v1790_v52, %v1789_v48  ;;  %v1897_v20 = vmul.f32 %v1896_v31, %v4220_v7 }
 0x343   :  { %2022 = vrot.lane.b32.xlu1 %v4417_v13, %s2449_s4  ;;  %2088 = vrot.lane.b32.xlu0 %v4419_v34, %s2449_s4 }
 0x344   :  { %v1793_v8 = vadd.f32 %v1791_v37, %v1783_v45  ;;  %v1794_v36 = vadd.f32 %v1792_v56, %v1784_v3  ;;  %v1830_v3 = vmul.f32 %v1828_v30, %v4218_v6  ;;  %v1848_v30 = vstv %s2306_s6 }
 0x345   :  { %v1731_v38 = vpop.permute.xlu1 %1730  ;;  %v1797_v53 = vpop.permute.xlu0 %1796  ;;  %v1810_v0 = vstv %s4505_s3  ;;  %s4652_s3 = sld [smem:[#allocation7 + $0x60]] }
 0x346   :  { %v1734_v63 = vmul.f32 %v1732_v24, %v1731_v38  ;;  %v1801_v46 = vmul.f32 %v1800_v57, %v1797_v53  ;;  %v1752_v24 = vstv %s4510_s11  ;;  %v1898_v53 = vmul.f32 %v1896_v31, %v4246_v26  ;;  %s4654_s11 = sld [smem:[#allocation7 + $0x5a]] }
 0x347   :  { %2090 = vrot.lane.b32.xlu1 %v4428_v22, %s2449_s4  ;;  %s4518_s4 = sld [smem:[#allocation7 + $0x47]]  ;;  %v1868_v31 = vstv %s4577_s24 }
 0x348   :  { %v1736_v4 = vadd.f32 %v1734_v63, %v1726_v10  ;;  %v1803_v62 = vadd.f32 %v1801_v46, %v1793_v8 }
 0x349   :  { %v1799_v11 = vpop.permute.xlu1 %1798  ;;  %v1739_v29 = vpop.permute.xlu0 %1738 }
 0x34a   :  { %v1802_v18 = vmul.f32 %v1800_v57, %v1799_v11  ;;  %v1743_v32 = vmul.f32 %v1742_v49, %v1739_v29 }
 0x34c   :  { %v1804_v54 = vadd.f32 %v1802_v18, %v1794_v36  ;;  %v1745_v58 = vadd.f32 %v1743_v32, %v1735_v2 }
 0x34d   :  { %v1741_v35 = vpop.permute.xlu1 %1740  ;;  %v1807_v1 = vpop.permute.xlu0 %1806  ;;  %v1838_v33 = vstv %s4518_s4  ;;  %s2123_s4 = sshll.u32 %s2450_s15, 4  ;;  %s2124_s4 = int_to_ptr.vmem [resolvable:$true] %s2123_s4 }
 0x34e   :  { %v1744_v40 = vmul.f32 %v1742_v49, %v1741_v35  ;;  %v1811_v59 = vmul.f32 %v1810_v0, %v1807_v1  ;;  %s2410_s17 = scalar_lea.vmem %s2124_s4, 512  ;;  %p2415_p0 = scmp.lt.s32.totalorder %s2124_s4, %s2124_s4 }
 0x34f   :  { %p2411_p13 = scmp.ne.s32.totalorder %s2124_s4, %s2410_s17  ;;  %p2416_p1 = scmp.lt.s32.totalorder %s2410_s17, %s2410_s17 }
 0x350   :  { %v1746_v47 = vadd.f32 %v1744_v40, %v1736_v4  ;;  %v1813_v28 = vadd.f32 %v1811_v59, %v1803_v62 }
 0x351   :  { %v1809_v23 = vpop.permute.xlu1 %1808  ;;  %v1749_v5 = vpop.permute.xlu0 %1748  ;;  %p2417_p2 = por %p2416_p1, %p2415_p0 }
 0x352   :  { %v1812_v17 = vmul.f32 %v1810_v0, %v1809_v23  ;;  %v1753_v41 = vmul.f32 %v1752_v24, %v1749_v5 }
 0x353   :  { %p2418_p3 = pnand %p2417_p2, %p2411_p13 }
 0x354   :  { %v1814_v51 = vadd.f32 %v1812_v17, %v1804_v54  ;;  %v1755_v10 = vadd.f32 %v1753_v41, %v1745_v58 }
 0x355   :  { %v1751_v2 = vpop.permute.xlu1 %1750  ;;  %v1817_v43 = vpop.permute.xlu0 %1816 }
 0x356   :  { %v1754_v60 = vmul.f32 %v1752_v24, %v1751_v2  ;;  %v1821_v12 = vmul.f32 %v1820_v61, %v1817_v43  ;;  %v1831_v14 = vadd.f32 %v1829_v42, %v1755_v10  ;;  %v1926_v42 = vstv %s4573_s20 }
 0x358   :  { %v1756_v27 = vadd.f32 %v1754_v60, %v1746_v47  ;;  %v1823_v16 = vadd.f32 %v1821_v12, %v1813_v28  ;;  %v1916_v60 = vstv %s2313_s19 }
 0x359   :  { %v1819_v15 = vpop.permute.xlu1 %1818  ;;  %v1835_v19 = vpop.permute.xlu0 %1834 }
 0x35a   :  { %v1822_v50 = vmul.f32 %v1820_v61, %v1819_v15  ;;  %v1839_v39 = vmul.f32 %v1838_v33, %v1835_v19  ;;  %v1832_v56 = vadd.f32 %v1830_v3, %v1756_v27  ;;  %v1899_v8 = vadd.f32 %v1897_v20, %v1823_v16 }
 0x35b   :  { %v1858_v27 = vstv %s4571_s16 }
 0x35c   :  { %v1824_v52 = vadd.f32 %v1822_v50, %v1814_v51  ;;  %v4530_v45 = vadd.f32 %v1839_v39, %v1831_v14  ;;  %v1964_v50 = vstv %s4575_s23 }
 0x35d   :  { %v1837_v48 = vpop.permute.xlu1 %1836  ;;  %v1903_v37 = vpop.permute.xlu0 %1902 }
 0x35e   :  { %v1840_v57 = vmul.f32 %v1838_v33, %v1837_v48  ;;  %v1907_v44 = vmul.f32 %v1906_v55, %v1903_v37  ;;  %v1900_v49 = vadd.f32 %v1898_v53, %v1824_v52  ;;  %v2032_v52 = vstv %s4579_s25 }
 0x35f   :  { %v1878_v37 = vstv %s4583_s26 }
 0x360   :  { %v4534_v36 = vadd.f32 %v1840_v57, %v1832_v56  ;;  %v4536_v38 = vadd.f32 %v1907_v44, %v1899_v8  ;;  %v1946_v56 = vstv %s4589_s0  ;;  %v1888_v57 = vstv %s4591_s7 }
 0x361   :  { %v1905_v63 = vpop.permute.xlu1 %1904  ;;  %v1845_v46 = vpop.permute.xlu0 %1844 }
 0x362   :  { %v1908_v4 = vmul.f32 %v1906_v55, %v1905_v63  ;;  %v1849_v16 = vmul.f32 %v1848_v30, %v1845_v46  ;;  %v1936_v55 = vstv %s4581_s21 }
 0x364   :  { %v4539_v62 = vadd.f32 %v1908_v4, %v1900_v49  ;;  %v1851_v8 = vadd.f32 %v1849_v16, %v4530_v45  ;;  %v1974_v16 = vstv %s4604_s27 }
 0x365   :  { %v1847_v6 = vpop.permute.xlu1 %1846  ;;  %v1913_v7 = vpop.permute.xlu0 %1912 }
 0x366   :  { %v1850_v15 = vmul.f32 %v1848_v30, %v1847_v6  ;;  %v1917_v19 = vmul.f32 %v1916_v60, %v1913_v7  ;;  %v1956_v6 = vstv %s4593_s8 }
 0x368   :  { %v1852_v46 = vadd.f32 %v1850_v15, %v4534_v36  ;;  %v1919_v49 = vadd.f32 %v1917_v19, %v4536_v38 }
 0x369   :  { %v1915_v11 = vpop.permute.xlu1 %1914  ;;  %v1855_v29 = vpop.permute.xlu0 %1854 }
 0x36a   :  { %v1918_v14 = vmul.f32 %v1916_v60, %v1915_v11  ;;  %v1859_v39 = vmul.f32 %v1858_v27, %v1855_v29 }
 0x36c   :  { %v1920_v7 = vadd.f32 %v1918_v14, %v4539_v62  ;;  %v1861_v11 = vadd.f32 %v1859_v39, %v1851_v8  ;;  %v1965_v62 = vmul.f32 %v1964_v50, %v4407_v25  ;;  %v2034_v14 = vmul.f32 %v2032_v52, %v4428_v22 }
 0x36d   :  { %v1857_v18 = vpop.permute.xlu1 %1856  ;;  %v1923_v32 = vpop.permute.xlu0 %1922  ;;  %v2052_v8 = vstv %s4622_s5  ;;  %v2004_v22 = vstv %s4638_s12 }
 0x36e   :  { %v1927_v48 = vmul.f32 %v1926_v42, %v1923_v32  ;;  %v1860_v44 = vmul.f32 %v1858_v27, %v1857_v18 }
 0x370   :  { %v1929_v18 = vadd.f32 %v1927_v48, %v1919_v49  ;;  %v2072_v49 = vstv %s4641_s30 }
 0x371   :  { %v1925_v0 = vpop.permute.xlu1 %1924  ;;  %v1865_v54 = vpop.permute.xlu0 %1864 }
 0x372   :  { %v1928_v53 = vmul.f32 %v1926_v42, %v1925_v0  ;;  %v1869_v63 = vmul.f32 %v1868_v31, %v1865_v54  ;;  %v1862_v54 = vadd.f32 %v1860_v44, %v1852_v46  ;;  %v1966_v42 = vmul.f32 %v1964_v50, %v4417_v13 }
 0x373   :  { %v2033_v13 = vmul.f32 %v2032_v52, %v4419_v34  ;;  %v2042_v50 = vstv %s4615_s9  ;;  %v1994_v44 = vstv %s4627_s10 }
 0x375   :  { %v4541_v58 = vpop.permute.xlu1 %1866  ;;  %v1933_v35 = vpop.permute.xlu0 %1932 }
 0x376   :  { %v1937_v4 = vmul.f32 %v1936_v55, %v1933_v35  ;;  %v1870_v45 = vmul.f32 %v1868_v31, %v4541_v58  ;;  %v1930_v58 = vadd.f32 %v1928_v53, %v1920_v7  ;;  %v1871_v35 = vadd.f32 %v1869_v63, %v1861_v11 }
 0x378   :  { %v1939_v30 = vadd.f32 %v1937_v4, %v1929_v18  ;;  %v1872_v25 = vadd.f32 %v1870_v45, %v1862_v54  ;;  %v2014_v4 = vstv %s4643_s13  ;;  %v2082_v18 = vstv %s4652_s3 }
 0x379   :  { %v4543_v1 = vpop.permute.xlu1 %1934  ;;  %v4545_v26 = vpop.permute.xlu0 %1874 }
 0x37a   :  { %v1879_v29 = vmul.f32 %v1878_v37, %v4545_v26  ;;  %v1938_v32 = vmul.f32 %v1936_v55, %v4543_v1 }
 0x37c   :  { %v1881_v27 = vadd.f32 %v1879_v29, %v1871_v35 }
 0x37d   :  { %v4547_v40 = vpop.permute.xlu1 %1876  ;;  %v4549_v59 = vpop.permute.xlu0 %1942 }
 0x37e   :  { %v1947_v0 = vmul.f32 %v1946_v56, %v4549_v59  ;;  %v1880_v60 = vmul.f32 %v1878_v37, %v4547_v40  ;;  %v1940_v40 = vadd.f32 %v1938_v32, %v1930_v58  ;;  %v1984_v37 = vstv %s4620_s28 }
 0x380   :  { %v1882_v39 = vadd.f32 %v1880_v60, %v1872_v25 }
 0x381   :  { %v4551_v24 = vpop.permute.xlu1 %1944  ;;  %v4553_v47 = vpop.permute.xlu0 %1884 }
 0x382   :  { %v1889_v26 = vmul.f32 %v1888_v57, %v4553_v47  ;;  %v1948_v1 = vmul.f32 %v1946_v56, %v4551_v24  ;;  %v1949_v24 = vadd.f32 %v1947_v0, %v1939_v30  ;;  %v2024_v0 = vstv %s4654_s11 }
 0x384   :  { %v1891_v31 = vadd.f32 %v1889_v26, %v1881_v27  ;;  %v1950_v55 = vadd.f32 %v1948_v1, %v1940_v40 }
 0x385   :  { %v4555_v28 = vpop.permute.xlu1 %1886  ;;  %v4557_v23 = vpop.permute.xlu0 %1952 }
 0x386   :  { %v1957_v59 = vmul.f32 %v1956_v6, %v4557_v23  ;;  %v1890_v23 = vmul.f32 %v1888_v57, %v4555_v28  ;;  %v2062_v28 = vstv %s4629_s29  ;;  %v1967_v52 = vadd.f32 %v1965_v62, %v1891_v31 }
 0x388   :  { %v1959_v48 = vadd.f32 %v1957_v59, %v1949_v24  ;;  %v1892_v53 = vadd.f32 %v1890_v23, %v1882_v39  ;;  %v2092_v24 = vstv %s4668_s14 }
 0x389   :  { %v4559_v5 = vpop.permute.xlu1 %1954  ;;  %v4561_v17 = vpop.permute.xlu0 %1970 }
 0x38a   :  { %v1958_v19 = vmul.f32 %v1956_v6, %v4559_v5  ;;  %v1975_v56 = vmul.f32 %v1974_v16, %v4561_v17  ;;  %v2035_v6 = vadd.f32 %v2033_v13, %v1959_v48  ;;  %v1968_v54 = vadd.f32 %v1966_v42, %v1892_v53 }
 0x38c   :  { %v1960_v34 = vadd.f32 %v1958_v19, %v1950_v55  ;;  %v1977_v45 = vadd.f32 %v1975_v56, %v1967_v52 }
 0x38d   :  { %v4563_v41 = vpop.permute.xlu1 %1972  ;;  %v4565_v61 = vpop.permute.xlu0 %2038 }
 0x38e   :  { %v2043_v63 = vmul.f32 %v2042_v50, %v4565_v61  ;;  %v1976_v17 = vmul.f32 %v1974_v16, %v4563_v41  ;;  %v2036_v58 = vadd.f32 %v2034_v14, %v1960_v34 }
 0x390   :  { %v2045_v62 = vadd.f32 %v2043_v63, %v2035_v6  ;;  %v1978_v26 = vadd.f32 %v1976_v17, %v1968_v54 }
 0x391   :  { %v4567_v51 = vpop.permute.xlu1 %2040  ;;  %v4569_v10 = vpop.permute.xlu0 %1980 }
 0x392   :  { %v1985_v46 = vmul.f32 %v1984_v37, %v4569_v10  ;;  %v2044_v7 = vmul.f32 %v2042_v50, %v4567_v51 }
 0x394   :  { %v1987_v35 = vadd.f32 %v1985_v46, %v1977_v45  ;;  %v2046_v30 = vadd.f32 %v2044_v7, %v2036_v58 }
 0x395   :  { %v4585_v2 = vpop.permute.xlu1 %1982  ;;  %v4587_v43 = vpop.permute.xlu0 %2048 }
 0x396   :  { %v2053_v11 = vmul.f32 %v2052_v8, %v4587_v43  ;;  %v1986_v41 = vmul.f32 %v1984_v37, %v4585_v2 }
 0x398   :  { %v1988_v2 = vadd.f32 %v1986_v41, %v1978_v26 }
 0x399   :  { %v4595_v12 = vpop.permute.xlu1 %2050  ;;  %v4597_v33 = vpop.permute.xlu0 %1990 }
 0x39a   :  { %v1995_v29 = vmul.f32 %v1994_v44, %v4597_v33  ;;  %v2054_v51 = vmul.f32 %v2052_v8, %v4595_v12  ;;  %v2055_v33 = vadd.f32 %v2053_v11, %v2045_v62 }
 0x39c   :  { %v1997_v1 = vadd.f32 %v1995_v29, %v1987_v35  ;;  %v2056_v23 = vadd.f32 %v2054_v51, %v2046_v30 }
 0x39d   :  { %v4607_v3 = vpop.permute.xlu1 %1992  ;;  %v4609_v20 = vpop.permute.xlu0 %2058 }
 0x39e   :  { %v2063_v10 = vmul.f32 %v2062_v28, %v4609_v20  ;;  %v1996_v59 = vmul.f32 %v1994_v44, %v4607_v3 }
 0x3a0   :  { %v2065_v42 = vadd.f32 %v2063_v10, %v2055_v33 }
 0x3a1   :  { %v4631_v36 = vpop.permute.xlu1 %2060  ;;  %v4633_v38 = vpop.permute.xlu0 %2000 }
 0x3a2   :  { %v2005_v43 = vmul.f32 %v2004_v22, %v4633_v38  ;;  %v2064_v25 = vmul.f32 %v2062_v28, %v4631_v36 }
 0x3a4   :  { %v2007_v12 = vadd.f32 %v2005_v43, %v1997_v1  ;;  %v2066_v50 = vadd.f32 %v2064_v25, %v2056_v23 }
 0x3a5   :  { %v4650_v15 = vpop.permute.xlu1 %2002  ;;  %v2069_v47 = vpop.permute.xlu0 %2068 }
 0x3a6   :  { %v2073_v60 = vmul.f32 %v2072_v49, %v2069_v47  ;;  %v2006_v38 = vmul.f32 %v2004_v22, %v4650_v15  ;;  %v1998_v47 = vadd.f32 %v1996_v59, %v1988_v2 }
 0x3a8   :  { %v2075_v19 = vadd.f32 %v2073_v60, %v2065_v42  ;;  %v2008_v56 = vadd.f32 %v2006_v38, %v1998_v47 }
 0x3a9   :  { %v2071_v57 = vpop.permute.xlu1 %2070  ;;  %v2011_v5 = vpop.permute.xlu0 %2010 }
 0x3aa   :  { %v2015_v27 = vmul.f32 %v2014_v4, %v2011_v5  ;;  %v2074_v31 = vmul.f32 %v2072_v49, %v2071_v57 }
 0x3ac   :  { %v2017_v14 = vadd.f32 %v2015_v27, %v2007_v12  ;;  %v2076_v8 = vadd.f32 %v2074_v31, %v2066_v50 }
 0x3ad   :  { %v2013_v61 = vpop.permute.xlu1 %2012  ;;  %v2079_v32 = vpop.permute.xlu0 %2078 }
 0x3ae   :  { %v2083_v40 = vmul.f32 %v2082_v18, %v2079_v32  ;;  %v2016_v36 = vmul.f32 %v2014_v4, %v2013_v61 }
 0x3b0   :  { %v2085_v55 = vadd.f32 %v2083_v40, %v2075_v19  ;;  %v2018_v34 = vadd.f32 %v2016_v36, %v2008_v56 }
 0x3b1   :  { %v2081_v16 = vpop.permute.xlu1 %2080  ;;  %v2021_v20 = vpop.permute.xlu0 %2020 }
 0x3b2   :  { %v2025_v13 = vmul.f32 %v2024_v0, %v2021_v20  ;;  %v2084_v48 = vmul.f32 %v2082_v18, %v2081_v16 }
 0x3b4   :  { %v2027_v44 = vadd.f32 %v2025_v13, %v2017_v14  ;;  %v2086_v15 = vadd.f32 %v2084_v48, %v2076_v8 }
 0x3b5   :  { %v2023_v3 = vpop.permute.xlu1 %2022  ;;  %v2089_v39 = vpop.permute.xlu0 %2088 }
 0x3b6   :  { %v2093_v37 = vmul.f32 %v2092_v24, %v2089_v39  ;;  %v2026_v28 = vmul.f32 %v2024_v0, %v2023_v3 }
 0x3b8   :  { %v2095_v5 = vadd.f32 %v2093_v37, %v2085_v55  ;;  %v2028_v22 = vadd.f32 %v2026_v28, %v2018_v34 }
 0x3b9   :  { %v2091_v53 = vpop.permute.xlu1 %2090 }
 0x3ba   :  { %v2099_v63 = vadd.f32 %v2095_v5, %v2027_v44  ;;  %v2094_v57 = vmul.f32 %v2092_v24, %v2091_v53 }
 0x3bc   :  { %v2101_v52 = vadd.f32 %v2099_v63, %v4395_v21  ;;  %v2096_v46 = vadd.f32 %v2094_v57, %v2086_v15 }
 0x3be   :  { %v2332_v49 = vmul.f32 -1.442695, %v2101_v52  ;;  %v2100_v17 = vadd.f32 %v2096_v46, %v2028_v22 }
 0x3c0   :  { %2355 = vpow2.f32 %v2332_v49  ;;  %v2102_v4 = vadd.f32 %v2100_v17, %v4405_v9 }
 0x3c2   :  { %v2333_v6 = vmul.f32 -1.442695, %v2102_v4 }
 0x3c4   :  { %2357 = vpow2.f32 %v2333_v6 }
 0x3ca   :  { %v2356_v7 = vpop.eup %2355 }
 0x3cb   :  { %v2109_v11 = vadd.f32 1.0, %v2356_v7 }
 0x3cd   :  { %2359 = vrcp.f32 %v2109_v11 }
 0x3ce   :  { %v2358_v45 = vpop.eup %2357 }
 0x3cf   :  { %v2110_v29 = vadd.f32 1.0, %v2358_v45 }
 0x3d1   :  { %2361 = vrcp.f32 %v2110_v29 }
 0x3d7   :  { %v2360_v61 = vpop.eup %2359 }
 0x3d8   :  { %2116 = vst.msk [vmem:[#allocation8 + $0x10] sm:$0xff] %vm59_vm0, %v2360_v61 }
 0x3db   :  { %v2362_v21 = vpop.eup %2361 }
 0x3dc   :  { %2117 = vst.msk [vmem:[#allocation8 + $0x18] sm:$0xff] %vm59_vm0, %v2362_v21 }
 0x3dd   :  { %2421 = shalt.err (!%p2418_p3)
}
 0x3de   :  { %s2422_s19 = scalar_lea.hbm %s4708_s2, 512 }
 0x3df   :  { %p2423_p4 = scmp.ne.s32.totalorder %s4708_s2, %s2422_s19  ;;  %p2426_p5 = scmp.lt.u32.totalorder %s2422_s19, %s4708_s2 }
 0x3e1   :  { %p2428_p6 = pnand %p2426_p5, %p2423_p4 }
 0x3e3   :  { %2431 = shalt.err (!%p2428_p6)
}
 0x3e4   :  { %2129 = dma.vmem_to_hbm [thread:$0]  %s2124_s4, 512, %s4708_s2, [#allocation5], %s2439_s1, %s2439_s1, %s2440_s22  }
 0x3e5   :  { %2436 = dma.done.wait [#allocation5], 512  }
 0x3e6   :  { %2437 = vsyncadd [#allocation5], 4294966784 }
 0x3e7   :  { %2133 = vsyncpa [#allocation4], 1 }
 0x3e8   :  { %2134 = vsyncpa [#allocation5], 1 }
 0x3e9   :  { %2135 = vsyncpa [#allocation6], 1 }

</bundles_post_ra>
